<compile_context>
chip_gen: v7x
topology: tpu7x:2x2x1
jax: 0.10.0
libtpu: 0.0.40
codegen_flags: <defaults>
</compile_context>

<pallas_src>
import functools

import jax
import jax.numpy as jnp
from jax import lax
from jax.experimental import pallas as pl
from jax.experimental.pallas import tpu as pltpu


# ------------------------------ fused forward kernel ------------------------------

def _fused_forward_kernel(x_ref, ctx_ref,
                          self_wq_ref, self_wkv_ref,
                          cross_wq_ref, cross_wkv_ref,
                          enc_wq_ref, enc_wkv_ref,
                          dec_ln_g_ref, dec_ln_b_ref, enc_ln_g_ref, enc_ln_b_ref,
                          dec_ff1w_ref, dec_ff1b_ref, dec_ff2w_ref, dec_ff2b_ref,
                          enc_ff1w_ref, enc_ff1b_ref, enc_ff2w_ref, enc_ff2b_ref,
                          embT_ref, lmb_ref,
                          out_ref, *, T1, T2, H, hs, L):
    C = H * hs
    HC = H * C
    scale = float(hs) ** -0.5

    # ---- layer-invariant constants, hoisted out of the block loop ----
    row = lax.broadcasted_iota(jnp.int32, (T2, T2), 0)
    col = lax.broadcasted_iota(jnp.int32, (T2, T2), 1)
    causal_keep = col <= row

    def layernorm(z, g, b):
        # LayerNorm over channels, eps = 1e-5, biased variance (PyTorch default), f32 math.
        mu = jnp.mean(z, axis=-1, keepdims=True)
        var = jnp.mean(jnp.square(z - mu), axis=-1, keepdims=True)
        return (z - mu) * lax.rsqrt(var + 1e-5) * g + b

    def attention(z_q, z_kv, wq, wkv, causal, softmax):
        # z_q: (Tq, C) f32, z_kv: (Tk, C) f32.
        # wq : (C, H*C)      bf16, per-head-masked query projections  -> lane-dense output.
        # wkv: (C, H*C + C)  bf16, [per-head-masked V | block-diagonal K].
        Tq = z_q.shape[0]
        z_q16 = z_q.astype(jnp.bfloat16)
        z_kv16 = z_q16 if z_kv is z_q else z_kv.astype(jnp.bfloat16)

        qall = jnp.dot(z_q16, wq, preferred_element_type=jnp.float32)     # (Tq, H*C)
        kvall = jnp.dot(z_kv16, wkv, preferred_element_type=jnp.float32)  # (Tk, H*C + C)
        k = kvall[:, HC:HC + C].astype(jnp.bfloat16)                      # (Tk, C)

        out = jnp.zeros((Tq, C), jnp.float32)
        for h in range(H):
            # Head-h query / value live only in head-h channels (rest are exact zeros baked
            # into the packed weights) -> no VPU masking needed anywhere below.
            qh = qall[:, h * C:(h + 1) * C].astype(jnp.bfloat16)          # (Tq, C)
            vh = kvall[:, h * C:(h + 1) * C].astype(jnp.bfloat16)         # (Tk, C)
            s = lax.dot_general(qh, k, (((1,), (1,)), ((), ())),
                                preferred_element_type=jnp.float32) * scale
            if causal:
                s = jnp.where(causal_keep, s, -jnp.inf)
            if softmax:
                m = jnp.max(s, axis=-1, keepdims=True)
                e = jnp.exp(s - m)
                p = e / jnp.sum(e, axis=-1, keepdims=True)
            else:
                p = s   # reference CrossAttention applies NO softmax — reproduced exactly.
            # vh is zero outside head-h channels, so the sum over heads IS the concat.
            out = out + jnp.dot(p.astype(jnp.bfloat16), vh,
                                preferred_element_type=jnp.float32)
        return out

    def ffn(z, w1, b1, w2, b2):
        h1 = jnp.dot(z.astype(jnp.bfloat16), w1, preferred_element_type=jnp.float32) + b1
        h1 = jnp.maximum(h1, 0.0)
        return jnp.dot(h1.astype(jnp.bfloat16), w2, preferred_element_type=jnp.float32) + b2

    x = x_ref[0]      # (T2, C) f32
    ctx = ctx_ref[0]  # (T1, C) f32

    for l in range(L):   # statically unrolled; all per-layer weights stay resident in VMEM
        # --- decoder: masked self-attention + LayerNorm1 ---
        a = attention(x, x, self_wq_ref[l], self_wkv_ref[l], causal=True, softmax=True)
        x = layernorm(x + a, dec_ln_g_ref[l, 0], dec_ln_b_ref[l, 0])

        # --- nested encoder block on the context stream ---
        ea = attention(ctx, ctx, enc_wq_ref[l], enc_wkv_ref[l], causal=False, softmax=True)
        ctx = layernorm(ctx + ea, enc_ln_g_ref[l, 0], enc_ln_b_ref[l, 0])
        eff = ffn(ctx, enc_ff1w_ref[l], enc_ff1b_ref[l], enc_ff2w_ref[l], enc_ff2b_ref[l])
        ctx = layernorm(ctx + eff, enc_ln_g_ref[l, 1], enc_ln_b_ref[l, 1])

        # --- decoder: cross-attention (no softmax) + LayerNorm2 ---
        ca = attention(x, ctx, cross_wq_ref[l], cross_wkv_ref[l], causal=False, softmax=False)
        x = layernorm(x + ca, dec_ln_g_ref[l, 1], dec_ln_b_ref[l, 1])

        # --- decoder: FFN + LayerNorm3 ---
        dff = ffn(x, dec_ff1w_ref[l], dec_ff1b_ref[l], dec_ff2w_ref[l], dec_ff2b_ref[l])
        x = layernorm(x + dff, dec_ln_g_ref[l, 2], dec_ln_b_ref[l, 2])

    # Weight-tied LM head, lane-dense (V padded to a multiple of 128), kept in f32.
    out_ref[0] = jnp.dot(x, embT_ref[...], preferred_element_type=jnp.float32) + lmb_ref[...]


# ------------------------------ cost estimate ------------------------------

def _estimate_cost(B, T1, T2, C, H, L, Vp, weights):
    HC = H * C

    def attn_flops(Tq, Tk):
        proj = 2 * Tq * C * HC + 2 * Tk * C * (HC + C)
        sv = H * (2 * Tq * Tk * C + 2 * Tq * Tk * C)
        return proj + sv

    def ffn_flops(T):
        return 2 * (2 * T * C * 4 * C)

    per_layer = (attn_flops(T2, T2) + attn_flops(T1, T1) + attn_flops(T2, T1)
                 + ffn_flops(T2) + ffn_flops(T1))
    flops = B * (L * per_layer + 2 * T2 * C * Vp)
    transcendentals = B * L * (H * (T2 * T2 + T1 * T1) + 3 * T2 + 2 * T1)
    bytes_acc = (B * T2 * C * 4 + B * T1 * C * 4 + B * T2 * Vp * 4
                 + sum(int(w.size) * w.dtype.itemsize for w in weights))
    return int(flops), int(transcendentals), int(bytes_acc)


# ------------------------------ model forward ------------------------------

@functools.partial(jax.jit, static_argnames=('no_of_heads',))
def translation_forward(packed, context_ids, x_ids, *, no_of_heads):
    emb = packed['emb']
    V, C = emb.shape
    Vp = packed['emb_T_pad'].shape[1]
    B, T2 = x_ids.shape
    _, T1 = context_ids.shape
    L = packed['self_wq'].shape[0]
    H = no_of_heads
    hs = C // H

    # Embedding lookups + positional embeddings (tiny XLA gathers feeding the fused kernel).
    x0 = packed['pos2'][None, :, :] + emb[x_ids]           # (B, T2, C)
    ctx0 = packed['pos1'][None, :, :] + emb[context_ids]   # (B, T1, C)

    kernel = functools.partial(_fused_forward_kernel, T1=T1, T2=T2, H=H, hs=hs, L=L)

    weights = (packed['self_wq'], packed['self_wkv'],
               packed['cross_wq'], packed['cross_wkv'],
               packed['enc_wq'], packed['enc_wkv'],
               packed['dec_ln_g'], packed['dec_ln_b'],
               packed['enc_ln_g'], packed['enc_ln_b'],
               packed['dec_ff1_w'], packed['dec_ff1_b'],
               packed['dec_ff2_w'], packed['dec_ff2_b'],
               packed['enc_ff1_w'], packed['enc_ff1_b'],
               packed['enc_ff2_w'], packed['enc_ff2_b'],
               packed['emb_T_pad'], packed['lm_b_pad'])

    def _resident(a):
        # Full-array block with a constant index_map -> DMA'd once, resident across grid steps.
        return pl.BlockSpec(a.shape, lambda b, _nd=a.ndim: (0,) * _nd)

    in_specs = [pl.BlockSpec((1, T2, C), lambda b: (b, 0, 0)),
                pl.BlockSpec((1, T1, C), lambda b: (b, 0, 0))] + [_resident(w) for w in weights]
    out_specs = pl.BlockSpec((1, T2, Vp), lambda b: (b, 0, 0))

    flops, transcendentals, bytes_acc = _estimate_cost(B, T1, T2, C, H, L, Vp, weights)

    logits_pad = pl.pallas_call(
        kernel,
        out_shape=jax.ShapeDtypeStruct((B, T2, Vp), jnp.float32),
        grid=(B,),
        in_specs=in_specs,
        out_specs=out_specs,
        compiler_params=pltpu.CompilerParams(
            dimension_semantics=("parallel",),
            vmem_limit_bytes=32 * 1024 * 1024),
        cost_estimate=pl.CostEstimate(flops=flops, transcendentals=transcendentals,
                                      bytes_accessed=bytes_acc),
    )(x0, ctx0, *weights)

    return logits_pad[:, :, :V]


# ------------------------------ parameter packing ------------------------------

def pack_params(params, no_of_heads):
    """Stack per-block weights; bake per-head channel masks into fused Q / [V|K] matrices."""
    V, C = params['emb'].shape
    H = no_of_heads
    hs = C // H
    HC = H * C
    Vp = ((V + 127) // 128) * 128
    bf = jnp.bfloat16

    def pack_attn(p):
        # Per-head nn.Linear weights (H, hs, hs): y_h = x_h @ W_h^T.
        # wq  columns [h*C:(h+1)*C)  = per-head-masked query projection for head h.
        # wkv columns [h*C:(h+1)*C)  = per-head-masked value projection for head h,
        #     columns [H*C:H*C+C)    = block-diagonal key projection (all heads).
        wq = jnp.zeros((C, HC), jnp.float32)
        wkv = jnp.zeros((C, HC + C), jnp.float32)
        for h in range(H):
            r0, r1 = h * hs, (h + 1) * hs
            wq = wq.at[r0:r1, h * C + r0:h * C + r1].set(p['wq'][h].T)
            wkv = wkv.at[r0:r1, h * C + r0:h * C + r1].set(p['wv'][h].T)
            wkv = wkv.at[r0:r1, HC + r0:HC + r1].set(p['wk'][h].T)
        return wq.astype(bf), wkv.astype(bf)

    blocks = params['blocks']
    L = len(blocks)
    self_p = [pack_attn(p['self']) for p in blocks]
    cross_p = [pack_attn(p['cross']) for p in blocks]
    enc_p = [pack_attn(p['enc']['self']) for p in blocks]

    # Lane-dense tied LM head: zero-pad V -> Vp (multiple of 128).
    emb_T_pad = jnp.zeros((C, Vp), jnp.float32).at[:, :V].set(params['emb'].T)
    lm_b_pad = jnp.zeros((1, Vp), jnp.float32).at[:, :V].set(params['lm_b'].reshape(1, V))

    return {
        'emb': params['emb'],
        'pos1': params['pos1'],
        'pos2': params['pos2'],
        'emb_T_pad': emb_T_pad,                                        # (C, Vp) f32
        'lm_b_pad': lm_b_pad,                                          # (1, Vp) f32
        'self_wq': jnp.stack([q for q, _ in self_p]),                  # (L, C, H*C)   bf16
        'self_wkv': jnp.stack([kv for _, kv in self_p]),               # (L, C, H*C+C) bf16
        'cross_wq': jnp.stack([q for q, _ in cross_p]),
        'cross_wkv': jnp.stack([kv for _, kv in cross_p]),
        'enc_wq': jnp.stack([q for q, _ in enc_p]),
        'enc_wkv': jnp.stack([kv for _, kv in enc_p]),
        'dec_ln_g': jnp.stack([jnp.stack([p['ln1_g'], p['ln2_g'], p['ln3_g']])
                               for p in blocks]).reshape(L, 3, 1, C),
        'dec_ln_b': jnp.stack([jnp.stack([p['ln1_b'], p['ln2_b'], p['ln3_b']])
                               for p in blocks]).reshape(L, 3, 1, C),
        'enc_ln_g': jnp.stack([jnp.stack([p['enc']['ln1_g'], p['enc']['ln2_g']])
                               for p in blocks]).reshape(L, 2, 1, C),
        'enc_ln_b': jnp.stack([jnp.stack([p['enc']['ln1_b'], p['enc']['ln2_b']])
                               for p in blocks]).reshape(L, 2, 1, C),
        'dec_ff1_w': jnp.stack([p['ff1_w'].T for p in blocks]).astype(bf),   # (L, C, 4C)
        'dec_ff1_b': jnp.stack([p['ff1_b'].reshape(1, -1) for p in blocks]),
        'dec_ff2_w': jnp.stack([p['ff2_w'].T for p in blocks]).astype(bf),   # (L, 4C, C)
        'dec_ff2_b': jnp.stack([p['ff2_b'].reshape(1, -1) for p in blocks]),
        'enc_ff1_w': jnp.stack([p['enc']['ff1_w'].T for p in blocks]).astype(bf),
        'enc_ff1_b': jnp.stack([p['enc']['ff1_b'].reshape(1, -1) for p in blocks]),
        'enc_ff2_w': jnp.stack([p['enc']['ff2_w'].T for p in blocks]).astype(bf),
        'enc_ff2_b': jnp.stack([p['enc']['ff2_b'].reshape(1, -1) for p in blocks]),
    }


# ------------------------------ parameter init ------------------------------

def init_params(key, heads, no_of_heads, tokens_size, T1, T2, no_of_blocks):
    hs = heads // no_of_heads
    keys = iter(jax.random.split(key, 4096))

    def w(shape, scale=0.02):
        return (scale * jax.random.normal(next(keys), shape)).astype(jnp.float32)

    def ln(c):
        return jnp.ones((c,), jnp.float32), jnp.zeros((c,), jnp.float32)

    def attn_weights():
        return {'wq': w((no_of_heads, hs, hs)),
                'wk': w((no_of_heads, hs, hs)),
                'wv': w((no_of_heads, hs, hs))}

    def ffn_weights():
        return (w((4 * heads, heads)), jnp.zeros((4 * heads,), jnp.float32),
                w((heads, 4 * heads)), jnp.zeros((heads,), jnp.float32))

    def block_params():
        ln1 = ln(heads); ln2 = ln(heads); ln3 = ln(heads)
        f1w, f1b, f2w, f2b = ffn_weights()
        e_ln1 = ln(heads); e_ln2 = ln(heads)
        ef1w, ef1b, ef2w, ef2b = ffn_weights()
        return {
            'self': attn_weights(),
            'cross': attn_weights(),
            'ln1_g': ln1[0], 'ln1_b': ln1[1],
            'ln2_g': ln2[0], 'ln2_b': ln2[1],
            'ln3_g': ln3[0], 'ln3_b': ln3[1],
            'ff1_w': f1w, 'ff1_b': f1b, 'ff2_w': f2w, 'ff2_b': f2b,
            'enc': {
                'self': attn_weights(),
                'ln1_g': e_ln1[0], 'ln1_b': e_ln1[1],
                'ln2_g': e_ln2[0], 'ln2_b': e_ln2[1],
                'ff1_w': ef1w, 'ff1_b': ef1b, 'ff2_w': ef2w, 'ff2_b': ef2b,
            },
        }

    return {
        'emb': w((tokens_size, heads)),   # shared embedding / LM-head weight
        'pos1': w((T1, heads)),
        'pos2': w((T2, heads)),
        'lm_b': jnp.zeros((tokens_size,), jnp.float32),
        'blocks': [block_params() for _ in range(no_of_blocks)],
    }


# ----------------------------------- main -----------------------------------

if __name__ == "__main__":
    heads = 32          # model dim (nn.Embedding(tokens_size, heads))
    no_of_heads = 4     # fixed default in TransformerBlock
    tokens_size = 64
    T1, T2 = 16, 8
    no_of_blocks = 2
    B = 2

    key = jax.random.PRNGKey(0)
    pkey, ckey, xkey = jax.random.split(key, 3)
    params = init_params(pkey, heads, no_of_heads, tokens_size, T1, T2, no_of_blocks)
    packed = pack_params(params, no_of_heads)
    context_ids = jax.random.randint(ckey, (B, T1), 0, tokens_size, dtype=jnp.int32)
    x_ids = jax.random.randint(xkey, (B, T2), 0, tokens_size, dtype=jnp.int32)

    logits = translation_forward(packed, context_ids, x_ids, no_of_heads=no_of_heads)
    logits = jax.block_until_ready(logits)

    assert logits.shape == (B, T2, tokens_size), logits.shape
    assert bool(jnp.all(jnp.isfinite(logits)))
    print("KERNEL_OK")
</pallas_src>

<mosaic_0001>
module attributes {stable_mosaic.version = 11 : i64} {
  func.func @_fused_forward_kernel(%arg0: i32, %arg1: memref<1x8x32xf32, #tpu.memory_space<vmem>>, %arg2: memref<1x16x32xf32, #tpu.memory_space<vmem>>, %arg3: memref<2x32x128xbf16, #tpu.memory_space<vmem>>, %arg4: memref<2x32x160xbf16, #tpu.memory_space<vmem>>, %arg5: memref<2x32x128xbf16, #tpu.memory_space<vmem>>, %arg6: memref<2x32x160xbf16, #tpu.memory_space<vmem>>, %arg7: memref<2x32x128xbf16, #tpu.memory_space<vmem>>, %arg8: memref<2x32x160xbf16, #tpu.memory_space<vmem>>, %arg9: memref<2x3x1x32xf32, #tpu.memory_space<vmem>>, %arg10: memref<2x3x1x32xf32, #tpu.memory_space<vmem>>, %arg11: memref<2x2x1x32xf32, #tpu.memory_space<vmem>>, %arg12: memref<2x2x1x32xf32, #tpu.memory_space<vmem>>, %arg13: memref<2x32x128xbf16, #tpu.memory_space<vmem>>, %arg14: memref<2x1x128xf32, #tpu.memory_space<vmem>>, %arg15: memref<2x128x32xbf16, #tpu.memory_space<vmem>>, %arg16: memref<2x1x32xf32, #tpu.memory_space<vmem>>, %arg17: memref<2x32x128xbf16, #tpu.memory_space<vmem>>, %arg18: memref<2x1x128xf32, #tpu.memory_space<vmem>>, %arg19: memref<2x128x32xbf16, #tpu.memory_space<vmem>>, %arg20: memref<2x1x32xf32, #tpu.memory_space<vmem>>, %arg21: memref<32x128xf32, #tpu.memory_space<vmem>>, %arg22: memref<1x128xf32, #tpu.memory_space<vmem>>, %arg23: memref<1x8x128xf32, #tpu.memory_space<vmem>>) attributes {dimension_semantics = [#tpu.dimension_semantics<parallel>], iteration_bounds = array<i64: 2>, scalar_prefetch = 0 : i64, scratch_operands = 0 : i64, tpu.core_type = #tpu.core_type<tc>, window_params = [{transform_indices = @transform_0, window_bounds = array<i64: 1, 8, 32>}, {transform_indices = @transform_1, window_bounds = array<i64: 1, 16, 32>}, {pipeline_mode = #tpu.pipeline_mode<synchronous>, transform_indices = @transform_2, window_bounds = array<i64: 2, 32, 128>}, {pipeline_mode = #tpu.pipeline_mode<synchronous>, transform_indices = @transform_3, window_bounds = array<i64: 2, 32, 160>}, {pipeline_mode = #tpu.pipeline_mode<synchronous>, transform_indices = @transform_4, window_bounds = array<i64: 2, 32, 128>}, {pipeline_mode = #tpu.pipeline_mode<synchronous>, transform_indices = @transform_5, window_bounds = array<i64: 2, 32, 160>}, {pipeline_mode = #tpu.pipeline_mode<synchronous>, transform_indices = @transform_6, window_bounds = array<i64: 2, 32, 128>}, {pipeline_mode = #tpu.pipeline_mode<synchronous>, transform_indices = @transform_7, window_bounds = array<i64: 2, 32, 160>}, {pipeline_mode = #tpu.pipeline_mode<synchronous>, transform_indices = @transform_8, window_bounds = array<i64: 2, 3, 1, 32>}, {pipeline_mode = #tpu.pipeline_mode<synchronous>, transform_indices = @transform_9, window_bounds = array<i64: 2, 3, 1, 32>}, {pipeline_mode = #tpu.pipeline_mode<synchronous>, transform_indices = @transform_10, window_bounds = array<i64: 2, 2, 1, 32>}, {pipeline_mode = #tpu.pipeline_mode<synchronous>, transform_indices = @transform_11, window_bounds = array<i64: 2, 2, 1, 32>}, {pipeline_mode = #tpu.pipeline_mode<synchronous>, transform_indices = @transform_12, window_bounds = array<i64: 2, 32, 128>}, {pipeline_mode = #tpu.pipeline_mode<synchronous>, transform_indices = @transform_13, window_bounds = array<i64: 2, 1, 128>}, {pipeline_mode = #tpu.pipeline_mode<synchronous>, transform_indices = @transform_14, window_bounds = array<i64: 2, 128, 32>}, {pipeline_mode = #tpu.pipeline_mode<synchronous>, transform_indices = @transform_15, window_bounds = array<i64: 2, 1, 32>}, {pipeline_mode = #tpu.pipeline_mode<synchronous>, transform_indices = @transform_16, window_bounds = array<i64: 2, 32, 128>}, {pipeline_mode = #tpu.pipeline_mode<synchronous>, transform_indices = @transform_17, window_bounds = array<i64: 2, 1, 128>}, {pipeline_mode = #tpu.pipeline_mode<synchronous>, transform_indices = @transform_18, window_bounds = array<i64: 2, 128, 32>}, {pipeline_mode = #tpu.pipeline_mode<synchronous>, transform_indices = @transform_19, window_bounds = array<i64: 2, 1, 32>}, {pipeline_mode = #tpu.pipeline_mode<synchronous>, transform_indices = @transform_20, window_bounds = array<i64: 32, 128>}, {pipeline_mode = #tpu.pipeline_mode<synchronous>, transform_indices = @transform_21, window_bounds = array<i64: 1, 128>}, {transform_indices = @transform_22, window_bounds = array<i64: 1, 8, 128>}]} {
    %0 = tpu.iota {dimensions = array<i32: 0>} : vector<8x8xi32>
    %1 = tpu.iota {dimensions = array<i32: 1>} : vector<8x8xi32>
    %2 = arith.cmpi sle, %1, %0 : vector<8x8xi32>
    %c0 = arith.constant 0 : index
    %c0_0 = arith.constant 0 : index
    %c0_1 = arith.constant 0 : index
    %3 = vector.load %arg1[%c0, %c0_0, %c0_1] : memref<1x8x32xf32, #tpu.memory_space<vmem>>, vector<1x8x32xf32>
    %4 = vector.shape_cast %3 : vector<1x8x32xf32> to vector<8x32xf32>
    %c0_2 = arith.constant 0 : index
    %c0_3 = arith.constant 0 : index
    %c0_4 = arith.constant 0 : index
    %5 = vector.load %arg2[%c0_2, %c0_3, %c0_4] : memref<1x16x32xf32, #tpu.memory_space<vmem>>, vector<1x16x32xf32>
    %6 = vector.shape_cast %5 : vector<1x16x32xf32> to vector<16x32xf32>
    %c0_5 = arith.constant 0 : index
    %c0_6 = arith.constant 0 : index
    %c0_7 = arith.constant 0 : index
    %7 = vector.load %arg3[%c0_5, %c0_6, %c0_7] : memref<2x32x128xbf16, #tpu.memory_space<vmem>>, vector<1x32x128xbf16>
    %8 = vector.shape_cast %7 : vector<1x32x128xbf16> to vector<32x128xbf16>
    %c0_8 = arith.constant 0 : index
    %c0_9 = arith.constant 0 : index
    %c0_10 = arith.constant 0 : index
    %9 = vector.load %arg4[%c0_8, %c0_9, %c0_10] : memref<2x32x160xbf16, #tpu.memory_space<vmem>>, vector<1x32x160xbf16>
    %10 = vector.shape_cast %9 : vector<1x32x160xbf16> to vector<32x160xbf16>
    %11 = arith.truncf %4 : vector<8x32xf32> to vector<8x32xbf16>
    %cst = arith.constant dense<0.000000e+00> : vector<8x128xf32>
    %12 = tpu.matmul %11, %8, %cst {dimension_numbers = #tpu.dot_dimension_numbers<[1], [0], [0], [1], [0, 0, 1, 1], [], []>} : vector<8x32xbf16>, vector<32x128xbf16>, vector<8x128xf32> -> vector<8x128xf32>
    %cst_11 = arith.constant dense<0.000000e+00> : vector<8x160xf32>
    %13 = tpu.matmul %11, %10, %cst_11 {dimension_numbers = #tpu.dot_dimension_numbers<[1], [0], [0], [1], [0, 0, 1, 1], [], []>} : vector<8x32xbf16>, vector<32x160xbf16>, vector<8x160xf32> -> vector<8x160xf32>
    %14 = vector.extract_strided_slice %13 {offsets = [0, 128], sizes = [8, 32], strides = [1, 1]} : vector<8x160xf32> to vector<8x32xf32>
    %15 = arith.truncf %14 : vector<8x32xf32> to vector<8x32xbf16>
    %cst_12 = arith.constant 0.000000e+00 : f32
    %16 = vector.broadcast %cst_12 : f32 to vector<8x32xf32>
    %17 = vector.extract_strided_slice %12 {offsets = [0, 0], sizes = [8, 32], strides = [1, 1]} : vector<8x128xf32> to vector<8x32xf32>
    %18 = arith.truncf %17 : vector<8x32xf32> to vector<8x32xbf16>
    %19 = vector.extract_strided_slice %13 {offsets = [0, 0], sizes = [8, 32], strides = [1, 1]} : vector<8x160xf32> to vector<8x32xf32>
    %20 = arith.truncf %19 : vector<8x32xf32> to vector<8x32xbf16>
    %cst_13 = arith.constant dense<0.000000e+00> : vector<8x8xf32>
    %21 = tpu.matmul %18, %15, %cst_13 {dimension_numbers = #tpu.dot_dimension_numbers<[1], [1], [0], [0], [0, 0, 1, 0], [], []>} : vector<8x32xbf16>, vector<8x32xbf16>, vector<8x8xf32> -> vector<8x8xf32>
    %cst_14 = arith.constant 0.353553385 : f32
    %22 = vector.broadcast %cst_14 : f32 to vector<8x8xf32>
    %23 = arith.mulf %21, %22 : vector<8x8xf32>
    %cst_15 = arith.constant 0xFF800000 : f32
    %24 = vector.broadcast %cst_15 : f32 to vector<8x8xf32>
    %25 = arith.select %2, %23, %24 : vector<8x8xi1>, vector<8x8xf32>
    %cst_16 = arith.constant dense<0xFF800000> : vector<8xf32>
    %26 = vector.multi_reduction <maximumf>, %25, %cst_16 [1] : vector<8x8xf32> to vector<8xf32>
    %27 = vector.shape_cast %26 : vector<8xf32> to vector<8x1xf32>
    %28 = vector.broadcast %27 : vector<8x1xf32> to vector<8x8xf32>
    %29 = arith.subf %25, %28 : vector<8x8xf32>
    %30 = math.exp %29 : vector<8x8xf32>
    %cst_17 = arith.constant dense<0.000000e+00> : vector<8xf32>
    %31 = vector.multi_reduction <add>, %30, %cst_17 [1] : vector<8x8xf32> to vector<8xf32>
    %32 = vector.shape_cast %31 : vector<8xf32> to vector<8x1xf32>
    %33 = vector.broadcast %32 : vector<8x1xf32> to vector<8x8xf32>
    %34 = arith.divf %30, %33 : vector<8x8xf32>
    %35 = arith.truncf %34 : vector<8x8xf32> to vector<8x8xbf16>
    %cst_18 = arith.constant dense<0.000000e+00> : vector<8x32xf32>
    %36 = tpu.matmul %35, %20, %cst_18 {dimension_numbers = #tpu.dot_dimension_numbers<[1], [0], [0], [1], [0, 0, 1, 1], [], []>} : vector<8x8xbf16>, vector<8x32xbf16>, vector<8x32xf32> -> vector<8x32xf32>
    %37 = arith.addf %16, %36 : vector<8x32xf32>
    %38 = vector.extract_strided_slice %12 {offsets = [0, 32], sizes = [8, 32], strides = [1, 1]} : vector<8x128xf32> to vector<8x32xf32>
    %39 = arith.truncf %38 : vector<8x32xf32> to vector<8x32xbf16>
    %40 = vector.extract_strided_slice %13 {offsets = [0, 32], sizes = [8, 32], strides = [1, 1]} : vector<8x160xf32> to vector<8x32xf32>
    %41 = arith.truncf %40 : vector<8x32xf32> to vector<8x32xbf16>
    %cst_19 = arith.constant dense<0.000000e+00> : vector<8x8xf32>
    %42 = tpu.matmul %39, %15, %cst_19 {dimension_numbers = #tpu.dot_dimension_numbers<[1], [1], [0], [0], [0, 0, 1, 0], [], []>} : vector<8x32xbf16>, vector<8x32xbf16>, vector<8x8xf32> -> vector<8x8xf32>
    %cst_20 = arith.constant 0.353553385 : f32
    %43 = vector.broadcast %cst_20 : f32 to vector<8x8xf32>
    %44 = arith.mulf %42, %43 : vector<8x8xf32>
    %cst_21 = arith.constant 0xFF800000 : f32
    %45 = vector.broadcast %cst_21 : f32 to vector<8x8xf32>
    %46 = arith.select %2, %44, %45 : vector<8x8xi1>, vector<8x8xf32>
    %cst_22 = arith.constant dense<0xFF800000> : vector<8xf32>
    %47 = vector.multi_reduction <maximumf>, %46, %cst_22 [1] : vector<8x8xf32> to vector<8xf32>
    %48 = vector.shape_cast %47 : vector<8xf32> to vector<8x1xf32>
    %49 = vector.broadcast %48 : vector<8x1xf32> to vector<8x8xf32>
    %50 = arith.subf %46, %49 : vector<8x8xf32>
    %51 = math.exp %50 : vector<8x8xf32>
    %cst_23 = arith.constant dense<0.000000e+00> : vector<8xf32>
    %52 = vector.multi_reduction <add>, %51, %cst_23 [1] : vector<8x8xf32> to vector<8xf32>
    %53 = vector.shape_cast %52 : vector<8xf32> to vector<8x1xf32>
    %54 = vector.broadcast %53 : vector<8x1xf32> to vector<8x8xf32>
    %55 = arith.divf %51, %54 : vector<8x8xf32>
    %56 = arith.truncf %55 : vector<8x8xf32> to vector<8x8xbf16>
    %cst_24 = arith.constant dense<0.000000e+00> : vector<8x32xf32>
    %57 = tpu.matmul %56, %41, %cst_24 {dimension_numbers = #tpu.dot_dimension_numbers<[1], [0], [0], [1], [0, 0, 1, 1], [], []>} : vector<8x8xbf16>, vector<8x32xbf16>, vector<8x32xf32> -> vector<8x32xf32>
    %58 = arith.addf %37, %57 : vector<8x32xf32>
    %59 = vector.extract_strided_slice %12 {offsets = [0, 64], sizes = [8, 32], strides = [1, 1]} : vector<8x128xf32> to vector<8x32xf32>
    %60 = arith.truncf %59 : vector<8x32xf32> to vector<8x32xbf16>
    %61 = vector.extract_strided_slice %13 {offsets = [0, 64], sizes = [8, 32], strides = [1, 1]} : vector<8x160xf32> to vector<8x32xf32>
    %62 = arith.truncf %61 : vector<8x32xf32> to vector<8x32xbf16>
    %cst_25 = arith.constant dense<0.000000e+00> : vector<8x8xf32>
    %63 = tpu.matmul %60, %15, %cst_25 {dimension_numbers = #tpu.dot_dimension_numbers<[1], [1], [0], [0], [0, 0, 1, 0], [], []>} : vector<8x32xbf16>, vector<8x32xbf16>, vector<8x8xf32> -> vector<8x8xf32>
    %cst_26 = arith.constant 0.353553385 : f32
    %64 = vector.broadcast %cst_26 : f32 to vector<8x8xf32>
    %65 = arith.mulf %63, %64 : vector<8x8xf32>
    %cst_27 = arith.constant 0xFF800000 : f32
    %66 = vector.broadcast %cst_27 : f32 to vector<8x8xf32>
    %67 = arith.select %2, %65, %66 : vector<8x8xi1>, vector<8x8xf32>
    %cst_28 = arith.constant dense<0xFF800000> : vector<8xf32>
    %68 = vector.multi_reduction <maximumf>, %67, %cst_28 [1] : vector<8x8xf32> to vector<8xf32>
    %69 = vector.shape_cast %68 : vector<8xf32> to vector<8x1xf32>
    %70 = vector.broadcast %69 : vector<8x1xf32> to vector<8x8xf32>
    %71 = arith.subf %67, %70 : vector<8x8xf32>
    %72 = math.exp %71 : vector<8x8xf32>
    %cst_29 = arith.constant dense<0.000000e+00> : vector<8xf32>
    %73 = vector.multi_reduction <add>, %72, %cst_29 [1] : vector<8x8xf32> to vector<8xf32>
    %74 = vector.shape_cast %73 : vector<8xf32> to vector<8x1xf32>
    %75 = vector.broadcast %74 : vector<8x1xf32> to vector<8x8xf32>
    %76 = arith.divf %72, %75 : vector<8x8xf32>
    %77 = arith.truncf %76 : vector<8x8xf32> to vector<8x8xbf16>
    %cst_30 = arith.constant dense<0.000000e+00> : vector<8x32xf32>
    %78 = tpu.matmul %77, %62, %cst_30 {dimension_numbers = #tpu.dot_dimension_numbers<[1], [0], [0], [1], [0, 0, 1, 1], [], []>} : vector<8x8xbf16>, vector<8x32xbf16>, vector<8x32xf32> -> vector<8x32xf32>
    %79 = arith.addf %58, %78 : vector<8x32xf32>
    %80 = vector.extract_strided_slice %12 {offsets = [0, 96], sizes = [8, 32], strides = [1, 1]} : vector<8x128xf32> to vector<8x32xf32>
    %81 = arith.truncf %80 : vector<8x32xf32> to vector<8x32xbf16>
    %82 = vector.extract_strided_slice %13 {offsets = [0, 96], sizes = [8, 32], strides = [1, 1]} : vector<8x160xf32> to vector<8x32xf32>
    %83 = arith.truncf %82 : vector<8x32xf32> to vector<8x32xbf16>
    %cst_31 = arith.constant dense<0.000000e+00> : vector<8x8xf32>
    %84 = tpu.matmul %81, %15, %cst_31 {dimension_numbers = #tpu.dot_dimension_numbers<[1], [1], [0], [0], [0, 0, 1, 0], [], []>} : vector<8x32xbf16>, vector<8x32xbf16>, vector<8x8xf32> -> vector<8x8xf32>
    %cst_32 = arith.constant 0.353553385 : f32
    %85 = vector.broadcast %cst_32 : f32 to vector<8x8xf32>
    %86 = arith.mulf %84, %85 : vector<8x8xf32>
    %cst_33 = arith.constant 0xFF800000 : f32
    %87 = vector.broadcast %cst_33 : f32 to vector<8x8xf32>
    %88 = arith.select %2, %86, %87 : vector<8x8xi1>, vector<8x8xf32>
    %cst_34 = arith.constant dense<0xFF800000> : vector<8xf32>
    %89 = vector.multi_reduction <maximumf>, %88, %cst_34 [1] : vector<8x8xf32> to vector<8xf32>
    %90 = vector.shape_cast %89 : vector<8xf32> to vector<8x1xf32>
    %91 = vector.broadcast %90 : vector<8x1xf32> to vector<8x8xf32>
    %92 = arith.subf %88, %91 : vector<8x8xf32>
    %93 = math.exp %92 : vector<8x8xf32>
    %cst_35 = arith.constant dense<0.000000e+00> : vector<8xf32>
    %94 = vector.multi_reduction <add>, %93, %cst_35 [1] : vector<8x8xf32> to vector<8xf32>
    %95 = vector.shape_cast %94 : vector<8xf32> to vector<8x1xf32>
    %96 = vector.broadcast %95 : vector<8x1xf32> to vector<8x8xf32>
    %97 = arith.divf %93, %96 : vector<8x8xf32>
    %98 = arith.truncf %97 : vector<8x8xf32> to vector<8x8xbf16>
    %cst_36 = arith.constant dense<0.000000e+00> : vector<8x32xf32>
    %99 = tpu.matmul %98, %83, %cst_36 {dimension_numbers = #tpu.dot_dimension_numbers<[1], [0], [0], [1], [0, 0, 1, 1], [], []>} : vector<8x8xbf16>, vector<8x32xbf16>, vector<8x32xf32> -> vector<8x32xf32>
    %100 = arith.addf %79, %99 : vector<8x32xf32>
    %101 = arith.addf %4, %100 : vector<8x32xf32>
    %c0_37 = arith.constant 0 : index
    %c0_38 = arith.constant 0 : index
    %c0_39 = arith.constant 0 : index
    %c0_40 = arith.constant 0 : index
    %102 = vector.load %arg9[%c0_37, %c0_38, %c0_39, %c0_40] : memref<2x3x1x32xf32, #tpu.memory_space<vmem>>, vector<1x1x1x32xf32>
    %103 = vector.shape_cast %102 : vector<1x1x1x32xf32> to vector<1x32xf32>
    %c0_41 = arith.constant 0 : index
    %c0_42 = arith.constant 0 : index
    %c0_43 = arith.constant 0 : index
    %c0_44 = arith.constant 0 : index
    %104 = vector.load %arg10[%c0_41, %c0_42, %c0_43, %c0_44] : memref<2x3x1x32xf32, #tpu.memory_space<vmem>>, vector<1x1x1x32xf32>
    %105 = vector.shape_cast %104 : vector<1x1x1x32xf32> to vector<1x32xf32>
    %cst_45 = arith.constant dense<0.000000e+00> : vector<8xf32>
    %106 = vector.multi_reduction <add>, %101, %cst_45 [1] : vector<8x32xf32> to vector<8xf32>
    %107 = vector.shape_cast %106 : vector<8xf32> to vector<8x1xf32>
    %cst_46 = arith.constant 3.200000e+01 : f32
    %108 = vector.broadcast %cst_46 : f32 to vector<8x1xf32>
    %109 = arith.divf %107, %108 : vector<8x1xf32>
    %110 = vector.broadcast %109 : vector<8x1xf32> to vector<8x32xf32>
    %111 = arith.subf %101, %110 : vector<8x32xf32>
    %112 = arith.mulf %111, %111 : vector<8x32xf32>
    %cst_47 = arith.constant dense<0.000000e+00> : vector<8xf32>
    %113 = vector.multi_reduction <add>, %112, %cst_47 [1] : vector<8x32xf32> to vector<8xf32>
    %114 = vector.shape_cast %113 : vector<8xf32> to vector<8x1xf32>
    %cst_48 = arith.constant 3.200000e+01 : f32
    %115 = vector.broadcast %cst_48 : f32 to vector<8x1xf32>
    %116 = arith.divf %114, %115 : vector<8x1xf32>
    %117 = vector.broadcast %109 : vector<8x1xf32> to vector<8x32xf32>
    %118 = arith.subf %101, %117 : vector<8x32xf32>
    %cst_49 = arith.constant 9.99999974E-6 : f32
    %119 = vector.broadcast %cst_49 : f32 to vector<8x1xf32>
    %120 = arith.addf %116, %119 : vector<8x1xf32>
    %121 = math.rsqrt %120 : vector<8x1xf32>
    %122 = vector.broadcast %121 : vector<8x1xf32> to vector<8x32xf32>
    %123 = arith.mulf %118, %122 : vector<8x32xf32>
    %124 = vector.broadcast %103 : vector<1x32xf32> to vector<8x32xf32>
    %125 = arith.mulf %123, %124 : vector<8x32xf32>
    %126 = vector.broadcast %105 : vector<1x32xf32> to vector<8x32xf32>
    %127 = arith.addf %125, %126 : vector<8x32xf32>
    %c0_50 = arith.constant 0 : index
    %c0_51 = arith.constant 0 : index
    %c0_52 = arith.constant 0 : index
    %128 = vector.load %arg7[%c0_50, %c0_51, %c0_52] : memref<2x32x128xbf16, #tpu.memory_space<vmem>>, vector<1x32x128xbf16>
    %129 = vector.shape_cast %128 : vector<1x32x128xbf16> to vector<32x128xbf16>
    %c0_53 = arith.constant 0 : index
    %c0_54 = arith.constant 0 : index
    %c0_55 = arith.constant 0 : index
    %130 = vector.load %arg8[%c0_53, %c0_54, %c0_55] : memref<2x32x160xbf16, #tpu.memory_space<vmem>>, vector<1x32x160xbf16>
    %131 = vector.shape_cast %130 : vector<1x32x160xbf16> to vector<32x160xbf16>
    %132 = arith.truncf %6 : vector<16x32xf32> to vector<16x32xbf16>
    %cst_56 = arith.constant dense<0.000000e+00> : vector<16x128xf32>
    %133 = tpu.matmul %132, %129, %cst_56 {dimension_numbers = #tpu.dot_dimension_numbers<[1], [0], [0], [1], [0, 0, 1, 1], [], []>} : vector<16x32xbf16>, vector<32x128xbf16>, vector<16x128xf32> -> vector<16x128xf32>
    %cst_57 = arith.constant dense<0.000000e+00> : vector<16x160xf32>
    %134 = tpu.matmul %132, %131, %cst_57 {dimension_numbers = #tpu.dot_dimension_numbers<[1], [0], [0], [1], [0, 0, 1, 1], [], []>} : vector<16x32xbf16>, vector<32x160xbf16>, vector<16x160xf32> -> vector<16x160xf32>
    %135 = vector.extract_strided_slice %134 {offsets = [0, 128], sizes = [16, 32], strides = [1, 1]} : vector<16x160xf32> to vector<16x32xf32>
    %136 = arith.truncf %135 : vector<16x32xf32> to vector<16x32xbf16>
    %cst_58 = arith.constant 0.000000e+00 : f32
    %137 = vector.broadcast %cst_58 : f32 to vector<16x32xf32>
    %138 = vector.extract_strided_slice %133 {offsets = [0, 0], sizes = [16, 32], strides = [1, 1]} : vector<16x128xf32> to vector<16x32xf32>
    %139 = arith.truncf %138 : vector<16x32xf32> to vector<16x32xbf16>
    %140 = vector.extract_strided_slice %134 {offsets = [0, 0], sizes = [16, 32], strides = [1, 1]} : vector<16x160xf32> to vector<16x32xf32>
    %141 = arith.truncf %140 : vector<16x32xf32> to vector<16x32xbf16>
    %cst_59 = arith.constant dense<0.000000e+00> : vector<16x16xf32>
    %142 = tpu.matmul %139, %136, %cst_59 {dimension_numbers = #tpu.dot_dimension_numbers<[1], [1], [0], [0], [0, 0, 1, 0], [], []>} : vector<16x32xbf16>, vector<16x32xbf16>, vector<16x16xf32> -> vector<16x16xf32>
    %cst_60 = arith.constant 0.353553385 : f32
    %143 = vector.broadcast %cst_60 : f32 to vector<16x16xf32>
    %144 = arith.mulf %142, %143 : vector<16x16xf32>
    %cst_61 = arith.constant dense<0xFF800000> : vector<16xf32>
    %145 = vector.multi_reduction <maximumf>, %144, %cst_61 [1] : vector<16x16xf32> to vector<16xf32>
    %146 = vector.shape_cast %145 : vector<16xf32> to vector<16x1xf32>
    %147 = vector.broadcast %146 : vector<16x1xf32> to vector<16x16xf32>
    %148 = arith.subf %144, %147 : vector<16x16xf32>
    %149 = math.exp %148 : vector<16x16xf32>
    %cst_62 = arith.constant dense<0.000000e+00> : vector<16xf32>
    %150 = vector.multi_reduction <add>, %149, %cst_62 [1] : vector<16x16xf32> to vector<16xf32>
    %151 = vector.shape_cast %150 : vector<16xf32> to vector<16x1xf32>
    %152 = vector.broadcast %151 : vector<16x1xf32> to vector<16x16xf32>
    %153 = arith.divf %149, %152 : vector<16x16xf32>
    %154 = arith.truncf %153 : vector<16x16xf32> to vector<16x16xbf16>
    %cst_63 = arith.constant dense<0.000000e+00> : vector<16x32xf32>
    %155 = tpu.matmul %154, %141, %cst_63 {dimension_numbers = #tpu.dot_dimension_numbers<[1], [0], [0], [1], [0, 0, 1, 1], [], []>} : vector<16x16xbf16>, vector<16x32xbf16>, vector<16x32xf32> -> vector<16x32xf32>
    %156 = arith.addf %137, %155 : vector<16x32xf32>
    %157 = vector.extract_strided_slice %133 {offsets = [0, 32], sizes = [16, 32], strides = [1, 1]} : vector<16x128xf32> to vector<16x32xf32>
    %158 = arith.truncf %157 : vector<16x32xf32> to vector<16x32xbf16>
    %159 = vector.extract_strided_slice %134 {offsets = [0, 32], sizes = [16, 32], strides = [1, 1]} : vector<16x160xf32> to vector<16x32xf32>
    %160 = arith.truncf %159 : vector<16x32xf32> to vector<16x32xbf16>
    %cst_64 = arith.constant dense<0.000000e+00> : vector<16x16xf32>
    %161 = tpu.matmul %158, %136, %cst_64 {dimension_numbers = #tpu.dot_dimension_numbers<[1], [1], [0], [0], [0, 0, 1, 0], [], []>} : vector<16x32xbf16>, vector<16x32xbf16>, vector<16x16xf32> -> vector<16x16xf32>
    %cst_65 = arith.constant 0.353553385 : f32
    %162 = vector.broadcast %cst_65 : f32 to vector<16x16xf32>
    %163 = arith.mulf %161, %162 : vector<16x16xf32>
    %cst_66 = arith.constant dense<0xFF800000> : vector<16xf32>
    %164 = vector.multi_reduction <maximumf>, %163, %cst_66 [1] : vector<16x16xf32> to vector<16xf32>
    %165 = vector.shape_cast %164 : vector<16xf32> to vector<16x1xf32>
    %166 = vector.broadcast %165 : vector<16x1xf32> to vector<16x16xf32>
    %167 = arith.subf %163, %166 : vector<16x16xf32>
    %168 = math.exp %167 : vector<16x16xf32>
    %cst_67 = arith.constant dense<0.000000e+00> : vector<16xf32>
    %169 = vector.multi_reduction <add>, %168, %cst_67 [1] : vector<16x16xf32> to vector<16xf32>
    %170 = vector.shape_cast %169 : vector<16xf32> to vector<16x1xf32>
    %171 = vector.broadcast %170 : vector<16x1xf32> to vector<16x16xf32>
    %172 = arith.divf %168, %171 : vector<16x16xf32>
    %173 = arith.truncf %172 : vector<16x16xf32> to vector<16x16xbf16>
    %cst_68 = arith.constant dense<0.000000e+00> : vector<16x32xf32>
    %174 = tpu.matmul %173, %160, %cst_68 {dimension_numbers = #tpu.dot_dimension_numbers<[1], [0], [0], [1], [0, 0, 1, 1], [], []>} : vector<16x16xbf16>, vector<16x32xbf16>, vector<16x32xf32> -> vector<16x32xf32>
    %175 = arith.addf %156, %174 : vector<16x32xf32>
    %176 = vector.extract_strided_slice %133 {offsets = [0, 64], sizes = [16, 32], strides = [1, 1]} : vector<16x128xf32> to vector<16x32xf32>
    %177 = arith.truncf %176 : vector<16x32xf32> to vector<16x32xbf16>
    %178 = vector.extract_strided_slice %134 {offsets = [0, 64], sizes = [16, 32], strides = [1, 1]} : vector<16x160xf32> to vector<16x32xf32>
    %179 = arith.truncf %178 : vector<16x32xf32> to vector<16x32xbf16>
    %cst_69 = arith.constant dense<0.000000e+00> : vector<16x16xf32>
    %180 = tpu.matmul %177, %136, %cst_69 {dimension_numbers = #tpu.dot_dimension_numbers<[1], [1], [0], [0], [0, 0, 1, 0], [], []>} : vector<16x32xbf16>, vector<16x32xbf16>, vector<16x16xf32> -> vector<16x16xf32>
    %cst_70 = arith.constant 0.353553385 : f32
    %181 = vector.broadcast %cst_70 : f32 to vector<16x16xf32>
    %182 = arith.mulf %180, %181 : vector<16x16xf32>
    %cst_71 = arith.constant dense<0xFF800000> : vector<16xf32>
    %183 = vector.multi_reduction <maximumf>, %182, %cst_71 [1] : vector<16x16xf32> to vector<16xf32>
    %184 = vector.shape_cast %183 : vector<16xf32> to vector<16x1xf32>
    %185 = vector.broadcast %184 : vector<16x1xf32> to vector<16x16xf32>
    %186 = arith.subf %182, %185 : vector<16x16xf32>
    %187 = math.exp %186 : vector<16x16xf32>
    %cst_72 = arith.constant dense<0.000000e+00> : vector<16xf32>
    %188 = vector.multi_reduction <add>, %187, %cst_72 [1] : vector<16x16xf32> to vector<16xf32>
    %189 = vector.shape_cast %188 : vector<16xf32> to vector<16x1xf32>
    %190 = vector.broadcast %189 : vector<16x1xf32> to vector<16x16xf32>
    %191 = arith.divf %187, %190 : vector<16x16xf32>
    %192 = arith.truncf %191 : vector<16x16xf32> to vector<16x16xbf16>
    %cst_73 = arith.constant dense<0.000000e+00> : vector<16x32xf32>
    %193 = tpu.matmul %192, %179, %cst_73 {dimension_numbers = #tpu.dot_dimension_numbers<[1], [0], [0], [1], [0, 0, 1, 1], [], []>} : vector<16x16xbf16>, vector<16x32xbf16>, vector<16x32xf32> -> vector<16x32xf32>
    %194 = arith.addf %175, %193 : vector<16x32xf32>
    %195 = vector.extract_strided_slice %133 {offsets = [0, 96], sizes = [16, 32], strides = [1, 1]} : vector<16x128xf32> to vector<16x32xf32>
    %196 = arith.truncf %195 : vector<16x32xf32> to vector<16x32xbf16>
    %197 = vector.extract_strided_slice %134 {offsets = [0, 96], sizes = [16, 32], strides = [1, 1]} : vector<16x160xf32> to vector<16x32xf32>
    %198 = arith.truncf %197 : vector<16x32xf32> to vector<16x32xbf16>
    %cst_74 = arith.constant dense<0.000000e+00> : vector<16x16xf32>
    %199 = tpu.matmul %196, %136, %cst_74 {dimension_numbers = #tpu.dot_dimension_numbers<[1], [1], [0], [0], [0, 0, 1, 0], [], []>} : vector<16x32xbf16>, vector<16x32xbf16>, vector<16x16xf32> -> vector<16x16xf32>
    %cst_75 = arith.constant 0.353553385 : f32
    %200 = vector.broadcast %cst_75 : f32 to vector<16x16xf32>
    %201 = arith.mulf %199, %200 : vector<16x16xf32>
    %cst_76 = arith.constant dense<0xFF800000> : vector<16xf32>
    %202 = vector.multi_reduction <maximumf>, %201, %cst_76 [1] : vector<16x16xf32> to vector<16xf32>
    %203 = vector.shape_cast %202 : vector<16xf32> to vector<16x1xf32>
    %204 = vector.broadcast %203 : vector<16x1xf32> to vector<16x16xf32>
    %205 = arith.subf %201, %204 : vector<16x16xf32>
    %206 = math.exp %205 : vector<16x16xf32>
    %cst_77 = arith.constant dense<0.000000e+00> : vector<16xf32>
    %207 = vector.multi_reduction <add>, %206, %cst_77 [1] : vector<16x16xf32> to vector<16xf32>
    %208 = vector.shape_cast %207 : vector<16xf32> to vector<16x1xf32>
    %209 = vector.broadcast %208 : vector<16x1xf32> to vector<16x16xf32>
    %210 = arith.divf %206, %209 : vector<16x16xf32>
    %211 = arith.truncf %210 : vector<16x16xf32> to vector<16x16xbf16>
    %cst_78 = arith.constant dense<0.000000e+00> : vector<16x32xf32>
    %212 = tpu.matmul %211, %198, %cst_78 {dimension_numbers = #tpu.dot_dimension_numbers<[1], [0], [0], [1], [0, 0, 1, 1], [], []>} : vector<16x16xbf16>, vector<16x32xbf16>, vector<16x32xf32> -> vector<16x32xf32>
    %213 = arith.addf %194, %212 : vector<16x32xf32>
    %214 = arith.addf %6, %213 : vector<16x32xf32>
    %c0_79 = arith.constant 0 : index
    %c0_80 = arith.constant 0 : index
    %c0_81 = arith.constant 0 : index
    %c0_82 = arith.constant 0 : index
    %215 = vector.load %arg11[%c0_79, %c0_80, %c0_81, %c0_82] : memref<2x2x1x32xf32, #tpu.memory_space<vmem>>, vector<1x1x1x32xf32>
    %216 = vector.shape_cast %215 : vector<1x1x1x32xf32> to vector<1x32xf32>
    %c0_83 = arith.constant 0 : index
    %c0_84 = arith.constant 0 : index
    %c0_85 = arith.constant 0 : index
    %c0_86 = arith.constant 0 : index
    %217 = vector.load %arg12[%c0_83, %c0_84, %c0_85, %c0_86] : memref<2x2x1x32xf32, #tpu.memory_space<vmem>>, vector<1x1x1x32xf32>
    %218 = vector.shape_cast %217 : vector<1x1x1x32xf32> to vector<1x32xf32>
    %cst_87 = arith.constant dense<0.000000e+00> : vector<16xf32>
    %219 = vector.multi_reduction <add>, %214, %cst_87 [1] : vector<16x32xf32> to vector<16xf32>
    %220 = vector.shape_cast %219 : vector<16xf32> to vector<16x1xf32>
    %cst_88 = arith.constant 3.200000e+01 : f32
    %221 = vector.broadcast %cst_88 : f32 to vector<16x1xf32>
    %222 = arith.divf %220, %221 : vector<16x1xf32>
    %223 = vector.broadcast %222 : vector<16x1xf32> to vector<16x32xf32>
    %224 = arith.subf %214, %223 : vector<16x32xf32>
    %225 = arith.mulf %224, %224 : vector<16x32xf32>
    %cst_89 = arith.constant dense<0.000000e+00> : vector<16xf32>
    %226 = vector.multi_reduction <add>, %225, %cst_89 [1] : vector<16x32xf32> to vector<16xf32>
    %227 = vector.shape_cast %226 : vector<16xf32> to vector<16x1xf32>
    %cst_90 = arith.constant 3.200000e+01 : f32
    %228 = vector.broadcast %cst_90 : f32 to vector<16x1xf32>
    %229 = arith.divf %227, %228 : vector<16x1xf32>
    %230 = vector.broadcast %222 : vector<16x1xf32> to vector<16x32xf32>
    %231 = arith.subf %214, %230 : vector<16x32xf32>
    %cst_91 = arith.constant 9.99999974E-6 : f32
    %232 = vector.broadcast %cst_91 : f32 to vector<16x1xf32>
    %233 = arith.addf %229, %232 : vector<16x1xf32>
    %234 = math.rsqrt %233 : vector<16x1xf32>
    %235 = vector.broadcast %234 : vector<16x1xf32> to vector<16x32xf32>
    %236 = arith.mulf %231, %235 : vector<16x32xf32>
    %237 = vector.broadcast %216 : vector<1x32xf32> to vector<16x32xf32>
    %238 = arith.mulf %236, %237 : vector<16x32xf32>
    %239 = vector.broadcast %218 : vector<1x32xf32> to vector<16x32xf32>
    %240 = arith.addf %238, %239 : vector<16x32xf32>
    %c0_92 = arith.constant 0 : index
    %c0_93 = arith.constant 0 : index
    %c0_94 = arith.constant 0 : index
    %241 = vector.load %arg17[%c0_92, %c0_93, %c0_94] : memref<2x32x128xbf16, #tpu.memory_space<vmem>>, vector<1x32x128xbf16>
    %242 = vector.shape_cast %241 : vector<1x32x128xbf16> to vector<32x128xbf16>
    %c0_95 = arith.constant 0 : index
    %c0_96 = arith.constant 0 : index
    %c0_97 = arith.constant 0 : index
    %243 = vector.load %arg18[%c0_95, %c0_96, %c0_97] : memref<2x1x128xf32, #tpu.memory_space<vmem>>, vector<1x1x128xf32>
    %244 = vector.shape_cast %243 : vector<1x1x128xf32> to vector<1x128xf32>
    %c0_98 = arith.constant 0 : index
    %c0_99 = arith.constant 0 : index
    %c0_100 = arith.constant 0 : index
    %245 = vector.load %arg19[%c0_98, %c0_99, %c0_100] : memref<2x128x32xbf16, #tpu.memory_space<vmem>>, vector<1x128x32xbf16>
    %246 = vector.shape_cast %245 : vector<1x128x32xbf16> to vector<128x32xbf16>
    %c0_101 = arith.constant 0 : index
    %c0_102 = arith.constant 0 : index
    %c0_103 = arith.constant 0 : index
    %247 = vector.load %arg20[%c0_101, %c0_102, %c0_103] : memref<2x1x32xf32, #tpu.memory_space<vmem>>, vector<1x1x32xf32>
    %248 = vector.shape_cast %247 : vector<1x1x32xf32> to vector<1x32xf32>
    %249 = arith.truncf %240 : vector<16x32xf32> to vector<16x32xbf16>
    %cst_104 = arith.constant dense<0.000000e+00> : vector<16x128xf32>
    %250 = tpu.matmul %249, %242, %cst_104 {dimension_numbers = #tpu.dot_dimension_numbers<[1], [0], [0], [1], [0, 0, 1, 1], [], []>} : vector<16x32xbf16>, vector<32x128xbf16>, vector<16x128xf32> -> vector<16x128xf32>
    %251 = vector.broadcast %244 : vector<1x128xf32> to vector<16x128xf32>
    %252 = arith.addf %250, %251 : vector<16x128xf32>
    %cst_105 = arith.constant 0.000000e+00 : f32
    %253 = vector.broadcast %cst_105 : f32 to vector<16x128xf32>
    %254 = arith.maximumf %252, %253 : vector<16x128xf32>
    %255 = arith.truncf %254 : vector<16x128xf32> to vector<16x128xbf16>
    %cst_106 = arith.constant dense<0.000000e+00> : vector<16x32xf32>
    %256 = tpu.matmul %255, %246, %cst_106 {dimension_numbers = #tpu.dot_dimension_numbers<[1], [0], [0], [1], [0, 0, 1, 1], [], []>} : vector<16x128xbf16>, vector<128x32xbf16>, vector<16x32xf32> -> vector<16x32xf32>
    %257 = vector.broadcast %248 : vector<1x32xf32> to vector<16x32xf32>
    %258 = arith.addf %256, %257 : vector<16x32xf32>
    %259 = arith.addf %240, %258 : vector<16x32xf32>
    %c0_107 = arith.constant 0 : index
    %c1 = arith.constant 1 : index
    %c0_108 = arith.constant 0 : index
    %c0_109 = arith.constant 0 : index
    %260 = vector.load %arg11[%c0_107, %c1, %c0_108, %c0_109] : memref<2x2x1x32xf32, #tpu.memory_space<vmem>>, vector<1x1x1x32xf32>
    %261 = vector.shape_cast %260 : vector<1x1x1x32xf32> to vector<1x32xf32>
    %c0_110 = arith.constant 0 : index
    %c1_111 = arith.constant 1 : index
    %c0_112 = arith.constant 0 : index
    %c0_113 = arith.constant 0 : index
    %262 = vector.load %arg12[%c0_110, %c1_111, %c0_112, %c0_113] : memref<2x2x1x32xf32, #tpu.memory_space<vmem>>, vector<1x1x1x32xf32>
    %263 = vector.shape_cast %262 : vector<1x1x1x32xf32> to vector<1x32xf32>
    %cst_114 = arith.constant dense<0.000000e+00> : vector<16xf32>
    %264 = vector.multi_reduction <add>, %259, %cst_114 [1] : vector<16x32xf32> to vector<16xf32>
    %265 = vector.shape_cast %264 : vector<16xf32> to vector<16x1xf32>
    %cst_115 = arith.constant 3.200000e+01 : f32
    %266 = vector.broadcast %cst_115 : f32 to vector<16x1xf32>
    %267 = arith.divf %265, %266 : vector<16x1xf32>
    %268 = vector.broadcast %267 : vector<16x1xf32> to vector<16x32xf32>
    %269 = arith.subf %259, %268 : vector<16x32xf32>
    %270 = arith.mulf %269, %269 : vector<16x32xf32>
    %cst_116 = arith.constant dense<0.000000e+00> : vector<16xf32>
    %271 = vector.multi_reduction <add>, %270, %cst_116 [1] : vector<16x32xf32> to vector<16xf32>
    %272 = vector.shape_cast %271 : vector<16xf32> to vector<16x1xf32>
    %cst_117 = arith.constant 3.200000e+01 : f32
    %273 = vector.broadcast %cst_117 : f32 to vector<16x1xf32>
    %274 = arith.divf %272, %273 : vector<16x1xf32>
    %275 = vector.broadcast %267 : vector<16x1xf32> to vector<16x32xf32>
    %276 = arith.subf %259, %275 : vector<16x32xf32>
    %cst_118 = arith.constant 9.99999974E-6 : f32
    %277 = vector.broadcast %cst_118 : f32 to vector<16x1xf32>
    %278 = arith.addf %274, %277 : vector<16x1xf32>
    %279 = math.rsqrt %278 : vector<16x1xf32>
    %280 = vector.broadcast %279 : vector<16x1xf32> to vector<16x32xf32>
    %281 = arith.mulf %276, %280 : vector<16x32xf32>
    %282 = vector.broadcast %261 : vector<1x32xf32> to vector<16x32xf32>
    %283 = arith.mulf %281, %282 : vector<16x32xf32>
    %284 = vector.broadcast %263 : vector<1x32xf32> to vector<16x32xf32>
    %285 = arith.addf %283, %284 : vector<16x32xf32>
    %c0_119 = arith.constant 0 : index
    %c0_120 = arith.constant 0 : index
    %c0_121 = arith.constant 0 : index
    %286 = vector.load %arg5[%c0_119, %c0_120, %c0_121] : memref<2x32x128xbf16, #tpu.memory_space<vmem>>, vector<1x32x128xbf16>
    %287 = vector.shape_cast %286 : vector<1x32x128xbf16> to vector<32x128xbf16>
    %c0_122 = arith.constant 0 : index
    %c0_123 = arith.constant 0 : index
    %c0_124 = arith.constant 0 : index
    %288 = vector.load %arg6[%c0_122, %c0_123, %c0_124] : memref<2x32x160xbf16, #tpu.memory_space<vmem>>, vector<1x32x160xbf16>
    %289 = vector.shape_cast %288 : vector<1x32x160xbf16> to vector<32x160xbf16>
    %290 = arith.truncf %127 : vector<8x32xf32> to vector<8x32xbf16>
    %291 = arith.truncf %285 : vector<16x32xf32> to vector<16x32xbf16>
    %cst_125 = arith.constant dense<0.000000e+00> : vector<8x128xf32>
    %292 = tpu.matmul %290, %287, %cst_125 {dimension_numbers = #tpu.dot_dimension_numbers<[1], [0], [0], [1], [0, 0, 1, 1], [], []>} : vector<8x32xbf16>, vector<32x128xbf16>, vector<8x128xf32> -> vector<8x128xf32>
    %cst_126 = arith.constant dense<0.000000e+00> : vector<16x160xf32>
    %293 = tpu.matmul %291, %289, %cst_126 {dimension_numbers = #tpu.dot_dimension_numbers<[1], [0], [0], [1], [0, 0, 1, 1], [], []>} : vector<16x32xbf16>, vector<32x160xbf16>, vector<16x160xf32> -> vector<16x160xf32>
    %294 = vector.extract_strided_slice %293 {offsets = [0, 128], sizes = [16, 32], strides = [1, 1]} : vector<16x160xf32> to vector<16x32xf32>
    %295 = arith.truncf %294 : vector<16x32xf32> to vector<16x32xbf16>
    %cst_127 = arith.constant 0.000000e+00 : f32
    %296 = vector.broadcast %cst_127 : f32 to vector<8x32xf32>
    %297 = vector.extract_strided_slice %292 {offsets = [0, 0], sizes = [8, 32], strides = [1, 1]} : vector<8x128xf32> to vector<8x32xf32>
    %298 = arith.truncf %297 : vector<8x32xf32> to vector<8x32xbf16>
    %299 = vector.extract_strided_slice %293 {offsets = [0, 0], sizes = [16, 32], strides = [1, 1]} : vector<16x160xf32> to vector<16x32xf32>
    %300 = arith.truncf %299 : vector<16x32xf32> to vector<16x32xbf16>
    %cst_128 = arith.constant dense<0.000000e+00> : vector<8x16xf32>
    %301 = tpu.matmul %298, %295, %cst_128 {dimension_numbers = #tpu.dot_dimension_numbers<[1], [1], [0], [0], [0, 0, 1, 0], [], []>} : vector<8x32xbf16>, vector<16x32xbf16>, vector<8x16xf32> -> vector<8x16xf32>
    %cst_129 = arith.constant 0.353553385 : f32
    %302 = vector.broadcast %cst_129 : f32 to vector<8x16xf32>
    %303 = arith.mulf %301, %302 : vector<8x16xf32>
    %304 = arith.truncf %303 : vector<8x16xf32> to vector<8x16xbf16>
    %cst_130 = arith.constant dense<0.000000e+00> : vector<8x32xf32>
    %305 = tpu.matmul %304, %300, %cst_130 {dimension_numbers = #tpu.dot_dimension_numbers<[1], [0], [0], [1], [0, 0, 1, 1], [], []>} : vector<8x16xbf16>, vector<16x32xbf16>, vector<8x32xf32> -> vector<8x32xf32>
    %306 = arith.addf %296, %305 : vector<8x32xf32>
    %307 = vector.extract_strided_slice %292 {offsets = [0, 32], sizes = [8, 32], strides = [1, 1]} : vector<8x128xf32> to vector<8x32xf32>
    %308 = arith.truncf %307 : vector<8x32xf32> to vector<8x32xbf16>
    %309 = vector.extract_strided_slice %293 {offsets = [0, 32], sizes = [16, 32], strides = [1, 1]} : vector<16x160xf32> to vector<16x32xf32>
    %310 = arith.truncf %309 : vector<16x32xf32> to vector<16x32xbf16>
    %cst_131 = arith.constant dense<0.000000e+00> : vector<8x16xf32>
    %311 = tpu.matmul %308, %295, %cst_131 {dimension_numbers = #tpu.dot_dimension_numbers<[1], [1], [0], [0], [0, 0, 1, 0], [], []>} : vector<8x32xbf16>, vector<16x32xbf16>, vector<8x16xf32> -> vector<8x16xf32>
    %cst_132 = arith.constant 0.353553385 : f32
    %312 = vector.broadcast %cst_132 : f32 to vector<8x16xf32>
    %313 = arith.mulf %311, %312 : vector<8x16xf32>
    %314 = arith.truncf %313 : vector<8x16xf32> to vector<8x16xbf16>
    %cst_133 = arith.constant dense<0.000000e+00> : vector<8x32xf32>
    %315 = tpu.matmul %314, %310, %cst_133 {dimension_numbers = #tpu.dot_dimension_numbers<[1], [0], [0], [1], [0, 0, 1, 1], [], []>} : vector<8x16xbf16>, vector<16x32xbf16>, vector<8x32xf32> -> vector<8x32xf32>
    %316 = arith.addf %306, %315 : vector<8x32xf32>
    %317 = vector.extract_strided_slice %292 {offsets = [0, 64], sizes = [8, 32], strides = [1, 1]} : vector<8x128xf32> to vector<8x32xf32>
    %318 = arith.truncf %317 : vector<8x32xf32> to vector<8x32xbf16>
    %319 = vector.extract_strided_slice %293 {offsets = [0, 64], sizes = [16, 32], strides = [1, 1]} : vector<16x160xf32> to vector<16x32xf32>
    %320 = arith.truncf %319 : vector<16x32xf32> to vector<16x32xbf16>
    %cst_134 = arith.constant dense<0.000000e+00> : vector<8x16xf32>
    %321 = tpu.matmul %318, %295, %cst_134 {dimension_numbers = #tpu.dot_dimension_numbers<[1], [1], [0], [0], [0, 0, 1, 0], [], []>} : vector<8x32xbf16>, vector<16x32xbf16>, vector<8x16xf32> -> vector<8x16xf32>
    %cst_135 = arith.constant 0.353553385 : f32
    %322 = vector.broadcast %cst_135 : f32 to vector<8x16xf32>
    %323 = arith.mulf %321, %322 : vector<8x16xf32>
    %324 = arith.truncf %323 : vector<8x16xf32> to vector<8x16xbf16>
    %cst_136 = arith.constant dense<0.000000e+00> : vector<8x32xf32>
    %325 = tpu.matmul %324, %320, %cst_136 {dimension_numbers = #tpu.dot_dimension_numbers<[1], [0], [0], [1], [0, 0, 1, 1], [], []>} : vector<8x16xbf16>, vector<16x32xbf16>, vector<8x32xf32> -> vector<8x32xf32>
    %326 = arith.addf %316, %325 : vector<8x32xf32>
    %327 = vector.extract_strided_slice %292 {offsets = [0, 96], sizes = [8, 32], strides = [1, 1]} : vector<8x128xf32> to vector<8x32xf32>
    %328 = arith.truncf %327 : vector<8x32xf32> to vector<8x32xbf16>
    %329 = vector.extract_strided_slice %293 {offsets = [0, 96], sizes = [16, 32], strides = [1, 1]} : vector<16x160xf32> to vector<16x32xf32>
    %330 = arith.truncf %329 : vector<16x32xf32> to vector<16x32xbf16>
    %cst_137 = arith.constant dense<0.000000e+00> : vector<8x16xf32>
    %331 = tpu.matmul %328, %295, %cst_137 {dimension_numbers = #tpu.dot_dimension_numbers<[1], [1], [0], [0], [0, 0, 1, 0], [], []>} : vector<8x32xbf16>, vector<16x32xbf16>, vector<8x16xf32> -> vector<8x16xf32>
    %cst_138 = arith.constant 0.353553385 : f32
    %332 = vector.broadcast %cst_138 : f32 to vector<8x16xf32>
    %333 = arith.mulf %331, %332 : vector<8x16xf32>
    %334 = arith.truncf %333 : vector<8x16xf32> to vector<8x16xbf16>
    %cst_139 = arith.constant dense<0.000000e+00> : vector<8x32xf32>
    %335 = tpu.matmul %334, %330, %cst_139 {dimension_numbers = #tpu.dot_dimension_numbers<[1], [0], [0], [1], [0, 0, 1, 1], [], []>} : vector<8x16xbf16>, vector<16x32xbf16>, vector<8x32xf32> -> vector<8x32xf32>
    %336 = arith.addf %326, %335 : vector<8x32xf32>
    %337 = arith.addf %127, %336 : vector<8x32xf32>
    %c0_140 = arith.constant 0 : index
    %c1_141 = arith.constant 1 : index
    %c0_142 = arith.constant 0 : index
    %c0_143 = arith.constant 0 : index
    %338 = vector.load %arg9[%c0_140, %c1_141, %c0_142, %c0_143] : memref<2x3x1x32xf32, #tpu.memory_space<vmem>>, vector<1x1x1x32xf32>
    %339 = vector.shape_cast %338 : vector<1x1x1x32xf32> to vector<1x32xf32>
    %c0_144 = arith.constant 0 : index
    %c1_145 = arith.constant 1 : index
    %c0_146 = arith.constant 0 : index
    %c0_147 = arith.constant 0 : index
    %340 = vector.load %arg10[%c0_144, %c1_145, %c0_146, %c0_147] : memref<2x3x1x32xf32, #tpu.memory_space<vmem>>, vector<1x1x1x32xf32>
    %341 = vector.shape_cast %340 : vector<1x1x1x32xf32> to vector<1x32xf32>
    %cst_148 = arith.constant dense<0.000000e+00> : vector<8xf32>
    %342 = vector.multi_reduction <add>, %337, %cst_148 [1] : vector<8x32xf32> to vector<8xf32>
    %343 = vector.shape_cast %342 : vector<8xf32> to vector<8x1xf32>
    %cst_149 = arith.constant 3.200000e+01 : f32
    %344 = vector.broadcast %cst_149 : f32 to vector<8x1xf32>
    %345 = arith.divf %343, %344 : vector<8x1xf32>
    %346 = vector.broadcast %345 : vector<8x1xf32> to vector<8x32xf32>
    %347 = arith.subf %337, %346 : vector<8x32xf32>
    %348 = arith.mulf %347, %347 : vector<8x32xf32>
    %cst_150 = arith.constant dense<0.000000e+00> : vector<8xf32>
    %349 = vector.multi_reduction <add>, %348, %cst_150 [1] : vector<8x32xf32> to vector<8xf32>
    %350 = vector.shape_cast %349 : vector<8xf32> to vector<8x1xf32>
    %cst_151 = arith.constant 3.200000e+01 : f32
    %351 = vector.broadcast %cst_151 : f32 to vector<8x1xf32>
    %352 = arith.divf %350, %351 : vector<8x1xf32>
    %353 = vector.broadcast %345 : vector<8x1xf32> to vector<8x32xf32>
    %354 = arith.subf %337, %353 : vector<8x32xf32>
    %cst_152 = arith.constant 9.99999974E-6 : f32
    %355 = vector.broadcast %cst_152 : f32 to vector<8x1xf32>
    %356 = arith.addf %352, %355 : vector<8x1xf32>
    %357 = math.rsqrt %356 : vector<8x1xf32>
    %358 = vector.broadcast %357 : vector<8x1xf32> to vector<8x32xf32>
    %359 = arith.mulf %354, %358 : vector<8x32xf32>
    %360 = vector.broadcast %339 : vector<1x32xf32> to vector<8x32xf32>
    %361 = arith.mulf %359, %360 : vector<8x32xf32>
    %362 = vector.broadcast %341 : vector<1x32xf32> to vector<8x32xf32>
    %363 = arith.addf %361, %362 : vector<8x32xf32>
    %c0_153 = arith.constant 0 : index
    %c0_154 = arith.constant 0 : index
    %c0_155 = arith.constant 0 : index
    %364 = vector.load %arg13[%c0_153, %c0_154, %c0_155] : memref<2x32x128xbf16, #tpu.memory_space<vmem>>, vector<1x32x128xbf16>
    %365 = vector.shape_cast %364 : vector<1x32x128xbf16> to vector<32x128xbf16>
    %c0_156 = arith.constant 0 : index
    %c0_157 = arith.constant 0 : index
    %c0_158 = arith.constant 0 : index
    %366 = vector.load %arg14[%c0_156, %c0_157, %c0_158] : memref<2x1x128xf32, #tpu.memory_space<vmem>>, vector<1x1x128xf32>
    %367 = vector.shape_cast %366 : vector<1x1x128xf32> to vector<1x128xf32>
    %c0_159 = arith.constant 0 : index
    %c0_160 = arith.constant 0 : index
    %c0_161 = arith.constant 0 : index
    %368 = vector.load %arg15[%c0_159, %c0_160, %c0_161] : memref<2x128x32xbf16, #tpu.memory_space<vmem>>, vector<1x128x32xbf16>
    %369 = vector.shape_cast %368 : vector<1x128x32xbf16> to vector<128x32xbf16>
    %c0_162 = arith.constant 0 : index
    %c0_163 = arith.constant 0 : index
    %c0_164 = arith.constant 0 : index
    %370 = vector.load %arg16[%c0_162, %c0_163, %c0_164] : memref<2x1x32xf32, #tpu.memory_space<vmem>>, vector<1x1x32xf32>
    %371 = vector.shape_cast %370 : vector<1x1x32xf32> to vector<1x32xf32>
    %372 = arith.truncf %363 : vector<8x32xf32> to vector<8x32xbf16>
    %cst_165 = arith.constant dense<0.000000e+00> : vector<8x128xf32>
    %373 = tpu.matmul %372, %365, %cst_165 {dimension_numbers = #tpu.dot_dimension_numbers<[1], [0], [0], [1], [0, 0, 1, 1], [], []>} : vector<8x32xbf16>, vector<32x128xbf16>, vector<8x128xf32> -> vector<8x128xf32>
    %374 = vector.broadcast %367 : vector<1x128xf32> to vector<8x128xf32>
    %375 = arith.addf %373, %374 : vector<8x128xf32>
    %cst_166 = arith.constant 0.000000e+00 : f32
    %376 = vector.broadcast %cst_166 : f32 to vector<8x128xf32>
    %377 = arith.maximumf %375, %376 : vector<8x128xf32>
    %378 = arith.truncf %377 : vector<8x128xf32> to vector<8x128xbf16>
    %cst_167 = arith.constant dense<0.000000e+00> : vector<8x32xf32>
    %379 = tpu.matmul %378, %369, %cst_167 {dimension_numbers = #tpu.dot_dimension_numbers<[1], [0], [0], [1], [0, 0, 1, 1], [], []>} : vector<8x128xbf16>, vector<128x32xbf16>, vector<8x32xf32> -> vector<8x32xf32>
    %380 = vector.broadcast %371 : vector<1x32xf32> to vector<8x32xf32>
    %381 = arith.addf %379, %380 : vector<8x32xf32>
    %382 = arith.addf %363, %381 : vector<8x32xf32>
    %c0_168 = arith.constant 0 : index
    %c2 = arith.constant 2 : index
    %c0_169 = arith.constant 0 : index
    %c0_170 = arith.constant 0 : index
    %383 = vector.load %arg9[%c0_168, %c2, %c0_169, %c0_170] : memref<2x3x1x32xf32, #tpu.memory_space<vmem>>, vector<1x1x1x32xf32>
    %384 = vector.shape_cast %383 : vector<1x1x1x32xf32> to vector<1x32xf32>
    %c0_171 = arith.constant 0 : index
    %c2_172 = arith.constant 2 : index
    %c0_173 = arith.constant 0 : index
    %c0_174 = arith.constant 0 : index
    %385 = vector.load %arg10[%c0_171, %c2_172, %c0_173, %c0_174] : memref<2x3x1x32xf32, #tpu.memory_space<vmem>>, vector<1x1x1x32xf32>
    %386 = vector.shape_cast %385 : vector<1x1x1x32xf32> to vector<1x32xf32>
    %cst_175 = arith.constant dense<0.000000e+00> : vector<8xf32>
    %387 = vector.multi_reduction <add>, %382, %cst_175 [1] : vector<8x32xf32> to vector<8xf32>
    %388 = vector.shape_cast %387 : vector<8xf32> to vector<8x1xf32>
    %cst_176 = arith.constant 3.200000e+01 : f32
    %389 = vector.broadcast %cst_176 : f32 to vector<8x1xf32>
    %390 = arith.divf %388, %389 : vector<8x1xf32>
    %391 = vector.broadcast %390 : vector<8x1xf32> to vector<8x32xf32>
    %392 = arith.subf %382, %391 : vector<8x32xf32>
    %393 = arith.mulf %392, %392 : vector<8x32xf32>
    %cst_177 = arith.constant dense<0.000000e+00> : vector<8xf32>
    %394 = vector.multi_reduction <add>, %393, %cst_177 [1] : vector<8x32xf32> to vector<8xf32>
    %395 = vector.shape_cast %394 : vector<8xf32> to vector<8x1xf32>
    %cst_178 = arith.constant 3.200000e+01 : f32
    %396 = vector.broadcast %cst_178 : f32 to vector<8x1xf32>
    %397 = arith.divf %395, %396 : vector<8x1xf32>
    %398 = vector.broadcast %390 : vector<8x1xf32> to vector<8x32xf32>
    %399 = arith.subf %382, %398 : vector<8x32xf32>
    %cst_179 = arith.constant 9.99999974E-6 : f32
    %400 = vector.broadcast %cst_179 : f32 to vector<8x1xf32>
    %401 = arith.addf %397, %400 : vector<8x1xf32>
    %402 = math.rsqrt %401 : vector<8x1xf32>
    %403 = vector.broadcast %402 : vector<8x1xf32> to vector<8x32xf32>
    %404 = arith.mulf %399, %403 : vector<8x32xf32>
    %405 = vector.broadcast %384 : vector<1x32xf32> to vector<8x32xf32>
    %406 = arith.mulf %404, %405 : vector<8x32xf32>
    %407 = vector.broadcast %386 : vector<1x32xf32> to vector<8x32xf32>
    %408 = arith.addf %406, %407 : vector<8x32xf32>
    %c1_180 = arith.constant 1 : index
    %c0_181 = arith.constant 0 : index
    %c0_182 = arith.constant 0 : index
    %409 = vector.load %arg3[%c1_180, %c0_181, %c0_182] : memref<2x32x128xbf16, #tpu.memory_space<vmem>>, vector<1x32x128xbf16>
    %410 = vector.shape_cast %409 : vector<1x32x128xbf16> to vector<32x128xbf16>
    %c1_183 = arith.constant 1 : index
    %c0_184 = arith.constant 0 : index
    %c0_185 = arith.constant 0 : index
    %411 = vector.load %arg4[%c1_183, %c0_184, %c0_185] : memref<2x32x160xbf16, #tpu.memory_space<vmem>>, vector<1x32x160xbf16>
    %412 = vector.shape_cast %411 : vector<1x32x160xbf16> to vector<32x160xbf16>
    %413 = arith.truncf %408 : vector<8x32xf32> to vector<8x32xbf16>
    %cst_186 = arith.constant dense<0.000000e+00> : vector<8x128xf32>
    %414 = tpu.matmul %413, %410, %cst_186 {dimension_numbers = #tpu.dot_dimension_numbers<[1], [0], [0], [1], [0, 0, 1, 1], [], []>} : vector<8x32xbf16>, vector<32x128xbf16>, vector<8x128xf32> -> vector<8x128xf32>
    %cst_187 = arith.constant dense<0.000000e+00> : vector<8x160xf32>
    %415 = tpu.matmul %413, %412, %cst_187 {dimension_numbers = #tpu.dot_dimension_numbers<[1], [0], [0], [1], [0, 0, 1, 1], [], []>} : vector<8x32xbf16>, vector<32x160xbf16>, vector<8x160xf32> -> vector<8x160xf32>
    %416 = vector.extract_strided_slice %415 {offsets = [0, 128], sizes = [8, 32], strides = [1, 1]} : vector<8x160xf32> to vector<8x32xf32>
    %417 = arith.truncf %416 : vector<8x32xf32> to vector<8x32xbf16>
    %cst_188 = arith.constant 0.000000e+00 : f32
    %418 = vector.broadcast %cst_188 : f32 to vector<8x32xf32>
    %419 = vector.extract_strided_slice %414 {offsets = [0, 0], sizes = [8, 32], strides = [1, 1]} : vector<8x128xf32> to vector<8x32xf32>
    %420 = arith.truncf %419 : vector<8x32xf32> to vector<8x32xbf16>
    %421 = vector.extract_strided_slice %415 {offsets = [0, 0], sizes = [8, 32], strides = [1, 1]} : vector<8x160xf32> to vector<8x32xf32>
    %422 = arith.truncf %421 : vector<8x32xf32> to vector<8x32xbf16>
    %cst_189 = arith.constant dense<0.000000e+00> : vector<8x8xf32>
    %423 = tpu.matmul %420, %417, %cst_189 {dimension_numbers = #tpu.dot_dimension_numbers<[1], [1], [0], [0], [0, 0, 1, 0], [], []>} : vector<8x32xbf16>, vector<8x32xbf16>, vector<8x8xf32> -> vector<8x8xf32>
    %cst_190 = arith.constant 0.353553385 : f32
    %424 = vector.broadcast %cst_190 : f32 to vector<8x8xf32>
    %425 = arith.mulf %423, %424 : vector<8x8xf32>
    %cst_191 = arith.constant 0xFF800000 : f32
    %426 = vector.broadcast %cst_191 : f32 to vector<8x8xf32>
    %427 = arith.select %2, %425, %426 : vector<8x8xi1>, vector<8x8xf32>
    %cst_192 = arith.constant dense<0xFF800000> : vector<8xf32>
    %428 = vector.multi_reduction <maximumf>, %427, %cst_192 [1] : vector<8x8xf32> to vector<8xf32>
    %429 = vector.shape_cast %428 : vector<8xf32> to vector<8x1xf32>
    %430 = vector.broadcast %429 : vector<8x1xf32> to vector<8x8xf32>
    %431 = arith.subf %427, %430 : vector<8x8xf32>
    %432 = math.exp %431 : vector<8x8xf32>
    %cst_193 = arith.constant dense<0.000000e+00> : vector<8xf32>
    %433 = vector.multi_reduction <add>, %432, %cst_193 [1] : vector<8x8xf32> to vector<8xf32>
    %434 = vector.shape_cast %433 : vector<8xf32> to vector<8x1xf32>
    %435 = vector.broadcast %434 : vector<8x1xf32> to vector<8x8xf32>
    %436 = arith.divf %432, %435 : vector<8x8xf32>
    %437 = arith.truncf %436 : vector<8x8xf32> to vector<8x8xbf16>
    %cst_194 = arith.constant dense<0.000000e+00> : vector<8x32xf32>
    %438 = tpu.matmul %437, %422, %cst_194 {dimension_numbers = #tpu.dot_dimension_numbers<[1], [0], [0], [1], [0, 0, 1, 1], [], []>} : vector<8x8xbf16>, vector<8x32xbf16>, vector<8x32xf32> -> vector<8x32xf32>
    %439 = arith.addf %418, %438 : vector<8x32xf32>
    %440 = vector.extract_strided_slice %414 {offsets = [0, 32], sizes = [8, 32], strides = [1, 1]} : vector<8x128xf32> to vector<8x32xf32>
    %441 = arith.truncf %440 : vector<8x32xf32> to vector<8x32xbf16>
    %442 = vector.extract_strided_slice %415 {offsets = [0, 32], sizes = [8, 32], strides = [1, 1]} : vector<8x160xf32> to vector<8x32xf32>
    %443 = arith.truncf %442 : vector<8x32xf32> to vector<8x32xbf16>
    %cst_195 = arith.constant dense<0.000000e+00> : vector<8x8xf32>
    %444 = tpu.matmul %441, %417, %cst_195 {dimension_numbers = #tpu.dot_dimension_numbers<[1], [1], [0], [0], [0, 0, 1, 0], [], []>} : vector<8x32xbf16>, vector<8x32xbf16>, vector<8x8xf32> -> vector<8x8xf32>
    %cst_196 = arith.constant 0.353553385 : f32
    %445 = vector.broadcast %cst_196 : f32 to vector<8x8xf32>
    %446 = arith.mulf %444, %445 : vector<8x8xf32>
    %cst_197 = arith.constant 0xFF800000 : f32
    %447 = vector.broadcast %cst_197 : f32 to vector<8x8xf32>
    %448 = arith.select %2, %446, %447 : vector<8x8xi1>, vector<8x8xf32>
    %cst_198 = arith.constant dense<0xFF800000> : vector<8xf32>
    %449 = vector.multi_reduction <maximumf>, %448, %cst_198 [1] : vector<8x8xf32> to vector<8xf32>
    %450 = vector.shape_cast %449 : vector<8xf32> to vector<8x1xf32>
    %451 = vector.broadcast %450 : vector<8x1xf32> to vector<8x8xf32>
    %452 = arith.subf %448, %451 : vector<8x8xf32>
    %453 = math.exp %452 : vector<8x8xf32>
    %cst_199 = arith.constant dense<0.000000e+00> : vector<8xf32>
    %454 = vector.multi_reduction <add>, %453, %cst_199 [1] : vector<8x8xf32> to vector<8xf32>
    %455 = vector.shape_cast %454 : vector<8xf32> to vector<8x1xf32>
    %456 = vector.broadcast %455 : vector<8x1xf32> to vector<8x8xf32>
    %457 = arith.divf %453, %456 : vector<8x8xf32>
    %458 = arith.truncf %457 : vector<8x8xf32> to vector<8x8xbf16>
    %cst_200 = arith.constant dense<0.000000e+00> : vector<8x32xf32>
    %459 = tpu.matmul %458, %443, %cst_200 {dimension_numbers = #tpu.dot_dimension_numbers<[1], [0], [0], [1], [0, 0, 1, 1], [], []>} : vector<8x8xbf16>, vector<8x32xbf16>, vector<8x32xf32> -> vector<8x32xf32>
    %460 = arith.addf %439, %459 : vector<8x32xf32>
    %461 = vector.extract_strided_slice %414 {offsets = [0, 64], sizes = [8, 32], strides = [1, 1]} : vector<8x128xf32> to vector<8x32xf32>
    %462 = arith.truncf %461 : vector<8x32xf32> to vector<8x32xbf16>
    %463 = vector.extract_strided_slice %415 {offsets = [0, 64], sizes = [8, 32], strides = [1, 1]} : vector<8x160xf32> to vector<8x32xf32>
    %464 = arith.truncf %463 : vector<8x32xf32> to vector<8x32xbf16>
    %cst_201 = arith.constant dense<0.000000e+00> : vector<8x8xf32>
    %465 = tpu.matmul %462, %417, %cst_201 {dimension_numbers = #tpu.dot_dimension_numbers<[1], [1], [0], [0], [0, 0, 1, 0], [], []>} : vector<8x32xbf16>, vector<8x32xbf16>, vector<8x8xf32> -> vector<8x8xf32>
    %cst_202 = arith.constant 0.353553385 : f32
    %466 = vector.broadcast %cst_202 : f32 to vector<8x8xf32>
    %467 = arith.mulf %465, %466 : vector<8x8xf32>
    %cst_203 = arith.constant 0xFF800000 : f32
    %468 = vector.broadcast %cst_203 : f32 to vector<8x8xf32>
    %469 = arith.select %2, %467, %468 : vector<8x8xi1>, vector<8x8xf32>
    %cst_204 = arith.constant dense<0xFF800000> : vector<8xf32>
    %470 = vector.multi_reduction <maximumf>, %469, %cst_204 [1] : vector<8x8xf32> to vector<8xf32>
    %471 = vector.shape_cast %470 : vector<8xf32> to vector<8x1xf32>
    %472 = vector.broadcast %471 : vector<8x1xf32> to vector<8x8xf32>
    %473 = arith.subf %469, %472 : vector<8x8xf32>
    %474 = math.exp %473 : vector<8x8xf32>
    %cst_205 = arith.constant dense<0.000000e+00> : vector<8xf32>
    %475 = vector.multi_reduction <add>, %474, %cst_205 [1] : vector<8x8xf32> to vector<8xf32>
    %476 = vector.shape_cast %475 : vector<8xf32> to vector<8x1xf32>
    %477 = vector.broadcast %476 : vector<8x1xf32> to vector<8x8xf32>
    %478 = arith.divf %474, %477 : vector<8x8xf32>
    %479 = arith.truncf %478 : vector<8x8xf32> to vector<8x8xbf16>
    %cst_206 = arith.constant dense<0.000000e+00> : vector<8x32xf32>
    %480 = tpu.matmul %479, %464, %cst_206 {dimension_numbers = #tpu.dot_dimension_numbers<[1], [0], [0], [1], [0, 0, 1, 1], [], []>} : vector<8x8xbf16>, vector<8x32xbf16>, vector<8x32xf32> -> vector<8x32xf32>
    %481 = arith.addf %460, %480 : vector<8x32xf32>
    %482 = vector.extract_strided_slice %414 {offsets = [0, 96], sizes = [8, 32], strides = [1, 1]} : vector<8x128xf32> to vector<8x32xf32>
    %483 = arith.truncf %482 : vector<8x32xf32> to vector<8x32xbf16>
    %484 = vector.extract_strided_slice %415 {offsets = [0, 96], sizes = [8, 32], strides = [1, 1]} : vector<8x160xf32> to vector<8x32xf32>
    %485 = arith.truncf %484 : vector<8x32xf32> to vector<8x32xbf16>
    %cst_207 = arith.constant dense<0.000000e+00> : vector<8x8xf32>
    %486 = tpu.matmul %483, %417, %cst_207 {dimension_numbers = #tpu.dot_dimension_numbers<[1], [1], [0], [0], [0, 0, 1, 0], [], []>} : vector<8x32xbf16>, vector<8x32xbf16>, vector<8x8xf32> -> vector<8x8xf32>
    %cst_208 = arith.constant 0.353553385 : f32
    %487 = vector.broadcast %cst_208 : f32 to vector<8x8xf32>
    %488 = arith.mulf %486, %487 : vector<8x8xf32>
    %cst_209 = arith.constant 0xFF800000 : f32
    %489 = vector.broadcast %cst_209 : f32 to vector<8x8xf32>
    %490 = arith.select %2, %488, %489 : vector<8x8xi1>, vector<8x8xf32>
    %cst_210 = arith.constant dense<0xFF800000> : vector<8xf32>
    %491 = vector.multi_reduction <maximumf>, %490, %cst_210 [1] : vector<8x8xf32> to vector<8xf32>
    %492 = vector.shape_cast %491 : vector<8xf32> to vector<8x1xf32>
    %493 = vector.broadcast %492 : vector<8x1xf32> to vector<8x8xf32>
    %494 = arith.subf %490, %493 : vector<8x8xf32>
    %495 = math.exp %494 : vector<8x8xf32>
    %cst_211 = arith.constant dense<0.000000e+00> : vector<8xf32>
    %496 = vector.multi_reduction <add>, %495, %cst_211 [1] : vector<8x8xf32> to vector<8xf32>
    %497 = vector.shape_cast %496 : vector<8xf32> to vector<8x1xf32>
    %498 = vector.broadcast %497 : vector<8x1xf32> to vector<8x8xf32>
    %499 = arith.divf %495, %498 : vector<8x8xf32>
    %500 = arith.truncf %499 : vector<8x8xf32> to vector<8x8xbf16>
    %cst_212 = arith.constant dense<0.000000e+00> : vector<8x32xf32>
    %501 = tpu.matmul %500, %485, %cst_212 {dimension_numbers = #tpu.dot_dimension_numbers<[1], [0], [0], [1], [0, 0, 1, 1], [], []>} : vector<8x8xbf16>, vector<8x32xbf16>, vector<8x32xf32> -> vector<8x32xf32>
    %502 = arith.addf %481, %501 : vector<8x32xf32>
    %503 = arith.addf %408, %502 : vector<8x32xf32>
    %c1_213 = arith.constant 1 : index
    %c0_214 = arith.constant 0 : index
    %c0_215 = arith.constant 0 : index
    %c0_216 = arith.constant 0 : index
    %504 = vector.load %arg9[%c1_213, %c0_214, %c0_215, %c0_216] : memref<2x3x1x32xf32, #tpu.memory_space<vmem>>, vector<1x1x1x32xf32>
    %505 = vector.shape_cast %504 : vector<1x1x1x32xf32> to vector<1x32xf32>
    %c1_217 = arith.constant 1 : index
    %c0_218 = arith.constant 0 : index
    %c0_219 = arith.constant 0 : index
    %c0_220 = arith.constant 0 : index
    %506 = vector.load %arg10[%c1_217, %c0_218, %c0_219, %c0_220] : memref<2x3x1x32xf32, #tpu.memory_space<vmem>>, vector<1x1x1x32xf32>
    %507 = vector.shape_cast %506 : vector<1x1x1x32xf32> to vector<1x32xf32>
    %cst_221 = arith.constant dense<0.000000e+00> : vector<8xf32>
    %508 = vector.multi_reduction <add>, %503, %cst_221 [1] : vector<8x32xf32> to vector<8xf32>
    %509 = vector.shape_cast %508 : vector<8xf32> to vector<8x1xf32>
    %cst_222 = arith.constant 3.200000e+01 : f32
    %510 = vector.broadcast %cst_222 : f32 to vector<8x1xf32>
    %511 = arith.divf %509, %510 : vector<8x1xf32>
    %512 = vector.broadcast %511 : vector<8x1xf32> to vector<8x32xf32>
    %513 = arith.subf %503, %512 : vector<8x32xf32>
    %514 = arith.mulf %513, %513 : vector<8x32xf32>
    %cst_223 = arith.constant dense<0.000000e+00> : vector<8xf32>
    %515 = vector.multi_reduction <add>, %514, %cst_223 [1] : vector<8x32xf32> to vector<8xf32>
    %516 = vector.shape_cast %515 : vector<8xf32> to vector<8x1xf32>
    %cst_224 = arith.constant 3.200000e+01 : f32
    %517 = vector.broadcast %cst_224 : f32 to vector<8x1xf32>
    %518 = arith.divf %516, %517 : vector<8x1xf32>
    %519 = vector.broadcast %511 : vector<8x1xf32> to vector<8x32xf32>
    %520 = arith.subf %503, %519 : vector<8x32xf32>
    %cst_225 = arith.constant 9.99999974E-6 : f32
    %521 = vector.broadcast %cst_225 : f32 to vector<8x1xf32>
    %522 = arith.addf %518, %521 : vector<8x1xf32>
    %523 = math.rsqrt %522 : vector<8x1xf32>
    %524 = vector.broadcast %523 : vector<8x1xf32> to vector<8x32xf32>
    %525 = arith.mulf %520, %524 : vector<8x32xf32>
    %526 = vector.broadcast %505 : vector<1x32xf32> to vector<8x32xf32>
    %527 = arith.mulf %525, %526 : vector<8x32xf32>
    %528 = vector.broadcast %507 : vector<1x32xf32> to vector<8x32xf32>
    %529 = arith.addf %527, %528 : vector<8x32xf32>
    %c1_226 = arith.constant 1 : index
    %c0_227 = arith.constant 0 : index
    %c0_228 = arith.constant 0 : index
    %530 = vector.load %arg7[%c1_226, %c0_227, %c0_228] : memref<2x32x128xbf16, #tpu.memory_space<vmem>>, vector<1x32x128xbf16>
    %531 = vector.shape_cast %530 : vector<1x32x128xbf16> to vector<32x128xbf16>
    %c1_229 = arith.constant 1 : index
    %c0_230 = arith.constant 0 : index
    %c0_231 = arith.constant 0 : index
    %532 = vector.load %arg8[%c1_229, %c0_230, %c0_231] : memref<2x32x160xbf16, #tpu.memory_space<vmem>>, vector<1x32x160xbf16>
    %533 = vector.shape_cast %532 : vector<1x32x160xbf16> to vector<32x160xbf16>
    %534 = arith.truncf %285 : vector<16x32xf32> to vector<16x32xbf16>
    %cst_232 = arith.constant dense<0.000000e+00> : vector<16x128xf32>
    %535 = tpu.matmul %534, %531, %cst_232 {dimension_numbers = #tpu.dot_dimension_numbers<[1], [0], [0], [1], [0, 0, 1, 1], [], []>} : vector<16x32xbf16>, vector<32x128xbf16>, vector<16x128xf32> -> vector<16x128xf32>
    %cst_233 = arith.constant dense<0.000000e+00> : vector<16x160xf32>
    %536 = tpu.matmul %534, %533, %cst_233 {dimension_numbers = #tpu.dot_dimension_numbers<[1], [0], [0], [1], [0, 0, 1, 1], [], []>} : vector<16x32xbf16>, vector<32x160xbf16>, vector<16x160xf32> -> vector<16x160xf32>
    %537 = vector.extract_strided_slice %536 {offsets = [0, 128], sizes = [16, 32], strides = [1, 1]} : vector<16x160xf32> to vector<16x32xf32>
    %538 = arith.truncf %537 : vector<16x32xf32> to vector<16x32xbf16>
    %cst_234 = arith.constant 0.000000e+00 : f32
    %539 = vector.broadcast %cst_234 : f32 to vector<16x32xf32>
    %540 = vector.extract_strided_slice %535 {offsets = [0, 0], sizes = [16, 32], strides = [1, 1]} : vector<16x128xf32> to vector<16x32xf32>
    %541 = arith.truncf %540 : vector<16x32xf32> to vector<16x32xbf16>
    %542 = vector.extract_strided_slice %536 {offsets = [0, 0], sizes = [16, 32], strides = [1, 1]} : vector<16x160xf32> to vector<16x32xf32>
    %543 = arith.truncf %542 : vector<16x32xf32> to vector<16x32xbf16>
    %cst_235 = arith.constant dense<0.000000e+00> : vector<16x16xf32>
    %544 = tpu.matmul %541, %538, %cst_235 {dimension_numbers = #tpu.dot_dimension_numbers<[1], [1], [0], [0], [0, 0, 1, 0], [], []>} : vector<16x32xbf16>, vector<16x32xbf16>, vector<16x16xf32> -> vector<16x16xf32>
    %cst_236 = arith.constant 0.353553385 : f32
    %545 = vector.broadcast %cst_236 : f32 to vector<16x16xf32>
    %546 = arith.mulf %544, %545 : vector<16x16xf32>
    %cst_237 = arith.constant dense<0xFF800000> : vector<16xf32>
    %547 = vector.multi_reduction <maximumf>, %546, %cst_237 [1] : vector<16x16xf32> to vector<16xf32>
    %548 = vector.shape_cast %547 : vector<16xf32> to vector<16x1xf32>
    %549 = vector.broadcast %548 : vector<16x1xf32> to vector<16x16xf32>
    %550 = arith.subf %546, %549 : vector<16x16xf32>
    %551 = math.exp %550 : vector<16x16xf32>
    %cst_238 = arith.constant dense<0.000000e+00> : vector<16xf32>
    %552 = vector.multi_reduction <add>, %551, %cst_238 [1] : vector<16x16xf32> to vector<16xf32>
    %553 = vector.shape_cast %552 : vector<16xf32> to vector<16x1xf32>
    %554 = vector.broadcast %553 : vector<16x1xf32> to vector<16x16xf32>
    %555 = arith.divf %551, %554 : vector<16x16xf32>
    %556 = arith.truncf %555 : vector<16x16xf32> to vector<16x16xbf16>
    %cst_239 = arith.constant dense<0.000000e+00> : vector<16x32xf32>
    %557 = tpu.matmul %556, %543, %cst_239 {dimension_numbers = #tpu.dot_dimension_numbers<[1], [0], [0], [1], [0, 0, 1, 1], [], []>} : vector<16x16xbf16>, vector<16x32xbf16>, vector<16x32xf32> -> vector<16x32xf32>
    %558 = arith.addf %539, %557 : vector<16x32xf32>
    %559 = vector.extract_strided_slice %535 {offsets = [0, 32], sizes = [16, 32], strides = [1, 1]} : vector<16x128xf32> to vector<16x32xf32>
    %560 = arith.truncf %559 : vector<16x32xf32> to vector<16x32xbf16>
    %561 = vector.extract_strided_slice %536 {offsets = [0, 32], sizes = [16, 32], strides = [1, 1]} : vector<16x160xf32> to vector<16x32xf32>
    %562 = arith.truncf %561 : vector<16x32xf32> to vector<16x32xbf16>
    %cst_240 = arith.constant dense<0.000000e+00> : vector<16x16xf32>
    %563 = tpu.matmul %560, %538, %cst_240 {dimension_numbers = #tpu.dot_dimension_numbers<[1], [1], [0], [0], [0, 0, 1, 0], [], []>} : vector<16x32xbf16>, vector<16x32xbf16>, vector<16x16xf32> -> vector<16x16xf32>
    %cst_241 = arith.constant 0.353553385 : f32
    %564 = vector.broadcast %cst_241 : f32 to vector<16x16xf32>
    %565 = arith.mulf %563, %564 : vector<16x16xf32>
    %cst_242 = arith.constant dense<0xFF800000> : vector<16xf32>
    %566 = vector.multi_reduction <maximumf>, %565, %cst_242 [1] : vector<16x16xf32> to vector<16xf32>
    %567 = vector.shape_cast %566 : vector<16xf32> to vector<16x1xf32>
    %568 = vector.broadcast %567 : vector<16x1xf32> to vector<16x16xf32>
    %569 = arith.subf %565, %568 : vector<16x16xf32>
    %570 = math.exp %569 : vector<16x16xf32>
    %cst_243 = arith.constant dense<0.000000e+00> : vector<16xf32>
    %571 = vector.multi_reduction <add>, %570, %cst_243 [1] : vector<16x16xf32> to vector<16xf32>
    %572 = vector.shape_cast %571 : vector<16xf32> to vector<16x1xf32>
    %573 = vector.broadcast %572 : vector<16x1xf32> to vector<16x16xf32>
    %574 = arith.divf %570, %573 : vector<16x16xf32>
    %575 = arith.truncf %574 : vector<16x16xf32> to vector<16x16xbf16>
    %cst_244 = arith.constant dense<0.000000e+00> : vector<16x32xf32>
    %576 = tpu.matmul %575, %562, %cst_244 {dimension_numbers = #tpu.dot_dimension_numbers<[1], [0], [0], [1], [0, 0, 1, 1], [], []>} : vector<16x16xbf16>, vector<16x32xbf16>, vector<16x32xf32> -> vector<16x32xf32>
    %577 = arith.addf %558, %576 : vector<16x32xf32>
    %578 = vector.extract_strided_slice %535 {offsets = [0, 64], sizes = [16, 32], strides = [1, 1]} : vector<16x128xf32> to vector<16x32xf32>
    %579 = arith.truncf %578 : vector<16x32xf32> to vector<16x32xbf16>
    %580 = vector.extract_strided_slice %536 {offsets = [0, 64], sizes = [16, 32], strides = [1, 1]} : vector<16x160xf32> to vector<16x32xf32>
    %581 = arith.truncf %580 : vector<16x32xf32> to vector<16x32xbf16>
    %cst_245 = arith.constant dense<0.000000e+00> : vector<16x16xf32>
    %582 = tpu.matmul %579, %538, %cst_245 {dimension_numbers = #tpu.dot_dimension_numbers<[1], [1], [0], [0], [0, 0, 1, 0], [], []>} : vector<16x32xbf16>, vector<16x32xbf16>, vector<16x16xf32> -> vector<16x16xf32>
    %cst_246 = arith.constant 0.353553385 : f32
    %583 = vector.broadcast %cst_246 : f32 to vector<16x16xf32>
    %584 = arith.mulf %582, %583 : vector<16x16xf32>
    %cst_247 = arith.constant dense<0xFF800000> : vector<16xf32>
    %585 = vector.multi_reduction <maximumf>, %584, %cst_247 [1] : vector<16x16xf32> to vector<16xf32>
    %586 = vector.shape_cast %585 : vector<16xf32> to vector<16x1xf32>
    %587 = vector.broadcast %586 : vector<16x1xf32> to vector<16x16xf32>
    %588 = arith.subf %584, %587 : vector<16x16xf32>
    %589 = math.exp %588 : vector<16x16xf32>
    %cst_248 = arith.constant dense<0.000000e+00> : vector<16xf32>
    %590 = vector.multi_reduction <add>, %589, %cst_248 [1] : vector<16x16xf32> to vector<16xf32>
    %591 = vector.shape_cast %590 : vector<16xf32> to vector<16x1xf32>
    %592 = vector.broadcast %591 : vector<16x1xf32> to vector<16x16xf32>
    %593 = arith.divf %589, %592 : vector<16x16xf32>
    %594 = arith.truncf %593 : vector<16x16xf32> to vector<16x16xbf16>
    %cst_249 = arith.constant dense<0.000000e+00> : vector<16x32xf32>
    %595 = tpu.matmul %594, %581, %cst_249 {dimension_numbers = #tpu.dot_dimension_numbers<[1], [0], [0], [1], [0, 0, 1, 1], [], []>} : vector<16x16xbf16>, vector<16x32xbf16>, vector<16x32xf32> -> vector<16x32xf32>
    %596 = arith.addf %577, %595 : vector<16x32xf32>
    %597 = vector.extract_strided_slice %535 {offsets = [0, 96], sizes = [16, 32], strides = [1, 1]} : vector<16x128xf32> to vector<16x32xf32>
    %598 = arith.truncf %597 : vector<16x32xf32> to vector<16x32xbf16>
    %599 = vector.extract_strided_slice %536 {offsets = [0, 96], sizes = [16, 32], strides = [1, 1]} : vector<16x160xf32> to vector<16x32xf32>
    %600 = arith.truncf %599 : vector<16x32xf32> to vector<16x32xbf16>
    %cst_250 = arith.constant dense<0.000000e+00> : vector<16x16xf32>
    %601 = tpu.matmul %598, %538, %cst_250 {dimension_numbers = #tpu.dot_dimension_numbers<[1], [1], [0], [0], [0, 0, 1, 0], [], []>} : vector<16x32xbf16>, vector<16x32xbf16>, vector<16x16xf32> -> vector<16x16xf32>
    %cst_251 = arith.constant 0.353553385 : f32
    %602 = vector.broadcast %cst_251 : f32 to vector<16x16xf32>
    %603 = arith.mulf %601, %602 : vector<16x16xf32>
    %cst_252 = arith.constant dense<0xFF800000> : vector<16xf32>
    %604 = vector.multi_reduction <maximumf>, %603, %cst_252 [1] : vector<16x16xf32> to vector<16xf32>
    %605 = vector.shape_cast %604 : vector<16xf32> to vector<16x1xf32>
    %606 = vector.broadcast %605 : vector<16x1xf32> to vector<16x16xf32>
    %607 = arith.subf %603, %606 : vector<16x16xf32>
    %608 = math.exp %607 : vector<16x16xf32>
    %cst_253 = arith.constant dense<0.000000e+00> : vector<16xf32>
    %609 = vector.multi_reduction <add>, %608, %cst_253 [1] : vector<16x16xf32> to vector<16xf32>
    %610 = vector.shape_cast %609 : vector<16xf32> to vector<16x1xf32>
    %611 = vector.broadcast %610 : vector<16x1xf32> to vector<16x16xf32>
    %612 = arith.divf %608, %611 : vector<16x16xf32>
    %613 = arith.truncf %612 : vector<16x16xf32> to vector<16x16xbf16>
    %cst_254 = arith.constant dense<0.000000e+00> : vector<16x32xf32>
    %614 = tpu.matmul %613, %600, %cst_254 {dimension_numbers = #tpu.dot_dimension_numbers<[1], [0], [0], [1], [0, 0, 1, 1], [], []>} : vector<16x16xbf16>, vector<16x32xbf16>, vector<16x32xf32> -> vector<16x32xf32>
    %615 = arith.addf %596, %614 : vector<16x32xf32>
    %616 = arith.addf %285, %615 : vector<16x32xf32>
    %c1_255 = arith.constant 1 : index
    %c0_256 = arith.constant 0 : index
    %c0_257 = arith.constant 0 : index
    %c0_258 = arith.constant 0 : index
    %617 = vector.load %arg11[%c1_255, %c0_256, %c0_257, %c0_258] : memref<2x2x1x32xf32, #tpu.memory_space<vmem>>, vector<1x1x1x32xf32>
    %618 = vector.shape_cast %617 : vector<1x1x1x32xf32> to vector<1x32xf32>
    %c1_259 = arith.constant 1 : index
    %c0_260 = arith.constant 0 : index
    %c0_261 = arith.constant 0 : index
    %c0_262 = arith.constant 0 : index
    %619 = vector.load %arg12[%c1_259, %c0_260, %c0_261, %c0_262] : memref<2x2x1x32xf32, #tpu.memory_space<vmem>>, vector<1x1x1x32xf32>
    %620 = vector.shape_cast %619 : vector<1x1x1x32xf32> to vector<1x32xf32>
    %cst_263 = arith.constant dense<0.000000e+00> : vector<16xf32>
    %621 = vector.multi_reduction <add>, %616, %cst_263 [1] : vector<16x32xf32> to vector<16xf32>
    %622 = vector.shape_cast %621 : vector<16xf32> to vector<16x1xf32>
    %cst_264 = arith.constant 3.200000e+01 : f32
    %623 = vector.broadcast %cst_264 : f32 to vector<16x1xf32>
    %624 = arith.divf %622, %623 : vector<16x1xf32>
    %625 = vector.broadcast %624 : vector<16x1xf32> to vector<16x32xf32>
    %626 = arith.subf %616, %625 : vector<16x32xf32>
    %627 = arith.mulf %626, %626 : vector<16x32xf32>
    %cst_265 = arith.constant dense<0.000000e+00> : vector<16xf32>
    %628 = vector.multi_reduction <add>, %627, %cst_265 [1] : vector<16x32xf32> to vector<16xf32>
    %629 = vector.shape_cast %628 : vector<16xf32> to vector<16x1xf32>
    %cst_266 = arith.constant 3.200000e+01 : f32
    %630 = vector.broadcast %cst_266 : f32 to vector<16x1xf32>
    %631 = arith.divf %629, %630 : vector<16x1xf32>
    %632 = vector.broadcast %624 : vector<16x1xf32> to vector<16x32xf32>
    %633 = arith.subf %616, %632 : vector<16x32xf32>
    %cst_267 = arith.constant 9.99999974E-6 : f32
    %634 = vector.broadcast %cst_267 : f32 to vector<16x1xf32>
    %635 = arith.addf %631, %634 : vector<16x1xf32>
    %636 = math.rsqrt %635 : vector<16x1xf32>
    %637 = vector.broadcast %636 : vector<16x1xf32> to vector<16x32xf32>
    %638 = arith.mulf %633, %637 : vector<16x32xf32>
    %639 = vector.broadcast %618 : vector<1x32xf32> to vector<16x32xf32>
    %640 = arith.mulf %638, %639 : vector<16x32xf32>
    %641 = vector.broadcast %620 : vector<1x32xf32> to vector<16x32xf32>
    %642 = arith.addf %640, %641 : vector<16x32xf32>
    %c1_268 = arith.constant 1 : index
    %c0_269 = arith.constant 0 : index
    %c0_270 = arith.constant 0 : index
    %643 = vector.load %arg17[%c1_268, %c0_269, %c0_270] : memref<2x32x128xbf16, #tpu.memory_space<vmem>>, vector<1x32x128xbf16>
    %644 = vector.shape_cast %643 : vector<1x32x128xbf16> to vector<32x128xbf16>
    %c1_271 = arith.constant 1 : index
    %c0_272 = arith.constant 0 : index
    %c0_273 = arith.constant 0 : index
    %645 = vector.load %arg18[%c1_271, %c0_272, %c0_273] : memref<2x1x128xf32, #tpu.memory_space<vmem>>, vector<1x1x128xf32>
    %646 = vector.shape_cast %645 : vector<1x1x128xf32> to vector<1x128xf32>
    %c1_274 = arith.constant 1 : index
    %c0_275 = arith.constant 0 : index
    %c0_276 = arith.constant 0 : index
    %647 = vector.load %arg19[%c1_274, %c0_275, %c0_276] : memref<2x128x32xbf16, #tpu.memory_space<vmem>>, vector<1x128x32xbf16>
    %648 = vector.shape_cast %647 : vector<1x128x32xbf16> to vector<128x32xbf16>
    %c1_277 = arith.constant 1 : index
    %c0_278 = arith.constant 0 : index
    %c0_279 = arith.constant 0 : index
    %649 = vector.load %arg20[%c1_277, %c0_278, %c0_279] : memref<2x1x32xf32, #tpu.memory_space<vmem>>, vector<1x1x32xf32>
    %650 = vector.shape_cast %649 : vector<1x1x32xf32> to vector<1x32xf32>
    %651 = arith.truncf %642 : vector<16x32xf32> to vector<16x32xbf16>
    %cst_280 = arith.constant dense<0.000000e+00> : vector<16x128xf32>
    %652 = tpu.matmul %651, %644, %cst_280 {dimension_numbers = #tpu.dot_dimension_numbers<[1], [0], [0], [1], [0, 0, 1, 1], [], []>} : vector<16x32xbf16>, vector<32x128xbf16>, vector<16x128xf32> -> vector<16x128xf32>
    %653 = vector.broadcast %646 : vector<1x128xf32> to vector<16x128xf32>
    %654 = arith.addf %652, %653 : vector<16x128xf32>
    %cst_281 = arith.constant 0.000000e+00 : f32
    %655 = vector.broadcast %cst_281 : f32 to vector<16x128xf32>
    %656 = arith.maximumf %654, %655 : vector<16x128xf32>
    %657 = arith.truncf %656 : vector<16x128xf32> to vector<16x128xbf16>
    %cst_282 = arith.constant dense<0.000000e+00> : vector<16x32xf32>
    %658 = tpu.matmul %657, %648, %cst_282 {dimension_numbers = #tpu.dot_dimension_numbers<[1], [0], [0], [1], [0, 0, 1, 1], [], []>} : vector<16x128xbf16>, vector<128x32xbf16>, vector<16x32xf32> -> vector<16x32xf32>
    %659 = vector.broadcast %650 : vector<1x32xf32> to vector<16x32xf32>
    %660 = arith.addf %658, %659 : vector<16x32xf32>
    %661 = arith.addf %642, %660 : vector<16x32xf32>
    %c1_283 = arith.constant 1 : index
    %c1_284 = arith.constant 1 : index
    %c0_285 = arith.constant 0 : index
    %c0_286 = arith.constant 0 : index
    %662 = vector.load %arg11[%c1_283, %c1_284, %c0_285, %c0_286] : memref<2x2x1x32xf32, #tpu.memory_space<vmem>>, vector<1x1x1x32xf32>
    %663 = vector.shape_cast %662 : vector<1x1x1x32xf32> to vector<1x32xf32>
    %c1_287 = arith.constant 1 : index
    %c1_288 = arith.constant 1 : index
    %c0_289 = arith.constant 0 : index
    %c0_290 = arith.constant 0 : index
    %664 = vector.load %arg12[%c1_287, %c1_288, %c0_289, %c0_290] : memref<2x2x1x32xf32, #tpu.memory_space<vmem>>, vector<1x1x1x32xf32>
    %665 = vector.shape_cast %664 : vector<1x1x1x32xf32> to vector<1x32xf32>
    %cst_291 = arith.constant dense<0.000000e+00> : vector<16xf32>
    %666 = vector.multi_reduction <add>, %661, %cst_291 [1] : vector<16x32xf32> to vector<16xf32>
    %667 = vector.shape_cast %666 : vector<16xf32> to vector<16x1xf32>
    %cst_292 = arith.constant 3.200000e+01 : f32
    %668 = vector.broadcast %cst_292 : f32 to vector<16x1xf32>
    %669 = arith.divf %667, %668 : vector<16x1xf32>
    %670 = vector.broadcast %669 : vector<16x1xf32> to vector<16x32xf32>
    %671 = arith.subf %661, %670 : vector<16x32xf32>
    %672 = arith.mulf %671, %671 : vector<16x32xf32>
    %cst_293 = arith.constant dense<0.000000e+00> : vector<16xf32>
    %673 = vector.multi_reduction <add>, %672, %cst_293 [1] : vector<16x32xf32> to vector<16xf32>
    %674 = vector.shape_cast %673 : vector<16xf32> to vector<16x1xf32>
    %cst_294 = arith.constant 3.200000e+01 : f32
    %675 = vector.broadcast %cst_294 : f32 to vector<16x1xf32>
    %676 = arith.divf %674, %675 : vector<16x1xf32>
    %677 = vector.broadcast %669 : vector<16x1xf32> to vector<16x32xf32>
    %678 = arith.subf %661, %677 : vector<16x32xf32>
    %cst_295 = arith.constant 9.99999974E-6 : f32
    %679 = vector.broadcast %cst_295 : f32 to vector<16x1xf32>
    %680 = arith.addf %676, %679 : vector<16x1xf32>
    %681 = math.rsqrt %680 : vector<16x1xf32>
    %682 = vector.broadcast %681 : vector<16x1xf32> to vector<16x32xf32>
    %683 = arith.mulf %678, %682 : vector<16x32xf32>
    %684 = vector.broadcast %663 : vector<1x32xf32> to vector<16x32xf32>
    %685 = arith.mulf %683, %684 : vector<16x32xf32>
    %686 = vector.broadcast %665 : vector<1x32xf32> to vector<16x32xf32>
    %687 = arith.addf %685, %686 : vector<16x32xf32>
    %c1_296 = arith.constant 1 : index
    %c0_297 = arith.constant 0 : index
    %c0_298 = arith.constant 0 : index
    %688 = vector.load %arg5[%c1_296, %c0_297, %c0_298] : memref<2x32x128xbf16, #tpu.memory_space<vmem>>, vector<1x32x128xbf16>
    %689 = vector.shape_cast %688 : vector<1x32x128xbf16> to vector<32x128xbf16>
    %c1_299 = arith.constant 1 : index
    %c0_300 = arith.constant 0 : index
    %c0_301 = arith.constant 0 : index
    %690 = vector.load %arg6[%c1_299, %c0_300, %c0_301] : memref<2x32x160xbf16, #tpu.memory_space<vmem>>, vector<1x32x160xbf16>
    %691 = vector.shape_cast %690 : vector<1x32x160xbf16> to vector<32x160xbf16>
    %692 = arith.truncf %529 : vector<8x32xf32> to vector<8x32xbf16>
    %693 = arith.truncf %687 : vector<16x32xf32> to vector<16x32xbf16>
    %cst_302 = arith.constant dense<0.000000e+00> : vector<8x128xf32>
    %694 = tpu.matmul %692, %689, %cst_302 {dimension_numbers = #tpu.dot_dimension_numbers<[1], [0], [0], [1], [0, 0, 1, 1], [], []>} : vector<8x32xbf16>, vector<32x128xbf16>, vector<8x128xf32> -> vector<8x128xf32>
    %cst_303 = arith.constant dense<0.000000e+00> : vector<16x160xf32>
    %695 = tpu.matmul %693, %691, %cst_303 {dimension_numbers = #tpu.dot_dimension_numbers<[1], [0], [0], [1], [0, 0, 1, 1], [], []>} : vector<16x32xbf16>, vector<32x160xbf16>, vector<16x160xf32> -> vector<16x160xf32>
    %696 = vector.extract_strided_slice %695 {offsets = [0, 128], sizes = [16, 32], strides = [1, 1]} : vector<16x160xf32> to vector<16x32xf32>
    %697 = arith.truncf %696 : vector<16x32xf32> to vector<16x32xbf16>
    %cst_304 = arith.constant 0.000000e+00 : f32
    %698 = vector.broadcast %cst_304 : f32 to vector<8x32xf32>
    %699 = vector.extract_strided_slice %694 {offsets = [0, 0], sizes = [8, 32], strides = [1, 1]} : vector<8x128xf32> to vector<8x32xf32>
    %700 = arith.truncf %699 : vector<8x32xf32> to vector<8x32xbf16>
    %701 = vector.extract_strided_slice %695 {offsets = [0, 0], sizes = [16, 32], strides = [1, 1]} : vector<16x160xf32> to vector<16x32xf32>
    %702 = arith.truncf %701 : vector<16x32xf32> to vector<16x32xbf16>
    %cst_305 = arith.constant dense<0.000000e+00> : vector<8x16xf32>
    %703 = tpu.matmul %700, %697, %cst_305 {dimension_numbers = #tpu.dot_dimension_numbers<[1], [1], [0], [0], [0, 0, 1, 0], [], []>} : vector<8x32xbf16>, vector<16x32xbf16>, vector<8x16xf32> -> vector<8x16xf32>
    %cst_306 = arith.constant 0.353553385 : f32
    %704 = vector.broadcast %cst_306 : f32 to vector<8x16xf32>
    %705 = arith.mulf %703, %704 : vector<8x16xf32>
    %706 = arith.truncf %705 : vector<8x16xf32> to vector<8x16xbf16>
    %cst_307 = arith.constant dense<0.000000e+00> : vector<8x32xf32>
    %707 = tpu.matmul %706, %702, %cst_307 {dimension_numbers = #tpu.dot_dimension_numbers<[1], [0], [0], [1], [0, 0, 1, 1], [], []>} : vector<8x16xbf16>, vector<16x32xbf16>, vector<8x32xf32> -> vector<8x32xf32>
    %708 = arith.addf %698, %707 : vector<8x32xf32>
    %709 = vector.extract_strided_slice %694 {offsets = [0, 32], sizes = [8, 32], strides = [1, 1]} : vector<8x128xf32> to vector<8x32xf32>
    %710 = arith.truncf %709 : vector<8x32xf32> to vector<8x32xbf16>
    %711 = vector.extract_strided_slice %695 {offsets = [0, 32], sizes = [16, 32], strides = [1, 1]} : vector<16x160xf32> to vector<16x32xf32>
    %712 = arith.truncf %711 : vector<16x32xf32> to vector<16x32xbf16>
    %cst_308 = arith.constant dense<0.000000e+00> : vector<8x16xf32>
    %713 = tpu.matmul %710, %697, %cst_308 {dimension_numbers = #tpu.dot_dimension_numbers<[1], [1], [0], [0], [0, 0, 1, 0], [], []>} : vector<8x32xbf16>, vector<16x32xbf16>, vector<8x16xf32> -> vector<8x16xf32>
    %cst_309 = arith.constant 0.353553385 : f32
    %714 = vector.broadcast %cst_309 : f32 to vector<8x16xf32>
    %715 = arith.mulf %713, %714 : vector<8x16xf32>
    %716 = arith.truncf %715 : vector<8x16xf32> to vector<8x16xbf16>
    %cst_310 = arith.constant dense<0.000000e+00> : vector<8x32xf32>
    %717 = tpu.matmul %716, %712, %cst_310 {dimension_numbers = #tpu.dot_dimension_numbers<[1], [0], [0], [1], [0, 0, 1, 1], [], []>} : vector<8x16xbf16>, vector<16x32xbf16>, vector<8x32xf32> -> vector<8x32xf32>
    %718 = arith.addf %708, %717 : vector<8x32xf32>
    %719 = vector.extract_strided_slice %694 {offsets = [0, 64], sizes = [8, 32], strides = [1, 1]} : vector<8x128xf32> to vector<8x32xf32>
    %720 = arith.truncf %719 : vector<8x32xf32> to vector<8x32xbf16>
    %721 = vector.extract_strided_slice %695 {offsets = [0, 64], sizes = [16, 32], strides = [1, 1]} : vector<16x160xf32> to vector<16x32xf32>
    %722 = arith.truncf %721 : vector<16x32xf32> to vector<16x32xbf16>
    %cst_311 = arith.constant dense<0.000000e+00> : vector<8x16xf32>
    %723 = tpu.matmul %720, %697, %cst_311 {dimension_numbers = #tpu.dot_dimension_numbers<[1], [1], [0], [0], [0, 0, 1, 0], [], []>} : vector<8x32xbf16>, vector<16x32xbf16>, vector<8x16xf32> -> vector<8x16xf32>
    %cst_312 = arith.constant 0.353553385 : f32
    %724 = vector.broadcast %cst_312 : f32 to vector<8x16xf32>
    %725 = arith.mulf %723, %724 : vector<8x16xf32>
    %726 = arith.truncf %725 : vector<8x16xf32> to vector<8x16xbf16>
    %cst_313 = arith.constant dense<0.000000e+00> : vector<8x32xf32>
    %727 = tpu.matmul %726, %722, %cst_313 {dimension_numbers = #tpu.dot_dimension_numbers<[1], [0], [0], [1], [0, 0, 1, 1], [], []>} : vector<8x16xbf16>, vector<16x32xbf16>, vector<8x32xf32> -> vector<8x32xf32>
    %728 = arith.addf %718, %727 : vector<8x32xf32>
    %729 = vector.extract_strided_slice %694 {offsets = [0, 96], sizes = [8, 32], strides = [1, 1]} : vector<8x128xf32> to vector<8x32xf32>
    %730 = arith.truncf %729 : vector<8x32xf32> to vector<8x32xbf16>
    %731 = vector.extract_strided_slice %695 {offsets = [0, 96], sizes = [16, 32], strides = [1, 1]} : vector<16x160xf32> to vector<16x32xf32>
    %732 = arith.truncf %731 : vector<16x32xf32> to vector<16x32xbf16>
    %cst_314 = arith.constant dense<0.000000e+00> : vector<8x16xf32>
    %733 = tpu.matmul %730, %697, %cst_314 {dimension_numbers = #tpu.dot_dimension_numbers<[1], [1], [0], [0], [0, 0, 1, 0], [], []>} : vector<8x32xbf16>, vector<16x32xbf16>, vector<8x16xf32> -> vector<8x16xf32>
    %cst_315 = arith.constant 0.353553385 : f32
    %734 = vector.broadcast %cst_315 : f32 to vector<8x16xf32>
    %735 = arith.mulf %733, %734 : vector<8x16xf32>
    %736 = arith.truncf %735 : vector<8x16xf32> to vector<8x16xbf16>
    %cst_316 = arith.constant dense<0.000000e+00> : vector<8x32xf32>
    %737 = tpu.matmul %736, %732, %cst_316 {dimension_numbers = #tpu.dot_dimension_numbers<[1], [0], [0], [1], [0, 0, 1, 1], [], []>} : vector<8x16xbf16>, vector<16x32xbf16>, vector<8x32xf32> -> vector<8x32xf32>
    %738 = arith.addf %728, %737 : vector<8x32xf32>
    %739 = arith.addf %529, %738 : vector<8x32xf32>
    %c1_317 = arith.constant 1 : index
    %c1_318 = arith.constant 1 : index
    %c0_319 = arith.constant 0 : index
    %c0_320 = arith.constant 0 : index
    %740 = vector.load %arg9[%c1_317, %c1_318, %c0_319, %c0_320] : memref<2x3x1x32xf32, #tpu.memory_space<vmem>>, vector<1x1x1x32xf32>
    %741 = vector.shape_cast %740 : vector<1x1x1x32xf32> to vector<1x32xf32>
    %c1_321 = arith.constant 1 : index
    %c1_322 = arith.constant 1 : index
    %c0_323 = arith.constant 0 : index
    %c0_324 = arith.constant 0 : index
    %742 = vector.load %arg10[%c1_321, %c1_322, %c0_323, %c0_324] : memref<2x3x1x32xf32, #tpu.memory_space<vmem>>, vector<1x1x1x32xf32>
    %743 = vector.shape_cast %742 : vector<1x1x1x32xf32> to vector<1x32xf32>
    %cst_325 = arith.constant dense<0.000000e+00> : vector<8xf32>
    %744 = vector.multi_reduction <add>, %739, %cst_325 [1] : vector<8x32xf32> to vector<8xf32>
    %745 = vector.shape_cast %744 : vector<8xf32> to vector<8x1xf32>
    %cst_326 = arith.constant 3.200000e+01 : f32
    %746 = vector.broadcast %cst_326 : f32 to vector<8x1xf32>
    %747 = arith.divf %745, %746 : vector<8x1xf32>
    %748 = vector.broadcast %747 : vector<8x1xf32> to vector<8x32xf32>
    %749 = arith.subf %739, %748 : vector<8x32xf32>
    %750 = arith.mulf %749, %749 : vector<8x32xf32>
    %cst_327 = arith.constant dense<0.000000e+00> : vector<8xf32>
    %751 = vector.multi_reduction <add>, %750, %cst_327 [1] : vector<8x32xf32> to vector<8xf32>
    %752 = vector.shape_cast %751 : vector<8xf32> to vector<8x1xf32>
    %cst_328 = arith.constant 3.200000e+01 : f32
    %753 = vector.broadcast %cst_328 : f32 to vector<8x1xf32>
    %754 = arith.divf %752, %753 : vector<8x1xf32>
    %755 = vector.broadcast %747 : vector<8x1xf32> to vector<8x32xf32>
    %756 = arith.subf %739, %755 : vector<8x32xf32>
    %cst_329 = arith.constant 9.99999974E-6 : f32
    %757 = vector.broadcast %cst_329 : f32 to vector<8x1xf32>
    %758 = arith.addf %754, %757 : vector<8x1xf32>
    %759 = math.rsqrt %758 : vector<8x1xf32>
    %760 = vector.broadcast %759 : vector<8x1xf32> to vector<8x32xf32>
    %761 = arith.mulf %756, %760 : vector<8x32xf32>
    %762 = vector.broadcast %741 : vector<1x32xf32> to vector<8x32xf32>
    %763 = arith.mulf %761, %762 : vector<8x32xf32>
    %764 = vector.broadcast %743 : vector<1x32xf32> to vector<8x32xf32>
    %765 = arith.addf %763, %764 : vector<8x32xf32>
    %c1_330 = arith.constant 1 : index
    %c0_331 = arith.constant 0 : index
    %c0_332 = arith.constant 0 : index
    %766 = vector.load %arg13[%c1_330, %c0_331, %c0_332] : memref<2x32x128xbf16, #tpu.memory_space<vmem>>, vector<1x32x128xbf16>
    %767 = vector.shape_cast %766 : vector<1x32x128xbf16> to vector<32x128xbf16>
    %c1_333 = arith.constant 1 : index
    %c0_334 = arith.constant 0 : index
    %c0_335 = arith.constant 0 : index
    %768 = vector.load %arg14[%c1_333, %c0_334, %c0_335] : memref<2x1x128xf32, #tpu.memory_space<vmem>>, vector<1x1x128xf32>
    %769 = vector.shape_cast %768 : vector<1x1x128xf32> to vector<1x128xf32>
    %c1_336 = arith.constant 1 : index
    %c0_337 = arith.constant 0 : index
    %c0_338 = arith.constant 0 : index
    %770 = vector.load %arg15[%c1_336, %c0_337, %c0_338] : memref<2x128x32xbf16, #tpu.memory_space<vmem>>, vector<1x128x32xbf16>
    %771 = vector.shape_cast %770 : vector<1x128x32xbf16> to vector<128x32xbf16>
    %c1_339 = arith.constant 1 : index
    %c0_340 = arith.constant 0 : index
    %c0_341 = arith.constant 0 : index
    %772 = vector.load %arg16[%c1_339, %c0_340, %c0_341] : memref<2x1x32xf32, #tpu.memory_space<vmem>>, vector<1x1x32xf32>
    %773 = vector.shape_cast %772 : vector<1x1x32xf32> to vector<1x32xf32>
    %774 = arith.truncf %765 : vector<8x32xf32> to vector<8x32xbf16>
    %cst_342 = arith.constant dense<0.000000e+00> : vector<8x128xf32>
    %775 = tpu.matmul %774, %767, %cst_342 {dimension_numbers = #tpu.dot_dimension_numbers<[1], [0], [0], [1], [0, 0, 1, 1], [], []>} : vector<8x32xbf16>, vector<32x128xbf16>, vector<8x128xf32> -> vector<8x128xf32>
    %776 = vector.broadcast %769 : vector<1x128xf32> to vector<8x128xf32>
    %777 = arith.addf %775, %776 : vector<8x128xf32>
    %cst_343 = arith.constant 0.000000e+00 : f32
    %778 = vector.broadcast %cst_343 : f32 to vector<8x128xf32>
    %779 = arith.maximumf %777, %778 : vector<8x128xf32>
    %780 = arith.truncf %779 : vector<8x128xf32> to vector<8x128xbf16>
    %cst_344 = arith.constant dense<0.000000e+00> : vector<8x32xf32>
    %781 = tpu.matmul %780, %771, %cst_344 {dimension_numbers = #tpu.dot_dimension_numbers<[1], [0], [0], [1], [0, 0, 1, 1], [], []>} : vector<8x128xbf16>, vector<128x32xbf16>, vector<8x32xf32> -> vector<8x32xf32>
    %782 = vector.broadcast %773 : vector<1x32xf32> to vector<8x32xf32>
    %783 = arith.addf %781, %782 : vector<8x32xf32>
    %784 = arith.addf %765, %783 : vector<8x32xf32>
    %c1_345 = arith.constant 1 : index
    %c2_346 = arith.constant 2 : index
    %c0_347 = arith.constant 0 : index
    %c0_348 = arith.constant 0 : index
    %785 = vector.load %arg9[%c1_345, %c2_346, %c0_347, %c0_348] : memref<2x3x1x32xf32, #tpu.memory_space<vmem>>, vector<1x1x1x32xf32>
    %786 = vector.shape_cast %785 : vector<1x1x1x32xf32> to vector<1x32xf32>
    %c1_349 = arith.constant 1 : index
    %c2_350 = arith.constant 2 : index
    %c0_351 = arith.constant 0 : index
    %c0_352 = arith.constant 0 : index
    %787 = vector.load %arg10[%c1_349, %c2_350, %c0_351, %c0_352] : memref<2x3x1x32xf32, #tpu.memory_space<vmem>>, vector<1x1x1x32xf32>
    %788 = vector.shape_cast %787 : vector<1x1x1x32xf32> to vector<1x32xf32>
    %cst_353 = arith.constant dense<0.000000e+00> : vector<8xf32>
    %789 = vector.multi_reduction <add>, %784, %cst_353 [1] : vector<8x32xf32> to vector<8xf32>
    %790 = vector.shape_cast %789 : vector<8xf32> to vector<8x1xf32>
    %cst_354 = arith.constant 3.200000e+01 : f32
    %791 = vector.broadcast %cst_354 : f32 to vector<8x1xf32>
    %792 = arith.divf %790, %791 : vector<8x1xf32>
    %793 = vector.broadcast %792 : vector<8x1xf32> to vector<8x32xf32>
    %794 = arith.subf %784, %793 : vector<8x32xf32>
    %795 = arith.mulf %794, %794 : vector<8x32xf32>
    %cst_355 = arith.constant dense<0.000000e+00> : vector<8xf32>
    %796 = vector.multi_reduction <add>, %795, %cst_355 [1] : vector<8x32xf32> to vector<8xf32>
    %797 = vector.shape_cast %796 : vector<8xf32> to vector<8x1xf32>
    %cst_356 = arith.constant 3.200000e+01 : f32
    %798 = vector.broadcast %cst_356 : f32 to vector<8x1xf32>
    %799 = arith.divf %797, %798 : vector<8x1xf32>
    %800 = vector.broadcast %792 : vector<8x1xf32> to vector<8x32xf32>
    %801 = arith.subf %784, %800 : vector<8x32xf32>
    %cst_357 = arith.constant 9.99999974E-6 : f32
    %802 = vector.broadcast %cst_357 : f32 to vector<8x1xf32>
    %803 = arith.addf %799, %802 : vector<8x1xf32>
    %804 = math.rsqrt %803 : vector<8x1xf32>
    %805 = vector.broadcast %804 : vector<8x1xf32> to vector<8x32xf32>
    %806 = arith.mulf %801, %805 : vector<8x32xf32>
    %807 = vector.broadcast %786 : vector<1x32xf32> to vector<8x32xf32>
    %808 = arith.mulf %806, %807 : vector<8x32xf32>
    %809 = vector.broadcast %788 : vector<1x32xf32> to vector<8x32xf32>
    %810 = arith.addf %808, %809 : vector<8x32xf32>
    %c0_358 = arith.constant 0 : index
    %c0_359 = arith.constant 0 : index
    %811 = vector.load %arg21[%c0_358, %c0_359] : memref<32x128xf32, #tpu.memory_space<vmem>>, vector<32x128xf32>
    %cst_360 = arith.constant dense<0.000000e+00> : vector<8x128xf32>
    %812 = tpu.matmul %810, %811, %cst_360 {dimension_numbers = #tpu.dot_dimension_numbers<[1], [0], [0], [1], [0, 0, 1, 1], [], []>} : vector<8x32xf32>, vector<32x128xf32>, vector<8x128xf32> -> vector<8x128xf32>
    %c0_361 = arith.constant 0 : index
    %c0_362 = arith.constant 0 : index
    %813 = vector.load %arg22[%c0_361, %c0_362] : memref<1x128xf32, #tpu.memory_space<vmem>>, vector<1x128xf32>
    %814 = vector.broadcast %813 : vector<1x128xf32> to vector<8x128xf32>
    %815 = arith.addf %812, %814 : vector<8x128xf32>
    %c0_363 = arith.constant 0 : index
    %c0_364 = arith.constant 0 : index
    %c0_365 = arith.constant 0 : index
    %816 = vector.load %arg23[%c0_363, %c0_364, %c0_365] : memref<1x8x128xf32, #tpu.memory_space<vmem>>, vector<1x8x128xf32>
    %817 = vector.shape_cast %816 : vector<1x8x128xf32> to vector<8x128xf32>
    %818 = vector.shape_cast %815 : vector<8x128xf32> to vector<1x8x128xf32>
    tpu.vector_store %arg23[%c0_363, %c0_364, %c0_365], %818 {strides = array<i32>} : memref<1x8x128xf32, #tpu.memory_space<vmem>>, vector<1x8x128xf32>,
    return
  }
  func.func @transform_0(%arg0: i32) -> (i32, i32, i32) {
    %c0_i32 = arith.constant 0 : i32
    %c0_i32_0 = arith.constant 0 : i32
    %c0_i32_1 = arith.constant 0 : i32
    return %arg0, %c0_i32, %c0_i32_0 : i32, i32, i32
  }
  func.func @transform_1(%arg0: i32) -> (i32, i32, i32) {
    %c0_i32 = arith.constant 0 : i32
    %c0_i32_0 = arith.constant 0 : i32
    %c0_i32_1 = arith.constant 0 : i32
    return %arg0, %c0_i32, %c0_i32_0 : i32, i32, i32
  }
  func.func @transform_2(%arg0: i32) -> (i32, i32, i32) {
    %c0_i32 = arith.constant 0 : i32
    %c0_i32_0 = arith.constant 0 : i32
    %c0_i32_1 = arith.constant 0 : i32
    %c0_i32_2 = arith.constant 0 : i32
    return %c0_i32, %c0_i32_0, %c0_i32_1 : i32, i32, i32
  }
  func.func @transform_3(%arg0: i32) -> (i32, i32, i32) {
    %c0_i32 = arith.constant 0 : i32
    %c0_i32_0 = arith.constant 0 : i32
    %c0_i32_1 = arith.constant 0 : i32
    %c0_i32_2 = arith.constant 0 : i32
    return %c0_i32, %c0_i32_0, %c0_i32_1 : i32, i32, i32
  }
  func.func @transform_4(%arg0: i32) -> (i32, i32, i32) {
    %c0_i32 = arith.constant 0 : i32
    %c0_i32_0 = arith.constant 0 : i32
    %c0_i32_1 = arith.constant 0 : i32
    %c0_i32_2 = arith.constant 0 : i32
    return %c0_i32, %c0_i32_0, %c0_i32_1 : i32, i32, i32
  }
  func.func @transform_5(%arg0: i32) -> (i32, i32, i32) {
    %c0_i32 = arith.constant 0 : i32
    %c0_i32_0 = arith.constant 0 : i32
    %c0_i32_1 = arith.constant 0 : i32
    %c0_i32_2 = arith.constant 0 : i32
    return %c0_i32, %c0_i32_0, %c0_i32_1 : i32, i32, i32
  }
  func.func @transform_6(%arg0: i32) -> (i32, i32, i32) {
    %c0_i32 = arith.constant 0 : i32
    %c0_i32_0 = arith.constant 0 : i32
    %c0_i32_1 = arith.constant 0 : i32
    %c0_i32_2 = arith.constant 0 : i32
    return %c0_i32, %c0_i32_0, %c0_i32_1 : i32, i32, i32
  }
  func.func @transform_7(%arg0: i32) -> (i32, i32, i32) {
    %c0_i32 = arith.constant 0 : i32
    %c0_i32_0 = arith.constant 0 : i32
    %c0_i32_1 = arith.constant 0 : i32
    %c0_i32_2 = arith.constant 0 : i32
    return %c0_i32, %c0_i32_0, %c0_i32_1 : i32, i32, i32
  }
  func.func @transform_8(%arg0: i32) -> (i32, i32, i32, i32) {
    %c0_i32 = arith.constant 0 : i32
    %c0_i32_0 = arith.constant 0 : i32
    %c0_i32_1 = arith.constant 0 : i32
    %c0_i32_2 = arith.constant 0 : i32
    %c0_i32_3 = arith.constant 0 : i32
    return %c0_i32, %c0_i32_0, %c0_i32_1, %c0_i32_2 : i32, i32, i32, i32
  }
  func.func @transform_9(%arg0: i32) -> (i32, i32, i32, i32) {
    %c0_i32 = arith.constant 0 : i32
    %c0_i32_0 = arith.constant 0 : i32
    %c0_i32_1 = arith.constant 0 : i32
    %c0_i32_2 = arith.constant 0 : i32
    %c0_i32_3 = arith.constant 0 : i32
    return %c0_i32, %c0_i32_0, %c0_i32_1, %c0_i32_2 : i32, i32, i32, i32
  }
  func.func @transform_10(%arg0: i32) -> (i32, i32, i32, i32) {
    %c0_i32 = arith.constant 0 : i32
    %c0_i32_0 = arith.constant 0 : i32
    %c0_i32_1 = arith.constant 0 : i32
    %c0_i32_2 = arith.constant 0 : i32
    %c0_i32_3 = arith.constant 0 : i32
    return %c0_i32, %c0_i32_0, %c0_i32_1, %c0_i32_2 : i32, i32, i32, i32
  }
  func.func @transform_11(%arg0: i32) -> (i32, i32, i32, i32) {
    %c0_i32 = arith.constant 0 : i32
    %c0_i32_0 = arith.constant 0 : i32
    %c0_i32_1 = arith.constant 0 : i32
    %c0_i32_2 = arith.constant 0 : i32
    %c0_i32_3 = arith.constant 0 : i32
    return %c0_i32, %c0_i32_0, %c0_i32_1, %c0_i32_2 : i32, i32, i32, i32
  }
  func.func @transform_12(%arg0: i32) -> (i32, i32, i32) {
    %c0_i32 = arith.constant 0 : i32
    %c0_i32_0 = arith.constant 0 : i32
    %c0_i32_1 = arith.constant 0 : i32
    %c0_i32_2 = arith.constant 0 : i32
    return %c0_i32, %c0_i32_0, %c0_i32_1 : i32, i32, i32
  }
  func.func @transform_13(%arg0: i32) -> (i32, i32, i32) {
    %c0_i32 = arith.constant 0 : i32
    %c0_i32_0 = arith.constant 0 : i32
    %c0_i32_1 = arith.constant 0 : i32
    %c0_i32_2 = arith.constant 0 : i32
    return %c0_i32, %c0_i32_0, %c0_i32_1 : i32, i32, i32
  }
  func.func @transform_14(%arg0: i32) -> (i32, i32, i32) {
    %c0_i32 = arith.constant 0 : i32
    %c0_i32_0 = arith.constant 0 : i32
    %c0_i32_1 = arith.constant 0 : i32
    %c0_i32_2 = arith.constant 0 : i32
    return %c0_i32, %c0_i32_0, %c0_i32_1 : i32, i32, i32
  }
  func.func @transform_15(%arg0: i32) -> (i32, i32, i32) {
    %c0_i32 = arith.constant 0 : i32
    %c0_i32_0 = arith.constant 0 : i32
    %c0_i32_1 = arith.constant 0 : i32
    %c0_i32_2 = arith.constant 0 : i32
    return %c0_i32, %c0_i32_0, %c0_i32_1 : i32, i32, i32
  }
  func.func @transform_16(%arg0: i32) -> (i32, i32, i32) {
    %c0_i32 = arith.constant 0 : i32
    %c0_i32_0 = arith.constant 0 : i32
    %c0_i32_1 = arith.constant 0 : i32
    %c0_i32_2 = arith.constant 0 : i32
    return %c0_i32, %c0_i32_0, %c0_i32_1 : i32, i32, i32
  }
  func.func @transform_17(%arg0: i32) -> (i32, i32, i32) {
    %c0_i32 = arith.constant 0 : i32
    %c0_i32_0 = arith.constant 0 : i32
    %c0_i32_1 = arith.constant 0 : i32
    %c0_i32_2 = arith.constant 0 : i32
    return %c0_i32, %c0_i32_0, %c0_i32_1 : i32, i32, i32
  }
  func.func @transform_18(%arg0: i32) -> (i32, i32, i32) {
    %c0_i32 = arith.constant 0 : i32
    %c0_i32_0 = arith.constant 0 : i32
    %c0_i32_1 = arith.constant 0 : i32
    %c0_i32_2 = arith.constant 0 : i32
    return %c0_i32, %c0_i32_0, %c0_i32_1 : i32, i32, i32
  }
  func.func @transform_19(%arg0: i32) -> (i32, i32, i32) {
    %c0_i32 = arith.constant 0 : i32
    %c0_i32_0 = arith.constant 0 : i32
    %c0_i32_1 = arith.constant 0 : i32
    %c0_i32_2 = arith.constant 0 : i32
    return %c0_i32, %c0_i32_0, %c0_i32_1 : i32, i32, i32
  }
  func.func @transform_20(%arg0: i32) -> (i32, i32) {
    %c0_i32 = arith.constant 0 : i32
    %c0_i32_0 = arith.constant 0 : i32
    %c0_i32_1 = arith.constant 0 : i32
    return %c0_i32, %c0_i32_0 : i32, i32
  }
  func.func @transform_21(%arg0: i32) -> (i32, i32) {
    %c0_i32 = arith.constant 0 : i32
    %c0_i32_0 = arith.constant 0 : i32
    %c0_i32_1 = arith.constant 0 : i32
    return %c0_i32, %c0_i32_0 : i32, i32
  }
  func.func @transform_22(%arg0: i32) -> (i32, i32, i32) {
    %c0_i32 = arith.constant 0 : i32
    %c0_i32_0 = arith.constant 0 : i32
    %c0_i32_1 = arith.constant 0 : i32
    return %arg0, %c0_i32, %c0_i32_0 : i32, i32, i32
  }
}

</mosaic_0001>

<bundles_post_ra>
// kernel: translation_forward.1
= control target key start
LH: loop header
LB: loop body
LE: loop exit
PB: predicated region body
PF: predicated region fallthrough
CT: control target
= control target key end

     0   :  { %s7696_s0 = inlined_call_operand.vmem [shape: f32[2,8,32], index: 0, kind: input, shape index: {}]   ;;  %s7697_s1 = inlined_call_operand.vmem [shape: f32[2,16,32], index: 1, kind: input, shape index: {}]   ;;  %s7698_s2 = inlined_call_operand.vmem [shape: bf16[2,32,128], index: 2, kind: input, shape index: {}]   ;;  %s7699_s3 = inlined_call_operand.vmem [shape: bf16[2,32,160], index: 3, kind: input, shape index: {}]   ;;  %s7700_s4 = inlined_call_operand.vmem [shape: bf16[2,32,128], index: 4, kind: input, shape index: {}]   ;;  %s7701_s5 = inlined_call_operand.vmem [shape: bf16[2,32,160], index: 5, kind: input, shape index: {}]   ;;  %s7702_s6 = inlined_call_operand.vmem [shape: bf16[2,32,128], index: 6, kind: input, shape index: {}]   ;;  %s7703_s7 = inlined_call_operand.vmem [shape: bf16[2,32,160], index: 7, kind: input, shape index: {}]   ;;  %s7704_s8 = inlined_call_operand.vmem [shape: f32[2,3,1,32], index: 8, kind: input, shape index: {}]   ;;  %s7705_s9 = inlined_call_operand.vmem [shape: f32[2,3,1,32], index: 9, kind: input, shape index: {}]   ;;  %s7706_s10 = inlined_call_operand.vmem [shape: f32[2,2,1,32], index: 10, kind: input, shape index: {}]   ;;  %s7707_s11 = inlined_call_operand.vmem [shape: f32[2,2,1,32], index: 11, kind: input, shape index: {}]   ;;  %s7708_s12 = inlined_call_operand.vmem [shape: bf16[2,32,128], index: 12, kind: input, shape index: {}]   ;;  %s7709_s13 = inlined_call_operand.vmem [shape: f32[2,1,128], index: 13, kind: input, shape index: {}]   ;;  %s7710_s14 = inlined_call_operand.vmem [shape: bf16[2,128,32], index: 14, kind: input, shape index: {}]   ;;  %s7711_s15 = inlined_call_operand.vmem [shape: f32[2,1,32], index: 15, kind: input, shape index: {}]   ;;  %s7712_s16 = inlined_call_operand.vmem [shape: bf16[2,32,128], index: 16, kind: input, shape index: {}]   ;;  %s7713_s17 = inlined_call_operand.vmem [shape: f32[2,1,128], index: 17, kind: input, shape index: {}]   ;;  %s7714_s18 = inlined_call_operand.vmem [shape: bf16[2,128,32], index: 18, kind: input, shape index: {}]   ;;  %s7715_s19 = inlined_call_operand.vmem [shape: f32[2,1,32], index: 19, kind: input, shape index: {}]   ;;  %s7716_s20 = inlined_call_operand.vmem [shape: f32[32,128], index: 20, kind: input, shape index: {}]   ;;  %s7717_s21 = inlined_call_operand.vmem [shape: f32[1,128], index: 21, kind: input, shape index: {}]   ;;  %s7718_s22 = inlined_call_operand.hbm [shape: f32[2,8,128], index: 22, kind: output, shape index: {}]  }
   0x1   :  { %7742 = sst [smem:[#allocation14_spill]] %s7696_s0 }
   0x2   :  { %7743 = sst [smem:[#allocation15_spill]] %s7697_s1 }
   0x3   :  { %7744 = sst [smem:[#allocation16_spill]] %s7698_s2 }
   0x4   :  { %7745 = sst [smem:[#allocation17_spill]] %s7699_s3 }
   0x5   :  { %7746 = sst [smem:[#allocation18_spill]] %s7700_s4 }
   0x6   :  { %7747 = sst [smem:[#allocation19_spill]] %s7701_s5 }
   0x7   :  { %7748 = sst [smem:[#allocation20_spill]] %s7702_s6 }
   0x8   :  { %7749 = sst [smem:[#allocation21_spill]] %s7703_s7 }
   0x9   :  { %7750 = sst [smem:[#allocation22_spill]] %s7704_s8 }
   0xa   :  { %7751 = sst [smem:[#allocation23_spill]] %s7705_s9 }
   0xb   :  { %7752 = sst [smem:[#allocation24_spill]] %s7717_s21 }
   0xc   :  { %7753 = sst [smem:[#allocation25_spill]] %s7718_s22 }
   0xd   :  { %27 = vsyncpa [#allocation3], 0 }
   0xe   :  { %29 = vsyncpa [#allocation3 + $0x1], 0  ;;  %s6692_s3 = smov 0   ;;  %s6694_s28 = smov 0  }
   0xf   :  { %s6696_s29 = smov 0   ;;  %s6698_s30 = smov 0  }
  0x10 LB: > { %7754 = sst [smem:[#allocation5_spill]] %s6555_s3  ;;  %s6713_s4 = sadd.s32 4294967295, %s6567_s30   ;;  %s6567_s30 = sphi %s6698_s30, %s7791_s30   ;;  %s6563_s29 = sphi %s6696_s29, %s7794_s29   ;;  %s6559_s28 = sphi %s6694_s28, %s7793_s28   ;;  %s6555_s3 = sphi %s6692_s3, %s7792_s3  }
  0x11   : > { %7755 = sst [smem:[#allocation6_spill]] %s6559_s28  ;;  %s5347_s0 = sadd.s32 4294967294, %s6567_s30  }
  0x12   : > { %7756 = sst [smem:[#allocation7_spill]] %s6563_s29  ;;  %s6717_s23 = sadd.s32 1, %s6567_s30  }
  0x13   : > { %7757 = sst [smem:[#allocation8_spill]] %s6567_s30  ;;  %s514_s1 = sadd.s32 1, %s6563_s29 }
  0x14   : > { %7758 = sst [smem:[#allocation9_spill]] %s6713_s4  ;;  %s511_s5 = ssub.s32 %s6567_s30, %s6717_s23 }
  0x15   : > { %7759 = sst [smem:[#allocation10_spill]] %s6717_s23  ;;  %p524_p0 = scmp.ne.s32.totalorder %s6563_s29, %s6559_s28 }
  0x16   : > { %p512_p1 = scmp.eq.s32.totalorder %s511_s5, 0  ;;  %p525_p2 = scmp.eq.s32.totalorder %s6713_s4, 1 }
  0x17   : > { %p530_p3 = scmp.ne.s32.totalorder %s6559_s28, %s6555_s3  ;;  %p531_p4 = scmp.eq.s32.totalorder %s5347_s0, 1 }
  0x18   : > { %s6728_s24 = scalar_select %p512_p1, %s6563_s29, %s514_s1  }
  0x19   : > { %p6730_p5 = por %p525_p2, %p524_p0  ;;  %p6734_p6 = por %p531_p4, %p530_p3 }
  0x1a   : > { %7760 = sst [smem:[#allocation11_spill]] %s6728_s24  ;;  %p5350_p7 = scmp.ge.s32.totalorder %s6567_s30, 1 }
  0x1b   : > { %s7761_s6 = scalar_select %p6730_p5, 1, 0 }
  0x1c   : > { %s7763_s25 = scalar_select %p6734_p6, 1, 0 }
  0x1d   : > { %7762 = sst [smem:[#allocation12_spill]] %s7761_s6  ;;  %p624_p8 = scmp.lt.s32.totalorder %s6567_s30, 3 }
  0x1e   : > { %7764 = sst [smem:[#allocation13_spill]] %s7763_s25 }
  0x1f   : > { %p625_p9 = pnand %p5350_p7, %p624_p8 }
  0x20   : > { %s7765_s27 = sld [smem:[#allocation16_spill]] (!%p625_p9)  ;;  %v6569_v1 = vmov (!%p625_p9), 0.0   ;;  %vm6570_vm0 = vmmov (!%p625_p9), 0   ;;  %p690_p10 = scmp.lt.s32.totalorder (!%p625_p9), %s6713_s4, 1  ;;  %vm729_vm1 = vcmask (!%p625_p9), 261120   ;;  %v6571_v9 = vmov (!%p625_p9), 0  }
  0x21   : > { %628 = sbr.rel (%p625_p9) target bundleno = 12212 (0x2fb4), region = 108  ;;  %5781 = vmatprep.subr.bf16.mxu1 (!%p625_p9), %v6569_v1  ;;  %5801 = vmatprep.subr.bf16.mxu0 (!%p625_p9), %v6569_v1  ;;  %s7766_s2 = sld [smem:[#allocation17_spill]] (!%p625_p9)  ;;  %vm964_vm2 = vcmask (!%p625_p9), 1043456   ;;  %v700_v28 = vlaneseq (!%p625_p9)  ;;  %vm885_vm4 = vcmask (!%p625_p9), 64512   ;;  %vm1481_vm5 = vcmask (!%p625_p9), 130048  }
  0x22   : > { %5785 = vmatprep.mubr.msk.bf16.mxu1 (!%p625_p9), %vm6570_vm0, %v6569_v1  ;;  %5803 = vmatprep.mubr.msk.bf16.mxu0 (!%p625_p9), %vm6570_vm0, %v6569_v1  ;;  %s7767_s3 = sld [smem:[#allocation14_spill]] (!%p625_p9)  ;;  %s7733_s21 = smov (!%p625_p9), 96  }
  0x23   : > { %v701_v29 = vshrl.u32 (!%p625_p9), %v700_v28, 7  ;;  %v703_v30 = vand.u32 (!%p625_p9), 127, %v700_v28  ;;  %s7735_s22 = smov (!%p625_p9), 64   ;;  %s7774_s6 = smov (!%p625_p9), 96  }
  0x24   : > { %s7775_s7 = sld [smem:[#allocation21_spill]] (!%p625_p9)  ;;  %s7776_s26 = smov (!%p625_p9), 32  }
  0x25   : > { %vm6801_vm3 = vcmp.le.s32.totalorder (!%p625_p9), %v703_v30, %v701_v29  ;;  %s7777_s23 = sld [smem:[#allocation18_spill]] (!%p625_p9)  ;;  %s7778_s8 = sld [smem:[#allocation22_spill]] (!%p625_p9) }
  0x26   : > { %v6292_v0 = vld [vmem:[%s7765_s27] sm:$0xff] (!%p625_p9)   ;;  %v6293_v2 = vld [vmem:[%s7765_s27 + $0x8] sm:$0xff] (!%p625_p9)   ;;  %s7779_s9 = sld [smem:[#allocation23_spill]] (!%p625_p9)  ;;  %s7782_s5 = sld [smem:[#allocation6_spill]] (!%p625_p9) }
  0x27   : > { %5782 = vmatpush3.bf16.msra.mxu1 (!%p625_p9), %v6292_v0  ;;  %v6296_v3 = vld [vmem:[%s7766_s2 + $0x4] ss:$8 sps:$4 sm:$0xff] (!%p625_p9)   ;;  %v6294_v4 = vld [vmem:[%s7766_s2] ss:$8 sps:$4 sm:$0xff] (!%p625_p9)   ;;  %v6299_v5 = vld [vmem:[%s7766_s2 + $0x14] ss:$8 sps:$4 sm:$0xff] (!%p625_p9)  }
  0x28   : > { %5783 = vmatprep.subr.bf16.mxu1 %v6569_v1  ;;  %s6758_s24 = scalar_select %p690_p10, %s6713_s4, 1  ;;  %v6297_v8 = vld [vmem:[%s7766_s2 + $0x10] ss:$8 sps:$4 sm:$0xff]  }
  0x29   : > { %s7786_s28 = sld [smem:[#allocation25_spill]] }
  0x2a   : > { %s5352_s0 = sshll.u32 %s6758_s24, 3  ;;  %s5613_s29 = sshll.u32 %s6758_s24, 4 }
  0x2b   : > { %5784 = vmatpush3.bf16.msra.mxu1 %v6293_v2  ;;  %s6767_s30 = scalar_lea.vmem %s7767_s3, %s5352_s0  ;;  %s7731_s3 = smov 32  }
  0x2c   : > { %793 = vmatprep.subr.bf16.mxu1 %v6296_v3  ;;  %v705_v6 = vld [vmem:[%s6767_s30] sm:$0xff]  ;;  %s7770_s0 = sld [smem:[#allocation15_spill]]  ;;  %s7773_s24 = smov 64  }
  0x2d   : > { %v716_v7 = vpack.c.bf16 %v705_v6, %v705_v6 }
  0x2f   : > { %5786 = vmatmul.mubr.msk.bf16.vlgmr.msra.gmra.mrb[0].mxu1 %vm729_vm1, %v716_v7 }
  0x30   : > { %794 = vmatpush1.bf16.msra.mxu1 %v6294_v4  ;;  %825 = vmatprep.mubr.bf16.mxu1 %v6571_v9 }
  0x31   : > { %795 = vmatprep.subr.bf16.mxu1 %v6299_v5 }
  0x32   : > { %s698_s1 = scalar_lea.vmem %s7770_s0, %s5613_s29 }
  0x34   : > { %796 = vmatpush1.bf16.msra.mxu1 %v6297_v8 }
  0x35   : > { %5789 = vmatprep.subr.bf16.mxu1 %v6569_v1 }
  0x37   : > { %5362 = vmatmul.mubr.msk.bf16.vlgmr.msra.gmra.mrb[4].mxu1 %vm729_vm1, %v716_v7 }
  0x38   : > { %5791 = vmatprep.mubr.msk.bf16.mxu1 %vm6570_vm0, %v6569_v1 }
 0x102   : > { %v767_v10 = vpop.f32.mrb[0].mxu1 }
 0x103   : > { %v835_v11 = vpack.c.bf16 %v767_v10, %v767_v10  ;;  %v5787_v12 = vpop.f32.mrb[1].mxu1 }
 0x104   : > { %v770_v13 = vpop.f32.mrb[2].mxu1 }
 0x105   : > { %899 = vrot.lane.b32.xlu0 %v835_v11, %s7733_s21  ;;  %v5788_v14 = vpop.f32.mrb[3].mxu1 }
 0x10a   : > { %v827_v15 = vpop.f32.mrb[4].mxu1 }
 0x10b   : > { %v829_v16 = vpop.f32.mrb[5].mxu1  ;;  %v6793_v21 = vpack.c.bf16 %v827_v15, %v827_v15 }
 0x10c   : > { %v834_v17 = vpack.c.bf16 %v829_v16, %v829_v16  ;;  %v831_v18 = vpop.f32.mrb[6].mxu1 }
 0x10d   : > { %v832_v19 = vpop.f32.mrb[7].mxu1  ;;  %v1012_v23 = vsel %vm964_vm2, %v6793_v21, 0  ;;  %v6852_v18 = vld [vmem:[%s698_s1] sm:$0xff] }
 0x10e   : > { %v6784_v20 = vsel %vm729_vm1, %v834_v17, 0  ;;  %v6854_v19 = vld [vmem:[%s698_s1 + $0x8] sm:$0xff] }
 0x10f   : > { %5790 = vmatpush3.bf16.xpose.msra.mxu1 %v6784_v20 }
 0x110   : > { %5795 = vmatprep.subr.bf16.mxu1 %v6569_v1 }
 0x116   : > { %5792 = vmatmul.mubr.msk.bf16.vlgmr.msra.gmra.mrb[8].mxu1 %vm729_vm1, %v835_v11 }
 0x117   : > { %5796 = vmatpush3.bf16.xpose.msra.mxu1 %v6784_v20  ;;  %5797 = vmatprep.mubr.msk.bf16.mxu1 %vm6570_vm0, %v6569_v1 }
 0x118   : > { %5807 = vmatprep.subr.bf16.mxu1 %v6569_v1 }
 0x177   : > { %v900_v22 = vpop.permute.xlu0 %899 }
 0x178   : > { %5798 = vmatmul.mubr.msk.bf16.vlgmr.msra.gmra.mrb[12].mxu1 %vm729_vm1, %v900_v22 }
 0x179   : > { %5808 = vmatpush3.bf16.msra.mxu1 %v1012_v23  ;;  %5809 = vmatprep.mubr.msk.bf16.mxu1 %vm6570_vm0, %v6569_v1 }
 0x17a   : > { %5819 = vmatprep.subr.bf16.mxu1 %v6569_v1 }
 0x1e9   : > { %v877_v24 = vpop.f32.mrb[8].mxu1 }
 0x1ea   : > { %v5793_v25 = vpop.f32.mrb[9].mxu1  ;;  %v883_v44 = vmul.f32 0.35355338, %v877_v24 }
 0x1eb   : > { %v880_v26 = vpop.f32.mrb[10].mxu1 }
 0x1ec   : > { %v5794_v27 = vpop.f32.mrb[11].mxu1  ;;  %v884_v45 = vsel %vm6801_vm3, %v883_v44, -inf }
 0x1ed   : > { %v886_v46 = vsel %vm885_vm4, %v884_v45, -inf }
 0x24b   : > { %v938_v31 = vpop.f32.mrb[12].mxu1 }
 0x24c   : > { %v944_v32 = vmul.f32 0.35355338, %v938_v31  ;;  %v5799_v33 = vpop.f32.mrb[13].mxu1 }
 0x24d   : > { %v941_v34 = vpop.f32.mrb[14].mxu1 }
 0x24e   : > { %v5800_v36 = vpop.f32.mrb[15].mxu1  ;;  %v945_v37 = vsel %vm6801_vm3, %v944_v32, -inf }
 0x24f   : > { %v946_v38 = vsel %vm885_vm4, %v945_v37, -inf }
 0x250   : > { %947 = vmax.xlane.f32.xlu0 %v946_v38 }
 0x2dd   : > { %v948_v39 = vpop.xlane.xlu0 %947 }
 0x2de   : > { %v949_v40 = vsub.f32 %v945_v37, %v948_v39 }
 0x2e0   : > { %v950_v41 = vmul.f32 1.442695, %v949_v40 }
 0x2e2   : > { %6380 = vpow2.f32 %v950_v41 }
 0x2ec   : > { %v6381_v42 = vpop.eup %6380 }
 0x2ed   : > { %v952_v43 = vsel %vm885_vm4, %v6381_v42, 0.0 }
 0x2ee   : > { %953 = vadd.xlane.f32.xlu1 %v952_v43 }
 0x2ff   : > { %959 = vrot.lane.b32.xlu1 %v6793_v21, %s7733_s21 }
 0x303   : > { %1054 = vrot.lane.b32.xlu1 %v835_v11, %s7735_s22 }
 0x307   : > { %1162 = vrot.lane.b32.xlu1 %v835_v11, %s7731_s3 }
 0x32b   : > { %887 = vmax.xlane.f32.xlu1 %v886_v46 }
 0x33c   : > { %1221 = vrot.lane.b32.xlu1 %v6793_v21, %s7731_s3  ;;  %s7771_s3 = sld [smem:[#allocation20_spill]] }
 0x342   : > { %s7772_s21 = smov %s7771_s3  ;;  %v6300_v16 = vld [vmem:[%s7771_s3] sm:$0xff]  }
 0x343   : > { %v6301_v17 = vld [vmem:[%s7772_s21 + $0x8] sm:$0xff]  }
 0x37b   : > { %v954_v47 = vpop.xlane.xlu1 %953 }
 0x37c   : > { %6382 = vrcp.f32 %v954_v47 }
 0x37f   : > { %v960_v48 = vpop.permute.xlu1 %959 }
 0x380   : > { %v966_v49 = vsel %vm964_vm2, %v960_v48, 0 }
 0x381   : > { %5802 = vmatpush3.bf16.msra.mxu0 %v966_v49  ;;  %v6304_v49 = vld [vmem:[%s7775_s7 + $0x4] ss:$8 sps:$4 sm:$0xff]  }
 0x382   : > { %5813 = vmatprep.subr.bf16.mxu0 %v6569_v1 }
 0x383   : > { %v1055_v53 = vpop.permute.xlu1 %1054 }
 0x386   : > { %v6383_v50 = vpop.eup %6382 }
 0x387   : > { %v956_v51 = vmul.f32 %v6383_v50, %v6381_v42  ;;  %v1163_v54 = vpop.permute.xlu1 %1162 }
 0x389   : > { %v957_v52 = vpack.c.bf16 %v956_v51, %v956_v51 }
 0x38b   : > { %5804 = vmatmul.mubr.msk.bf16.vlgmr.msra.gmra.mrb[0].mxu0 %vm885_vm4, %v957_v52 }
 0x38c   : > { %5814 = vmatpush3.bf16.xpose.msra.mxu0 %v6784_v20  ;;  %5815 = vmatprep.mubr.msk.bf16.mxu0 %vm6570_vm0, %v6569_v1 }
 0x38d   : > { %5825 = vmatprep.subr.bf16.mxu0 %v6569_v1 }
 0x393   : > { %5816 = vmatmul.mubr.msk.bf16.vlgmr.msra.gmra.mrb[4].mxu0 %vm729_vm1, %v1055_v53 }
 0x394   : > { %5826 = vmatpush3.bf16.xpose.msra.mxu0 %v6784_v20  ;;  %5827 = vmatprep.mubr.msk.bf16.mxu0 %vm6570_vm0, %v6569_v1  ;;  %v6859_v20 = vpack.c.bf16 %v6854_v19, %v6852_v18 }
 0x395   : > { %5837 = vmatprep.subr.bf16.mxu0 %v6569_v1 }
 0x39b   : > { %5828 = vmatmul.mubr.msk.bf16.vlgmr.msra.gmra.mrb[8].mxu0 %vm729_vm1, %v1163_v54  ;;  %v6302_v54 = vld [vmem:[%s7775_s7] ss:$8 sps:$4 sm:$0xff]  }
 0x39c   : > { %5841 = vmatprep.mubr.msk.bf16.mxu0 %vm6570_vm0, %v6569_v1  ;;  %5838 = vmatpush3.bf16.msra.mxu0 %v6300_v16 }
 0x39d   : > { %5839 = vmatprep.subr.bf16.mxu0 %v6569_v1 }
 0x3a0   : > { %5840 = vmatpush3.bf16.msra.mxu0 %v6301_v17 }
 0x3a1   : > { %5845 = vmatprep.subr.bf16.mxu0 %v6569_v1 }
 0x3a3   : > { %5842 = vmatmul.mubr.msk.bf16.vlgmr.msra.gmra.mrb[12].mxu0 %vm729_vm1, %v6859_v20 }
 0x3a4   : > { %5847 = vmatprep.mubr.msk.bf16.mxu0 %vm6570_vm0, %v6569_v1 }
 0x3b8   : > { %v888_v55 = vpop.xlane.xlu1 %887 }
 0x3b9   : > { %v889_v59 = vsub.f32 %v884_v45, %v888_v55  ;;  %v6307_v55 = vld [vmem:[%s7775_s7 + $0x14] ss:$8 sps:$4 sm:$0xff]  }
 0x3bb   : > { %v890_v61 = vmul.f32 1.442695, %v889_v59 }
 0x3bc   : > { %v1222_v48 = vpop.permute.xlu1 %1221 }
 0x3bd   : > { %6384 = vpow2.f32 %v890_v61  ;;  %v1227_v50 = vsel %vm964_vm2, %v1222_v48, 0 }
 0x3c7   : > { %v6385_v14 = vpop.eup %6384 }
 0x3c8   : > { %v892_v15 = vsel %vm885_vm4, %v6385_v14, 0.0 }
 0x45e   : > { %v6833_v56 = vpop.f32.mrb[0].mxu0 }
 0x45f   : > { %v5805_v57 = vpop.f32.mrb[1].mxu0 }
 0x460   : > { %v1005_v58 = vpop.f32.mrb[2].mxu0  ;;  %v6305_v57 = vld [vmem:[%s7775_s7 + $0x10] ss:$8 sps:$4 sm:$0xff]  }
 0x461   : > { %v5806_v60 = vpop.f32.mrb[3].mxu0 }
 0x466   : > { %v1093_v62 = vpop.f32.mrb[4].mxu0 }
 0x467   : > { %v1099_v63 = vmul.f32 0.35355338, %v1093_v62  ;;  %v5817_v0 = vpop.f32.mrb[5].mxu0 }
 0x468   : > { %v1096_v2 = vpop.f32.mrb[6].mxu0 }
 0x469   : > { %v5818_v3 = vpop.f32.mrb[7].mxu0  ;;  %v1100_v4 = vsel %vm6801_vm3, %v1099_v63, -inf }
 0x46a   : > { %v1101_v5 = vsel %vm885_vm4, %v1100_v4, -inf }
 0x46b   : > { %1102 = vmax.xlane.f32.xlu0 %v1101_v5 }
 0x46e   : > { %v1201_v6 = vpop.f32.mrb[8].mxu0 }
 0x46f   : > { %v1207_v7 = vmul.f32 0.35355338, %v1201_v6  ;;  %v5829_v8 = vpop.f32.mrb[9].mxu0 }
 0x470   : > { %v1204_v10 = vpop.f32.mrb[10].mxu0 }
 0x471   : > { %v5830_v11 = vpop.f32.mrb[11].mxu0  ;;  %v1208_v12 = vsel %vm6801_vm3, %v1207_v7, -inf }
 0x472   : > { %v1209_v13 = vsel %vm885_vm4, %v1208_v12, -inf }
 0x473   : > { %1210 = vmax.xlane.f32.xlu0 %v1209_v13 }
 0x476   : > { %v1359_v37 = vpop.f32.mrb[12].mxu0 }
 0x477   : > { %893 = vadd.xlane.f32.xlu0 %v892_v15  ;;  %v5843_v38 = vpop.f32.mrb[13].mxu0 }
 0x478   : > { %v1362_v39 = vpop.f32.mrb[14].mxu0 }
 0x479   : > { %v6873_v40 = vpack.c.bf16 %v1362_v39, %v1359_v37  ;;  %v5844_v41 = vpop.f32.mrb[15].mxu0 }
 0x4f8   : > { %v1103_v22 = vpop.xlane.xlu0 %1102 }
 0x4f9   : > { %v1104_v23 = vsub.f32 %v1100_v4, %v1103_v22 }
 0x4fb   : > { %v1105_v24 = vmul.f32 1.442695, %v1104_v23 }
 0x4fd   : > { %6386 = vpow2.f32 %v1105_v24 }
 0x500   : > { %v1211_v25 = vpop.xlane.xlu0 %1210 }
 0x501   : > { %v1212_v26 = vsub.f32 %v1208_v12, %v1211_v25 }
 0x503   : > { %v1213_v27 = vmul.f32 1.442695, %v1212_v26 }
 0x504   : > { %v894_v28 = vpop.xlane.xlu0 %893 }
 0x505   : > { %6388 = vpow2.f32 %v1213_v27 }
 0x506   : > { %6390 = vrcp.f32 %v894_v28 }
 0x507   : > { %v6387_v29 = vpop.eup %6386 }
 0x508   : > { %v1107_v30 = vsel %vm885_vm4, %v6387_v29, 0.0 }
 0x509   : > { %1108 = vadd.xlane.f32.xlu0 %v1107_v30 }
 0x50f   : > { %v6389_v31 = vpop.eup %6388 }
 0x510   : > { %v6391_v32 = vpop.eup %6390  ;;  %v1215_v33 = vsel %vm885_vm4, %v6389_v31, 0.0 }
 0x511   : > { %1216 = vadd.xlane.f32.xlu0 %v1215_v33  ;;  %v896_v34 = vmul.f32 %v6391_v32, %v6385_v14 }
 0x513   : > { %v897_v36 = vpack.c.bf16 %v896_v34, %v896_v34 }
 0x515   : > { %5810 = vmatmul.mubr.msk.bf16.vlgmr.msra.gmra.mrb[16].mxu1 %vm885_vm4, %v897_v36 }
 0x516   : > { %5821 = vmatprep.mubr.msk.bf16.mxu1 %vm6570_vm0, %v6569_v1 }
 0x527   : > { %1113 = vrot.lane.b32.xlu0 %v6793_v21, %s7773_s24 }
 0x52b   : > { %1506 = vrot.lane.b32.xlu0 %v6873_v40, %s7774_s6 }
 0x596   : > { %v1109_v42 = vpop.xlane.xlu0 %1108 }
 0x597   : > { %6392 = vrcp.f32 %v1109_v42 }
 0x59e   : > { %v1217_v43 = vpop.xlane.xlu0 %1216 }
 0x59f   : > { %6394 = vrcp.f32 %v1217_v43 }
 0x5a1   : > { %v6393_v44 = vpop.eup %6392 }
 0x5a2   : > { %v1114_v45 = vpop.permute.xlu0 %1113  ;;  %v1111_v46 = vmul.f32 %v6393_v44, %v6387_v29 }
 0x5a3   : > { %v1119_v47 = vsel %vm964_vm2, %v1114_v45, 0 }
 0x5a4   : > { %5820 = vmatpush3.bf16.msra.mxu1 %v1119_v47  ;;  %v1112_v21 = vpack.c.bf16 %v1111_v46, %v1111_v46 }
 0x5a5   : > { %5831 = vmatprep.subr.bf16.mxu1 %v6569_v1 }
 0x5a6   : > { %v1507_v17 = vpop.permute.xlu0 %1506 }
 0x5a7   : > { %5822 = vmatmul.mubr.msk.bf16.vlgmr.msra.gmra.mrb[20].mxu1 %vm885_vm4, %v1112_v21 }
 0x5a8   : > { %5832 = vmatpush3.bf16.msra.mxu1 %v1227_v50  ;;  %5833 = vmatprep.mubr.msk.bf16.mxu1 %vm6570_vm0, %v6569_v1 }
 0x5a9   : > { %v6395_v51 = vpop.eup %6394  ;;  %1386 = vmatprep.subr.bf16.mxu1 %v6304_v49 }
 0x5aa   : > { %v1219_v52 = vmul.f32 %v6395_v51, %v6389_v31 }
 0x5ac   : > { %v1220_v53 = vpack.c.bf16 %v1219_v52, %v1219_v52 }
 0x5af   : > { %5834 = vmatmul.mubr.msk.bf16.vlgmr.msra.gmra.mrb[24].mxu1 %vm885_vm4, %v1220_v53 }
 0x5b0   : > { %1387 = vmatpush1.bf16.msra.mxu1 %v6302_v54  ;;  %1418 = vmatprep.mubr.bf16.mxu1 %v6571_v9 }
 0x5b1   : > { %1388 = vmatprep.subr.bf16.mxu1 %v6307_v55 }
 0x5b4   : > { %1389 = vmatpush1.bf16.msra.mxu1 %v6305_v57 }
 0x5b5   : > { %5851 = vmatprep.subr.bf16.mxu1 %v6569_v1 }
 0x5b7   : > { %5380 = vmatmul.mubr.msk.bf16.vlgmr.msra.gmra.mrb[28].mxu1 %vm729_vm1, %v6859_v20 }
 0x5b8   : > { %5853 = vmatprep.mubr.msk.bf16.mxu1 %vm6570_vm0, %v6569_v1 }
 0x5e8   : > { %v1048_v58 = vpop.f32.mrb[16].mxu1 }
 0x5e9   : > { %v1049_v59 = vadd.f32 %v1048_v58, %v6833_v56  ;;  %v5811_v60 = vpop.f32.mrb[17].mxu1 }
 0x5ea   : > { %v1051_v61 = vpop.f32.mrb[18].mxu1 }
 0x5eb   : > { %v5812_v62 = vpop.f32.mrb[19].mxu1 }
 0x67a   : > { %v1155_v63 = vpop.f32.mrb[20].mxu1 }
 0x67b   : > { %v1161_v0 = vadd.f32 %v1155_v63, %v1049_v59  ;;  %v5823_v2 = vpop.f32.mrb[21].mxu1 }
 0x67c   : > { %v1158_v3 = vpop.f32.mrb[22].mxu1 }
 0x67d   : > { %v5824_v4 = vpop.f32.mrb[23].mxu1 }
 0x682   : > { %v1263_v5 = vpop.f32.mrb[24].mxu1 }
 0x683   : > { %v6903_v6 = vadd.f32 %v1263_v5, %v1161_v0  ;;  %v5835_v7 = vpop.f32.mrb[25].mxu1 }
 0x684   : > { %v1266_v8 = vpop.f32.mrb[26].mxu1 }
 0x685   : > { %v5836_v10 = vpop.f32.mrb[27].mxu1 }
 0x68a   : > { %v1420_v11 = vpop.f32.mrb[28].mxu1 }
 0x68b   : > { %v1422_v12 = vpop.f32.mrb[29].mxu1 }
 0x68c   : > { %v1424_v13 = vpop.f32.mrb[30].mxu1 }
 0x68d   : > { %v6905_v14 = vpack.c.bf16 %v1424_v13, %v1420_v11  ;;  %v1426_v56 = vpop.f32.mrb[31].mxu1 }
 0x68e   : > { %v1429_v15 = vpack.c.bf16 %v1426_v56, %v1422_v12 }
 0x690   : > { %v6908_v16 = vsel %vm729_vm1, %v1429_v15, 0 }
 0x691   : > { %5846 = vmatpush3.bf16.xpose.msra.mxu0 %v6908_v16  ;;  %5852 = vmatpush3.bf16.xpose.msra.mxu1 %v6908_v16 }
 0x692   : > { %5863 = vmatprep.subr.bf16.mxu1 %v6569_v1  ;;  %5857 = vmatprep.subr.bf16.mxu0 %v6569_v1 }
 0x698   : > { %5848 = vmatmul.mubr.msk.bf16.vlgmr.msra.gmra.mrb[16].mxu0 %vm729_vm1, %v6873_v40  ;;  %5854 = vmatmul.mubr.msk.bf16.vlgmr.msra.gmra.mrb[32].mxu1 %vm729_vm1, %v1507_v17 }
 0x699   : > { %5864 = vmatpush3.bf16.msra.mxu1 %v6905_v14  ;;  %5859 = vmatprep.mubr.msk.bf16.mxu0 %vm6570_vm0, %v6569_v1 }
 0x69a   : > { %5865 = vmatprep.mubr.msk.bf16.mxu1 %vm6570_vm0, %v6569_v1  ;;  %5875 = vmatprep.subr.bf16.mxu1 %v6569_v1 }
 0x76b   : > { %v1472_v20 = vpop.f32.mrb[16].mxu0  ;;  %v1545_v22 = vpop.f32.mrb[32].mxu1 }
 0x76c   : > { %v1552_v23 = vmul.f32 0.35355338, %v1545_v22  ;;  %v5849_v24 = vpop.f32.mrb[17].mxu0  ;;  %v5855_v25 = vpop.f32.mrb[33].mxu1  ;;  %v1479_v33 = vmul.f32 0.35355338, %v1472_v20 }
 0x76d   : > { %v1475_v26 = vpop.f32.mrb[18].mxu0  ;;  %v1548_v27 = vpop.f32.mrb[34].mxu1 }
 0x76e   : > { %v1553_v28 = vmul.f32 0.35355338, %v1548_v27  ;;  %v5850_v29 = vpop.f32.mrb[19].mxu0  ;;  %v5856_v30 = vpop.f32.mrb[35].mxu1  ;;  %v1554_v31 = vsel %vm1481_vm5, %v1552_v23, -inf  ;;  %v1482_v34 = vsel %vm1481_vm5, %v1479_v33, -inf }
 0x76f   : > { %1555 = vmax.xlane.f32.xlu0 %v1554_v31  ;;  %v1480_v48 = vmul.f32 0.35355338, %v1475_v26 }
 0x770   : > { %v1557_v32 = vsel %vm1481_vm5, %v1553_v28, -inf }
 0x771   : > { %1558 = vmax.xlane.f32.xlu1 %v1557_v32  ;;  %v1485_v21 = vsel %vm1481_vm5, %v1480_v48, -inf }
 0x782   : > { %1578 = vrot.lane.b32.xlu1 %v6905_v14, %s7774_s6 }
 0x786   : > { %1789 = vrot.lane.b32.xlu1 %v6873_v40, %s7776_s26 }
 0x7aa   : > { %1483 = vmax.xlane.f32.xlu1 %v1482_v34 }
 0x7fc   : > { %v1556_v36 = vpop.xlane.xlu0 %1555 }
 0x7fd   : > { %v1560_v37 = vsub.f32 %v1552_v23, %v1556_v36 }
 0x7fe   : > { %v1559_v38 = vpop.xlane.xlu1 %1558 }
 0x7ff   : > { %v1561_v39 = vsub.f32 %v1553_v28, %v1559_v38  ;;  %v1562_v41 = vmul.f32 1.442695, %v1560_v37 }
 0x801   : > { %v1564_v42 = vmul.f32 1.442695, %v1561_v39  ;;  %6396 = vpow2.f32 %v1562_v41 }
 0x802   : > { %v1579_v43 = vpop.permute.xlu1 %1578 }
 0x803   : > { %5858 = vmatpush3.bf16.msra.mxu0 %v1579_v43  ;;  %6398 = vpow2.f32 %v1564_v42 }
 0x804   : > { %5869 = vmatprep.subr.bf16.mxu0 %v6569_v1 }
 0x806   : > { %v1790_v57 = vpop.permute.xlu1 %1789 }
 0x80b   : > { %v6397_v44 = vpop.eup %6396 }
 0x80c   : > { %v1566_v45 = vsel %vm1481_vm5, %v6397_v44, 0.0 }
 0x80d   : > { %v6399_v46 = vpop.eup %6398  ;;  %1567 = vadd.xlane.f32.xlu0 %v1566_v45 }
 0x80e   : > { %v1569_v47 = vsel %vm1481_vm5, %v6399_v46, 0.0 }
 0x811   : > { %1570 = vadd.xlane.f32.xlu0 %v1569_v47 }
 0x827   : > { %1669 = vrot.lane.b32.xlu0 %v6873_v40, %s7773_s24 }
 0x837   : > { %v1484_v58 = vpop.xlane.xlu1 %1483 }
 0x838   : > { %v1488_v62 = vsub.f32 %v1479_v33, %v1484_v58 }
 0x83a   : > { %v1490_v3 = vmul.f32 1.442695, %v1488_v62 }
 0x846   : > { %1486 = vmax.xlane.f32.xlu0 %v1485_v21 }
 0x89a   : > { %v1568_v49 = vpop.xlane.xlu0 %1567 }
 0x89b   : > { %6400 = vrcp.f32 %v1568_v49 }
 0x89e   : > { %v1571_v50 = vpop.xlane.xlu0 %1570 }
 0x89f   : > { %6402 = vrcp.f32 %v1571_v50 }
 0x8a0   : > { %6404 = vpow2.f32 %v1490_v3 }
 0x8a2   : > { %v1670_v40 = vpop.permute.xlu0 %1669 }
 0x8a5   : > { %v6401_v51 = vpop.eup %6400 }
 0x8a6   : > { %v1573_v53 = vmul.f32 %v6401_v51, %v6397_v44 }
 0x8a9   : > { %v6403_v52 = vpop.eup %6402 }
 0x8aa   : > { %v1575_v54 = vmul.f32 %v6403_v52, %v6399_v46  ;;  %v6405_v25 = vpop.eup %6404 }
 0x8ab   : > { %v1494_v28 = vsel %vm1481_vm5, %v6405_v25, 0.0 }
 0x8ac   : > { %v1576_v55 = vpack.c.bf16 %v1575_v54, %v1573_v53 }
 0x8ae   : > { %5860 = vmatmul.mubr.msk.bf16.vlgmr.msra.gmra.mrb[20].mxu0 %vm1481_vm5, %v1576_v55 }
 0x8af   : > { %5870 = vmatpush3.bf16.xpose.msra.mxu0 %v6908_v16  ;;  %5871 = vmatprep.mubr.msk.bf16.mxu0 %vm6570_vm0, %v6569_v1 }
 0x8b0   : > { %5881 = vmatprep.subr.bf16.mxu0 %v6569_v1 }
 0x8b6   : > { %5872 = vmatmul.mubr.msk.bf16.vlgmr.msra.gmra.mrb[24].mxu0 %vm729_vm1, %v1670_v40 }
 0x8b7   : > { %5882 = vmatpush3.bf16.xpose.msra.mxu0 %v6908_v16  ;;  %5883 = vmatprep.mubr.msk.bf16.mxu0 %vm6570_vm0, %v6569_v1 }
 0x8b8   : > { %5893 = vmatprep.subr.bf16.mxu0 %v6569_v1 }
 0x8be   : > { %5884 = vmatmul.mubr.msk.bf16.vlgmr.msra.gmra.mrb[28].mxu0 %vm729_vm1, %v1790_v57 }
 0x8bf   : > { %5897 = vmatprep.mubr.msk.bf16.mxu0 %vm6570_vm0, %v6569_v1 }
 0x8d3   : > { %v1487_v60 = vpop.xlane.xlu0 %1486 }
 0x8d4   : > { %v1489_v2 = vsub.f32 %v1480_v48, %v1487_v60 }
 0x8d6   : > { %v1492_v4 = vmul.f32 1.442695, %v1489_v2 }
 0x8d8   : > { %6406 = vpow2.f32 %v1492_v4 }
 0x8e2   : > { %v6407_v27 = vpop.eup %6406 }
 0x8e3   : > { %v1497_v29 = vsel %vm1481_vm5, %v6407_v27, 0.0 }
 0x981   : > { %v6949_v59 = vpop.f32.mrb[20].mxu0 }
 0x982   : > { %v5861_v61 = vpop.f32.mrb[21].mxu0 }
 0x983   : > { %v6951_v63 = vpop.f32.mrb[22].mxu0 }
 0x984   : > { %v5862_v0 = vpop.f32.mrb[23].mxu0 }
 0x989   : > { %v1708_v5 = vpop.f32.mrb[24].mxu0 }
 0x98a   : > { %v1715_v7 = vmul.f32 0.35355338, %v1708_v5  ;;  %v5873_v8 = vpop.f32.mrb[25].mxu0 }
 0x98b   : > { %v1711_v10 = vpop.f32.mrb[26].mxu0 }
 0x98c   : > { %v1716_v11 = vmul.f32 0.35355338, %v1711_v10  ;;  %v5874_v12 = vpop.f32.mrb[27].mxu0  ;;  %v1717_v13 = vsel %vm1481_vm5, %v1715_v7, -inf }
 0x98d   : > { %1718 = vmax.xlane.f32.xlu0 %v1717_v13 }
 0x98e   : > { %v1720_v56 = vsel %vm1481_vm5, %v1716_v11, -inf }
 0x98f   : > { %1721 = vmax.xlane.f32.xlu1 %v1720_v56 }
 0x991   : > { %v1828_v15 = vpop.f32.mrb[28].mxu0 }
 0x992   : > { %v1835_v16 = vmul.f32 0.35355338, %v1828_v15  ;;  %v5885_v17 = vpop.f32.mrb[29].mxu0 }
 0x993   : > { %v1831_v20 = vpop.f32.mrb[30].mxu0 }
 0x994   : > { %v1836_v22 = vmul.f32 0.35355338, %v1831_v20  ;;  %v5886_v23 = vpop.f32.mrb[31].mxu0  ;;  %v1837_v24 = vsel %vm1481_vm5, %v1835_v16, -inf }
 0x995   : > { %1838 = vmax.xlane.f32.xlu0 %v1837_v24 }
 0x996   : > { %v1840_v26 = vsel %vm1481_vm5, %v1836_v22, -inf }
 0x997   : > { %1841 = vmax.xlane.f32.xlu1 %v1840_v26 }
 0x999   : > { %1495 = vadd.xlane.f32.xlu0 %v1494_v28 }
 0x99b   : > { %1498 = vadd.xlane.f32.xlu1 %v1497_v29 }
 0xa1a   : > { %v1719_v30 = vpop.xlane.xlu0 %1718 }
 0xa1b   : > { %v1723_v31 = vsub.f32 %v1715_v7, %v1719_v30 }
 0xa1c   : > { %v1722_v32 = vpop.xlane.xlu1 %1721 }
 0xa1d   : > { %v1725_v33 = vmul.f32 1.442695, %v1723_v31  ;;  %v1724_v34 = vsub.f32 %v1716_v11, %v1722_v32 }
 0xa1f   : > { %6408 = vpow2.f32 %v1725_v33  ;;  %v1727_v36 = vmul.f32 1.442695, %v1724_v34 }
 0xa21   : > { %6410 = vpow2.f32 %v1727_v36 }
 0xa22   : > { %v1839_v37 = vpop.xlane.xlu0 %1838 }
 0xa23   : > { %v1843_v38 = vsub.f32 %v1835_v16, %v1839_v37 }
 0xa24   : > { %v1842_v39 = vpop.xlane.xlu1 %1841 }
 0xa25   : > { %v1845_v41 = vmul.f32 1.442695, %v1843_v38  ;;  %v1844_v42 = vsub.f32 %v1836_v22, %v1842_v39 }
 0xa26   : > { %v1496_v43 = vpop.xlane.xlu0 %1495 }
 0xa27   : > { %6412 = vpow2.f32 %v1845_v41  ;;  %v1847_v44 = vmul.f32 1.442695, %v1844_v42 }
 0xa28   : > { %6414 = vrcp.f32 %v1496_v43  ;;  %v1499_v45 = vpop.xlane.xlu1 %1498 }
 0xa29   : > { %v6409_v46 = vpop.eup %6408  ;;  %6416 = vpow2.f32 %v1847_v44 }
 0xa2a   : > { %6418 = vrcp.f32 %v1499_v45  ;;  %v1729_v47 = vsel %vm1481_vm5, %v6409_v46, 0.0 }
 0xa2b   : > { %v6411_v48 = vpop.eup %6410  ;;  %1730 = vadd.xlane.f32.xlu0 %v1729_v47 }
 0xa2c   : > { %v1732_v21 = vsel %vm1481_vm5, %v6411_v48, 0.0 }
 0xa2d   : > { %1733 = vadd.xlane.f32.xlu1 %v1732_v21 }
 0xa31   : > { %v6413_v49 = vpop.eup %6412 }
 0xa32   : > { %v6415_v50 = vpop.eup %6414  ;;  %v1849_v51 = vsel %vm1481_vm5, %v6413_v49, 0.0 }
 0xa33   : > { %v6417_v52 = vpop.eup %6416  ;;  %1850 = vadd.xlane.f32.xlu0 %v1849_v51  ;;  %v1501_v55 = vmul.f32 %v6415_v50, %v6405_v25  ;;  %v6309_v50 = vld [vmem:[%s7712_s16 + $0x8] sm:$0xff]  }
 0xa34   : > { %v6419_v53 = vpop.eup %6418  ;;  %v1852_v54 = vsel %vm1481_vm5, %v6417_v52, 0.0  ;;  %v6311_v51 = vld [vmem:[%s7714_s18 + $0x8] sm:$0xff]  }
 0xa35   : > { %v1503_v40 = vmul.f32 %v6419_v53, %v6407_v27  ;;  %1853 = vadd.xlane.f32.xlu1 %v1852_v54  ;;  %v6313_v53 = vld [vmem:[%s7714_s18 + $0x18] sm:$0xff]   ;;  %v6314_v54 = vld [vmem:[%s7714_s18 + $0x20] sm:$0xff]  }
 0xa37   : > { %v1504_v57 = vpack.c.bf16 %v1503_v40, %v1501_v55  ;;  %v6315_v55 = vld [vmem:[%s7714_s18 + $0x28] sm:$0xff]  }
 0xa39   : > { %5866 = vmatmul.mubr.msk.bf16.vlgmr.msra.gmra.mrb[36].mxu1 %vm1481_vm5, %v1504_v57 }
 0xa3a   : > { %5877 = vmatprep.mubr.msk.bf16.mxu1 %vm6570_vm0, %v6569_v1 }
 0xa46   : > { %1860 = vrot.lane.b32.xlu1 %v6905_v14, %s7776_s26 }
 0xa49   : > { %1740 = vrot.lane.b32.xlu0 %v6905_v14, %s7773_s24 }
 0xab8   : > { %v1731_v58 = vpop.xlane.xlu0 %1730 }
 0xab9   : > { %6420 = vrcp.f32 %v1731_v58 }
 0xaba   : > { %v1734_v60 = vpop.xlane.xlu1 %1733 }
 0xabb   : > { %6422 = vrcp.f32 %v1734_v60 }
 0xac0   : > { %v1851_v61 = vpop.xlane.xlu0 %1850 }
 0xac1   : > { %6424 = vrcp.f32 %v1851_v61 }
 0xac2   : > { %v1854_v62 = vpop.xlane.xlu1 %1853 }
 0xac3   : > { %v6421_v0 = vpop.eup %6420  ;;  %6426 = vrcp.f32 %v1854_v62 }
 0xac4   : > { %v1741_v2 = vpop.permute.xlu0 %1740  ;;  %v1736_v4 = vmul.f32 %v6421_v0, %v6409_v46 }
 0xac5   : > { %v6423_v3 = vpop.eup %6422  ;;  %5876 = vmatpush3.bf16.msra.mxu1 %v1741_v2  ;;  %v5389_v2 = vld [vmem:[%s7706_s10] ss:$0 sm:$0xff] }
 0xac6   : > { %v1738_v5 = vmul.f32 %v6423_v3, %v6411_v48  ;;  %5887 = vmatprep.subr.bf16.mxu1 %v6569_v1  ;;  %v1861_v8 = vpop.permute.xlu1 %1860  ;;  %v6504_v48 = vld [vmem:[%s6767_s30] sm:$0xff]  ;;  %s7780_s30 = sld [smem:[#allocation19_spill]] }
 0xac8   : > { %v1739_v7 = vpack.c.bf16 %v1738_v5, %v1736_v4 }
 0xaca   : > { %5878 = vmatmul.mubr.msk.bf16.vlgmr.msra.gmra.mrb[40].mxu1 %vm1481_vm5, %v1739_v7 }
 0xacb   : > { %v6425_v14 = vpop.eup %6424  ;;  %5888 = vmatpush3.bf16.msra.mxu1 %v1861_v8  ;;  %5889 = vmatprep.mubr.msk.bf16.mxu1 %vm6570_vm0, %v6569_v1  ;;  %v5390_v8 = vld [vmem:[%s7707_s11] ss:$0 sm:$0xff] }
 0xacc   : > { %5901 = vmatprep.subr.bf16.mxu1 %v6569_v1  ;;  %v1856_v11 = vmul.f32 %v6425_v14, %v6413_v49  ;;  %v6308_v49 = vld [vmem:[%s7712_s16] sm:$0xff]   ;;  %s7781_s25 = smov %s7780_s30 }
 0xacd   : > { %v6427_v10 = vpop.eup %6426  ;;  %5894 = vmatpush3.bf16.msra.mxu0 %v6308_v49 }
 0xace   : > { %v1858_v12 = vmul.f32 %v6427_v10, %v6417_v52  ;;  %5895 = vmatprep.subr.bf16.mxu0 %v6569_v1  ;;  %v6312_v52 = vld [vmem:[%s7714_s18 + $0x10] sm:$0xff]  }
 0xad0   : > { %v1859_v13 = vpack.c.bf16 %v1858_v12, %v1856_v11 }
 0xad1   : > { %5896 = vmatpush3.bf16.msra.mxu0 %v6309_v50 }
 0xad2   : > { %5890 = vmatmul.mubr.msk.bf16.vlgmr.msra.gmra.mrb[44].mxu1 %vm1481_vm5, %v1859_v13  ;;  %5921 = vmatprep.subr.bf16.mxu0 %v6569_v1  ;;  %v6316_v13 = vld [vmem:[%s7714_s18 + $0x30] sm:$0xff]  }
 0xad3   : > { %5917 = vmatprep.mubr.msk.bf16.mxu1 %vm6570_vm0, %v6569_v1 }
 0xb0c   : > { %v1662_v56 = vpop.f32.mrb[36].mxu1 }
 0xb0d   : > { %v1663_v15 = vadd.f32 %v1662_v56, %v6949_v59  ;;  %v5867_v16 = vpop.f32.mrb[37].mxu1  ;;  %v6317_v56 = vld [vmem:[%s7714_s18 + $0x38] sm:$0xff]  }
 0xb0e   : > { %v1665_v17 = vpop.f32.mrb[38].mxu1 }
 0xb0f   : > { %v1666_v20 = vadd.f32 %v1665_v17, %v6951_v63  ;;  %v5868_v22 = vpop.f32.mrb[39].mxu1 }
 0xb9d   : > { %v1780_v23 = vpop.f32.mrb[40].mxu1 }
 0xb9e   : > { %v1787_v24 = vadd.f32 %v1780_v23, %v1663_v15  ;;  %v5879_v25 = vpop.f32.mrb[41].mxu1  ;;  %v5391_v15 = vld [vmem:[%s7713_s17] ss:$0 sm:$0xff] }
 0xb9f   : > { %v1783_v26 = vpop.f32.mrb[42].mxu1 }
 0xba0   : > { %v1788_v27 = vadd.f32 %v1783_v26, %v1666_v20  ;;  %v5880_v28 = vpop.f32.mrb[43].mxu1 }
 0xba5   : > { %v1900_v29 = vpop.f32.mrb[44].mxu1 }
 0xba6   : > { %v1907_v30 = vadd.f32 %v1900_v29, %v1787_v24  ;;  %v5891_v31 = vpop.f32.mrb[45].mxu1 }
 0xba7   : > { %v1903_v32 = vpop.f32.mrb[46].mxu1 }
 0xba8   : > { %v1908_v33 = vadd.f32 %v1903_v32, %v1788_v27  ;;  %v5892_v34 = vpop.f32.mrb[47].mxu1  ;;  %v1909_v59 = vadd.f32 %v1907_v30, %v6852_v18  ;;  %v6987_v18 = vadd.f32 %v6504_v48, %v6903_v6  ;;  %v6310_v6 = vld [vmem:[%s7714_s18] sm:$0xff]  }
 0xba9   : > { %5902 = vmatpush3.bf16.msra.mxu1 %v6310_v6  ;;  %v5395_v30 = vld [vmem:[%s7715_s19] ss:$0 sm:$0xff] }
 0xbaa   : > { %v1913_v36 = vsel %vm729_vm1, %v1909_v59, 0.0  ;;  %v1910_v63 = vadd.f32 %v1908_v33, %v6854_v19  ;;  %v1273_v21 = vsel %vm729_vm1, %v6987_v18, 0.0  ;;  %5903 = vmatprep.subr.bf16.mxu1 %v6569_v1 }
 0xbab   : > { %1914 = vadd.xlane.f32.xlu1 %v1913_v36 }
 0xbac   : > { %v1916_v37 = vsel %vm729_vm1, %v1910_v63, 0.0 }
 0xbad   : > { %1917 = vadd.xlane.f32.xlu0 %v1916_v37  ;;  %5904 = vmatpush3.bf16.msra.mxu1 %v6311_v51 }
 0xbae   : > { %5905 = vmatprep.subr.bf16.mxu1 %v6569_v1 }
 0xbb1   : > { %5906 = vmatpush3.bf16.msra.mxu1 %v6312_v52 }
 0xbb2   : > { %5907 = vmatprep.subr.bf16.mxu1 %v6569_v1 }
 0xbb5   : > { %5908 = vmatpush3.bf16.msra.mxu1 %v6313_v53 }
 0xbb6   : > { %5909 = vmatprep.subr.bf16.mxu1 %v6569_v1 }
 0xbb9   : > { %5910 = vmatpush3.bf16.msra.mxu1 %v6314_v54 }
 0xbba   : > { %5911 = vmatprep.subr.bf16.mxu1 %v6569_v1 }
 0xbbd   : > { %5912 = vmatpush3.bf16.msra.mxu1 %v6315_v55 }
 0xbbe   : > { %5913 = vmatprep.subr.bf16.mxu1 %v6569_v1 }
 0xbc1   : > { %5914 = vmatpush3.bf16.msra.mxu1 %v6316_v13  ;;  %v5406_v13 = vld [vmem:[%s7706_s10 + $0x1] ss:$0 sm:$0xff] }
 0xbc2   : > { %5915 = vmatprep.subr.bf16.mxu1 %v6569_v1 }
 0xbc5   : > { %5916 = vmatpush3.bf16.msra.mxu1 %v6317_v56 }
 0xbc6   : > { %5941 = vmatprep.subr.bf16.mxu1 %v6569_v1 }
 0xc38   : > { %v1915_v38 = vpop.xlane.xlu1 %1914 }
 0xc39   : > { %v1919_v39 = vmul.f32 0.03125, %v1915_v38 }
 0xc3a   : > { %v1918_v41 = vpop.xlane.xlu0 %1917 }
 0xc3b   : > { %v1921_v42 = vsub.f32 %v1909_v59, %v1919_v39  ;;  %v1920_v43 = vmul.f32 0.03125, %v1918_v41 }
 0xc3d   : > { %v1922_v44 = vsub.f32 %v1910_v63, %v1920_v43  ;;  %v1923_v45 = vmul.f32 %v1921_v42, %v1921_v42 }
 0xc3f   : > { %v1925_v46 = vsel %vm729_vm1, %v1923_v45, 0.0  ;;  %v1924_v47 = vmul.f32 %v1922_v44, %v1922_v44  ;;  %v6319_v45 = vld [vmem:[%s7777_s23 + $0x8] sm:$0xff]  }
 0xc40   : > { %1926 = vadd.xlane.f32.xlu0 %v1925_v46 }
 0xc41   : > { %v1928_v19 = vsel %vm729_vm1, %v1924_v47, 0.0 }
 0xc42   : > { %1929 = vadd.xlane.f32.xlu1 %v1928_v19 }
 0xc44   : > { %1274 = vadd.xlane.f32.xlu0 %v1273_v21 }
 0xccd   : > { %v1927_v40 = vpop.xlane.xlu0 %1926 }
 0xcce   : > { %v1931_v57 = vmul.f32 0.03125, %v1927_v40  ;;  %v5371_v40 = vld [vmem:[%s7778_s8] ss:$0 sm:$0xff] }
 0xccf   : > { %v1930_v58 = vpop.xlane.xlu1 %1929 }
 0xcd0   : > { %v1933_v60 = vadd.f32 1e-05, %v1931_v57  ;;  %v1932_v61 = vmul.f32 0.03125, %v1930_v58  ;;  %v5372_v58 = vld [vmem:[%s7779_s9] ss:$0 sm:$0xff] }
 0xcd1   : > { %v1275_v28 = vpop.xlane.xlu0 %1274 }
 0xcd2   : > { %6428 = vrsqrt.f32 %v1933_v60  ;;  %v1934_v62 = vadd.f32 1e-05, %v1932_v61  ;;  %v1277_v29 = vmul.f32 0.03125, %v1275_v28 }
 0xcd4   : > { %6430 = vrsqrt.f32 %v1934_v62  ;;  %v1278_v32 = vsub.f32 %v6987_v18, %v1277_v29 }
 0xcd6   : > { %v1279_v41 = vmul.f32 %v1278_v32, %v1278_v32 }
 0xcd8   : > { %v1280_v43 = vsel %vm729_vm1, %v1279_v41, 0.0 }
 0xcdc   : > { %v6429_v0 = vpop.eup %6428 }
 0xcdd   : > { %v1937_v3 = vmul.f32 %v6429_v0, %v1921_v42  ;;  %v6322_v0 = vld [vmem:[%s7780_s30 + $0x4] ss:$8 sps:$4 sm:$0xff]   ;;  %s687_s30 = sand.u32 1, %s7782_s5  }
 0xcde   : > { %v6431_v4 = vpop.eup %6430  ;;  %s5351_s0 = sshll.u32 %s687_s30, 3  ;;  %s5263_s5 = scalar_lea.sflag [#allocation3], %s687_s30 }
 0xcdf   : > { %v1945_v5 = vmul.f32 %v5389_v2, %v1937_v3  ;;  %v1938_v7 = vmul.f32 %v6431_v4, %v1922_v44  ;;  %v6318_v44 = vld [vmem:[%s7777_s23] sm:$0xff]   ;;  %v6323_v3 = vld [vmem:[%s7781_s25 + $0x10] ss:$8 sps:$4 sm:$0xff]   ;;  %v6325_v4 = vld [vmem:[%s7781_s25 + $0x14] ss:$8 sps:$4 sm:$0xff]  }
 0xce1   : > { %v1946_v14 = vmul.f32 %v5389_v2, %v1938_v7  ;;  %v1953_v10 = vadd.f32 %v5390_v8, %v1945_v5  ;;  %v6320_v2 = vld [vmem:[%s7781_s25] ss:$8 sps:$4 sm:$0xff]  }
 0xce3   : > { %v1954_v11 = vadd.f32 %v5390_v8, %v1946_v14 }
 0xce5   : > { %v1977_v12 = vpack.c.bf16 %v1954_v11, %v1953_v10 }
 0xce7   : > { %5898 = vmatmul.mubr.msk.bf16.vlgmr.msra.gmra.mrb[32].mxu0 %vm729_vm1, %v1977_v12 }
 0xce8   : > { %5925 = vmatprep.mubr.msk.bf16.mxu0 %vm6570_vm0, %v6569_v1  ;;  %5922 = vmatpush3.bf16.msra.mxu0 %v6318_v44 }
 0xce9   : > { %5923 = vmatprep.subr.bf16.mxu0 %v6569_v1 }
 0xcec   : > { %5924 = vmatpush3.bf16.msra.mxu0 %v6319_v45 }
 0xced   : > { %2274 = vmatprep.subr.bf16.mxu0 %v6322_v0 }
 0xdba   : > { %v2033_v16 = vpop.f32.mrb[32].mxu0 }
 0xdbb   : > { %v2034_v17 = vadd.f32 %v5391_v15, %v2033_v16  ;;  %v5899_v20 = vpop.f32.mrb[33].mxu0 }
 0xdbc   : > { %v2036_v22 = vpop.f32.mrb[34].mxu0  ;;  %v5407_v20 = vld [vmem:[%s7707_s11 + $0x1] ss:$0 sm:$0xff] }
 0xdbd   : > { %v2037_v23 = vadd.f32 %v5391_v15, %v2036_v22  ;;  %v5900_v24 = vpop.f32.mrb[35].mxu0  ;;  %v2040_v25 = vmax.f32 %v2034_v17, 0.0 }
 0xdbf   : > { %v2041_v26 = vmax.f32 %v2037_v23, 0.0 }
 0xdc1   : > { %v2042_v27 = vpack.c.bf16 %v2041_v26, %v2040_v25 }
 0xdc3   : > { %5918 = vmatmul.mubr.bf16.vlgmr.msra.gmra.mrb[48].mxu1 %v2042_v27 }
 0xdc4   : > { %5943 = vmatprep.mubr.msk.bf16.mxu1 %vm6570_vm0, %v6569_v1 }
 0xe96   : > { %v2131_v31 = vpop.f32.mrb[48].mxu1 }
 0xe97   : > { %v2132_v33 = vadd.f32 %v5395_v30, %v2131_v31  ;;  %v5919_v34 = vpop.f32.mrb[49].mxu1 }
 0xe98   : > { %v2134_v59 = vpop.f32.mrb[50].mxu1 }
 0xe99   : > { %v2135_v36 = vadd.f32 %v5395_v30, %v2134_v59  ;;  %v5920_v63 = vpop.f32.mrb[51].mxu1  ;;  %v2138_v37 = vadd.f32 %v2132_v33, %v1953_v10 }
 0xe9b   : > { %v2144_v38 = vsel %vm729_vm1, %v2138_v37, 0.0  ;;  %v2139_v39 = vadd.f32 %v2135_v36, %v1954_v11 }
 0xe9c   : > { %2145 = vadd.xlane.f32.xlu1 %v2144_v38 }
 0xe9d   : > { %v2147_v42 = vsel %vm729_vm1, %v2139_v39, 0.0 }
 0xe9e   : > { %2148 = vadd.xlane.f32.xlu0 %v2147_v42 }
 0xea0   : > { %1281 = vadd.xlane.f32.xlu1 %v1280_v43 }
 0xf29   : > { %v2146_v46 = vpop.xlane.xlu1 %2145 }
 0xf2a   : > { %v2150_v47 = vmul.f32 0.03125, %v2146_v46 }
 0xf2b   : > { %v2149_v48 = vpop.xlane.xlu0 %2148 }
 0xf2c   : > { %v2152_v18 = vsub.f32 %v2138_v37, %v2150_v47  ;;  %v2151_v19 = vmul.f32 0.03125, %v2149_v48 }
 0xf2d   : > { %v1282_v21 = vpop.xlane.xlu1 %1281 }
 0xf2e   : > { %v2153_v49 = vsub.f32 %v2139_v39, %v2151_v19  ;;  %v1283_v50 = vmul.f32 0.03125, %v1282_v21  ;;  %v2154_v6 = vmul.f32 %v2152_v18, %v2152_v18 }
 0xf30   : > { %v1284_v51 = vadd.f32 1e-05, %v1283_v50  ;;  %v2156_v52 = vsel %vm729_vm1, %v2154_v6, 0.0  ;;  %v2155_v53 = vmul.f32 %v2153_v49, %v2153_v49 }
 0xf31   : > { %2157 = vadd.xlane.f32.xlu0 %v2156_v52 }
 0xf32   : > { %6432 = vrsqrt.f32 %v1284_v51  ;;  %v2159_v54 = vsel %vm729_vm1, %v2155_v53, 0.0 }
 0xf33   : > { %2160 = vadd.xlane.f32.xlu1 %v2159_v54 }
 0xf3c   : > { %v6433_v55 = vpop.eup %6432 }
 0xf3d   : > { %v1286_v57 = vmul.f32 %v6433_v55, %v1278_v32 }
 0xf3f   : > { %v1293_v60 = vmul.f32 %v5371_v40, %v1286_v57 }
 0xf41   : > { %v7068_v61 = vadd.f32 %v5372_v58, %v1293_v60 }
 0xf43   : > { %v2194_v62 = vpack.c.bf16 %v7068_v61, %v7068_v61 }
 0xf45   : > { %5926 = vmatmul.mubr.msk.bf16.vlgmr.msra.gmra.mrb[36].mxu0 %vm729_vm1, %v2194_v62 }
 0xf46   : > { %2306 = vmatprep.mubr.bf16.mxu0 %v6571_v9  ;;  %2275 = vmatpush1.bf16.msra.mxu0 %v6320_v2 }
 0xf47   : > { %2276 = vmatprep.subr.bf16.mxu0 %v6325_v4 }
 0xf4a   : > { %2277 = vmatpush1.bf16.msra.mxu0 %v6323_v3 }
 0xf4b   : > { %5929 = vmatprep.subr.bf16.mxu0 %v6569_v1 }
 0xfbe   : > { %v2158_v5 = vpop.xlane.xlu0 %2157 }
 0xfbf   : > { %v2162_v7 = vmul.f32 0.03125, %v2158_v5 }
 0xfc0   : > { %v2161_v8 = vpop.xlane.xlu1 %2160 }
 0xfc1   : > { %v2164_v14 = vadd.f32 1e-05, %v2162_v7  ;;  %v2163_v10 = vmul.f32 0.03125, %v2161_v8 }
 0xfc3   : > { %6434 = vrsqrt.f32 %v2164_v14  ;;  %v2165_v11 = vadd.f32 1e-05, %v2163_v10 }
 0xfc5   : > { %6436 = vrsqrt.f32 %v2165_v11 }
 0xfcd   : > { %v6435_v12 = vpop.eup %6434 }
 0xfce   : > { %v2168_v56 = vmul.f32 %v6435_v12, %v2152_v18 }
 0xfcf   : > { %v6437_v15 = vpop.eup %6436 }
 0xfd0   : > { %v2176_v16 = vmul.f32 %v5406_v13, %v2168_v56  ;;  %v2169_v17 = vmul.f32 %v6437_v15, %v2153_v49 }
 0xfd2   : > { %v2177_v22 = vmul.f32 %v5406_v13, %v2169_v17  ;;  %v7093_v23 = vadd.f32 %v5407_v20, %v2176_v16 }
 0xfd4   : > { %v7095_v24 = vadd.f32 %v5407_v20, %v2177_v22 }
 0xfd6   : > { %v7099_v25 = vpack.c.bf16 %v7095_v24, %v7093_v23 }
 0xfd8   : > { %5415 = vmatmul.mubr.msk.bf16.vlgmr.msra.gmra.mrb[40].mxu0 %vm729_vm1, %v7099_v25 }
 0xfd9   : > { %5931 = vmatprep.mubr.msk.bf16.mxu0 %vm6570_vm0, %v6569_v1 }
0x1018   : > { %v2245_v26 = vpop.f32.mrb[36].mxu0 }
0x1019   : > { %v2318_v27 = vpack.c.bf16 %v2245_v26, %v2245_v26  ;;  %v5927_v28 = vpop.f32.mrb[37].mxu0 }
0x101a   : > { %v2248_v29 = vpop.f32.mrb[38].mxu0 }
0x101b   : > { %2369 = vrot.lane.b32.xlu0 %v2318_v27, %s7774_s6  ;;  %v5928_v30 = vpop.f32.mrb[39].mxu0 }
0x101f   : > { %2600 = vrot.lane.b32.xlu0 %v2318_v27, %s7776_s26 }
0x108d   : > { %v2370_v37 = vpop.permute.xlu0 %2369 }
0x1091   : > { %v2601_v6 = vpop.permute.xlu0 %2600 }
0x10ab   : > { %v2308_v31 = vpop.f32.mrb[40].mxu0 }
0x10ac   : > { %v2310_v32 = vpop.f32.mrb[41].mxu0 }
0x10ad   : > { %v2312_v33 = vpop.f32.mrb[42].mxu0 }
0x10ae   : > { %v2319_v34 = vpack.c.bf16 %v2312_v33, %v2308_v31  ;;  %v2314_v59 = vpop.f32.mrb[43].mxu0 }
0x10af   : > { %v2317_v36 = vpack.c.bf16 %v2314_v59, %v2310_v32 }
0x10b0   : > { %2647 = vrot.lane.b32.xlu0 %v2319_v34, %s7776_s26  ;;  %2417 = vrot.lane.b32.xlu1 %v2319_v34, %s7774_s6 }
0x10b1   : > { %v2324_v63 = vsel %vm729_vm1, %v2317_v36, 0 }
0x10b2   : > { %5930 = vmatpush3.bf16.xpose.msra.mxu0 %v2324_v63 }
0x10b3   : > { %5935 = vmatprep.subr.bf16.mxu0 %v6569_v1 }
0x10b4   : > { %2506 = vrot.lane.b32.xlu1 %v2318_v27, %s7773_s24 }
0x10b8   : > { %2553 = vrot.lane.b32.xlu1 %v2319_v34, %s7773_s24 }
0x10b9   : > { %5932 = vmatmul.mubr.msk.bf16.vlgmr.msra.gmra.mrb[44].mxu0 %vm729_vm1, %v2318_v27 }
0x10ba   : > { %5936 = vmatpush3.bf16.xpose.msra.mxu0 %v2324_v63  ;;  %5937 = vmatprep.mubr.msk.bf16.mxu0 %vm6570_vm0, %v6569_v1 }
0x10bb   : > { %5947 = vmatprep.subr.bf16.mxu0 %v6569_v1 }
0x10c1   : > { %5938 = vmatmul.mubr.msk.bf16.vlgmr.msra.gmra.mrb[48].mxu0 %vm729_vm1, %v2370_v37  ;;  %v6327_v37 = vld [vmem:[%s7708_s12 + $0x8] sm:$0xff]  }
0x10c2   : > { %5948 = vmatpush3.bf16.msra.mxu0 %v2319_v34  ;;  %5949 = vmatprep.mubr.msk.bf16.mxu0 %vm6570_vm0, %v6569_v1 }
0x10c3   : > { %5959 = vmatprep.subr.bf16.mxu0 %v6569_v1 }
0x1122   : > { %v2418_v38 = vpop.permute.xlu1 %2417  ;;  %v2648_v7 = vpop.permute.xlu0 %2647 }
0x1123   : > { %5942 = vmatpush3.bf16.msra.mxu1 %v2418_v38  ;;  %v6329_v38 = vld [vmem:[%s7710_s14 + $0x8] sm:$0xff]  }
0x1124   : > { %5953 = vmatprep.subr.bf16.mxu1 %v6569_v1 }
0x1126   : > { %v2507_v39 = vpop.permute.xlu1 %2506 }
0x112a   : > { %v2554_v47 = vpop.permute.xlu1 %2553 }
0x118c   : > { %v2360_v41 = vpop.f32.mrb[44].mxu0 }
0x118d   : > { %v2366_v42 = vmul.f32 0.35355338, %v2360_v41  ;;  %v5933_v43 = vpop.f32.mrb[45].mxu0  ;;  %v6331_v41 = vld [vmem:[%s7710_s14 + $0x18] sm:$0xff]  }
0x118e   : > { %v2363_v44 = vpop.f32.mrb[46].mxu0  ;;  %v6333_v43 = vld [vmem:[%s7710_s14 + $0x28] sm:$0xff]  }
0x118f   : > { %v2367_v45 = vpack.c.bf16 %v2366_v42, %v2366_v42  ;;  %v5934_v46 = vpop.f32.mrb[47].mxu0  ;;  %v6332_v42 = vld [vmem:[%s7710_s14 + $0x20] sm:$0xff]  }
0x1191   : > { %5950 = vmatmul.mubr.msk.bf16.vlgmr.msra.gmra.mrb[52].mxu0 %vm1481_vm5, %v2367_v45 }
0x1192   : > { %5960 = vmatpush3.bf16.msra.mxu0 %v2554_v47  ;;  %5961 = vmatprep.mubr.msk.bf16.mxu0 %vm6570_vm0, %v6569_v1 }
0x1193   : > { %5971 = vmatprep.subr.bf16.mxu0 %v6569_v1 }
0x1194   : > { %v2408_v48 = vpop.f32.mrb[48].mxu0 }
0x1195   : > { %v2414_v18 = vmul.f32 0.35355338, %v2408_v48  ;;  %v5939_v19 = vpop.f32.mrb[49].mxu0  ;;  %v5426_v48 = vld [vmem:[%s7778_s8 + $0x1] ss:$0 sm:$0xff] }
0x1196   : > { %v2411_v21 = vpop.f32.mrb[50].mxu0  ;;  %v5427_v19 = vld [vmem:[%s7779_s9 + $0x1] ss:$0 sm:$0xff] }
0x1197   : > { %v2415_v49 = vpack.c.bf16 %v2414_v18, %v2414_v18  ;;  %v5940_v50 = vpop.f32.mrb[51].mxu0 }
0x1199   : > { %5944 = vmatmul.mubr.msk.bf16.vlgmr.msra.gmra.mrb[52].mxu1 %vm1481_vm5, %v2415_v49 }
0x119a   : > { %5954 = vmatpush3.bf16.xpose.msra.mxu1 %v2324_v63  ;;  %5955 = vmatprep.mubr.msk.bf16.mxu1 %vm6570_vm0, %v6569_v1 }
0x119b   : > { %5965 = vmatprep.subr.bf16.mxu1 %v6569_v1 }
0x11a1   : > { %5956 = vmatmul.mubr.msk.bf16.vlgmr.msra.gmra.mrb[56].mxu1 %vm729_vm1, %v2507_v39  ;;  %v6330_v39 = vld [vmem:[%s7710_s14 + $0x10] sm:$0xff]  }
0x11a2   : > { %5966 = vmatpush3.bf16.xpose.msra.mxu1 %v2324_v63  ;;  %5967 = vmatprep.mubr.msk.bf16.mxu1 %vm6570_vm0, %v6569_v1  ;;  %v6326_v63 = vld [vmem:[%s7708_s12] sm:$0xff]  }
0x11a3   : > { %5977 = vmatprep.subr.bf16.mxu1 %v6569_v1 }
0x11a9   : > { %5968 = vmatmul.mubr.msk.bf16.vlgmr.msra.gmra.mrb[60].mxu1 %vm729_vm1, %v2601_v6  ;;  %v6334_v6 = vld [vmem:[%s7710_s14 + $0x30] sm:$0xff]  }
0x11aa   : > { %5981 = vmatprep.mubr.msk.bf16.mxu1 %vm6570_vm0, %v6569_v1  ;;  %5978 = vmatpush3.bf16.msra.mxu1 %v6326_v63 }
0x11ab   : > { %5979 = vmatprep.subr.bf16.mxu1 %v6569_v1 }
0x11ae   : > { %5980 = vmatpush3.bf16.msra.mxu1 %v6327_v37 }
0x11af   : > { %6005 = vmatprep.subr.bf16.mxu1 %v6569_v1 }
0x1264   : > { %v2500_v51 = vpop.f32.mrb[52].mxu0 }
0x1265   : > { %v5951_v52 = vpop.f32.mrb[53].mxu0 }
0x1266   : > { %v2503_v53 = vpop.f32.mrb[54].mxu0  ;;  %v5428_v52 = vld [vmem:[%s7709_s13] ss:$0 sm:$0xff] }
0x1267   : > { %v5952_v54 = vpop.f32.mrb[55].mxu0 }
0x126c   : > { %v2457_v55 = vpop.f32.mrb[52].mxu1 }
0x126d   : > { %v2501_v40 = vadd.f32 %v2500_v51, %v2457_v55  ;;  %v5945_v57 = vpop.f32.mrb[53].mxu1  ;;  %v6335_v51 = vld [vmem:[%s7710_s14 + $0x38] sm:$0xff]  }
0x126e   : > { %v2460_v58 = vpop.f32.mrb[54].mxu1 }
0x126f   : > { %v5946_v60 = vpop.f32.mrb[55].mxu1 }
0x1274   : > { %v2545_v62 = vpop.f32.mrb[56].mxu1 }
0x1275   : > { %v2551_v0 = vmul.f32 0.35355338, %v2545_v62  ;;  %v5957_v2 = vpop.f32.mrb[57].mxu1  ;;  %v5432_v62 = vld [vmem:[%s7711_s15] ss:$0 sm:$0xff] }
0x1276   : > { %v2548_v3 = vpop.f32.mrb[58].mxu1 }
0x1277   : > { %v2552_v4 = vpack.c.bf16 %v2551_v0, %v2551_v0  ;;  %v5958_v5 = vpop.f32.mrb[59].mxu1 }
0x1279   : > { %5962 = vmatmul.mubr.msk.bf16.vlgmr.msra.gmra.mrb[56].mxu0 %vm1481_vm5, %v2552_v4 }
0x127a   : > { %5972 = vmatpush3.bf16.msra.mxu0 %v2648_v7  ;;  %5973 = vmatprep.mubr.msk.bf16.mxu0 %vm6570_vm0, %v6569_v1 }
0x127b   : > { %5985 = vmatprep.subr.bf16.mxu0 %v6569_v1 }
0x127c   : > { %v2639_v8 = vpop.f32.mrb[60].mxu1 }
0x127d   : > { %v2645_v14 = vmul.f32 0.35355338, %v2639_v8  ;;  %v5969_v10 = vpop.f32.mrb[61].mxu1 }
0x127e   : > { %v2642_v11 = vpop.f32.mrb[62].mxu1 }
0x127f   : > { %v2646_v12 = vpack.c.bf16 %v2645_v14, %v2645_v14  ;;  %v5970_v13 = vpop.f32.mrb[63].mxu1 }
0x1281   : > { %5974 = vmatmul.mubr.msk.bf16.vlgmr.msra.gmra.mrb[60].mxu0 %vm1481_vm5, %v2646_v12 }
0x1282   : > { %6001 = vmatprep.mubr.msk.bf16.mxu0 %vm6570_vm0, %v6569_v1 }
0x134c   : > { %v2593_v56 = vpop.f32.mrb[56].mxu0 }
0x134d   : > { %v2599_v15 = vadd.f32 %v2593_v56, %v2501_v40  ;;  %v5963_v16 = vpop.f32.mrb[57].mxu0  ;;  %v6336_v56 = vld [vmem:[%s7765_s27 + $0x10] sm:$0xff]  }
0x134e   : > { %v2596_v17 = vpop.f32.mrb[58].mxu0  ;;  %v6340_v16 = vld [vmem:[%s7766_s2 + $0x24] ss:$8 sps:$4 sm:$0xff]  }
0x134f   : > { %v5964_v20 = vpop.f32.mrb[59].mxu0 }
0x1354   : > { %v2687_v22 = vpop.f32.mrb[60].mxu0 }
0x1355   : > { %v2693_v26 = vadd.f32 %v2687_v22, %v2599_v15  ;;  %v5975_v27 = vpop.f32.mrb[61].mxu0  ;;  %v6337_v15 = vld [vmem:[%s7765_s27 + $0x18] sm:$0xff]  }
0x1356   : > { %v2690_v28 = vpop.f32.mrb[62].mxu0  ;;  %v5443_v27 = vld [vmem:[%s7778_s8 + $0x2] ss:$0 sm:$0xff] }
0x1357   : > { %v5976_v29 = vpop.f32.mrb[63].mxu0  ;;  %v2694_v30 = vadd.f32 %v2693_v26, %v7068_v61  ;;  %v6328_v61 = vld [vmem:[%s7710_s14] sm:$0xff]  }
0x1358   : > { %5986 = vmatpush3.bf16.msra.mxu0 %v6328_v61  ;;  %v5444_v29 = vld [vmem:[%s7779_s9 + $0x2] ss:$0 sm:$0xff] }
0x1359   : > { %v2699_v31 = vsel %vm729_vm1, %v2694_v30, 0.0  ;;  %5987 = vmatprep.subr.bf16.mxu0 %v6569_v1 }
0x135a   : > { %2700 = vadd.xlane.f32.xlu1 %v2699_v31 }
0x135c   : > { %5988 = vmatpush3.bf16.msra.mxu0 %v6329_v38 }
0x135d   : > { %5989 = vmatprep.subr.bf16.mxu0 %v6569_v1 }
0x1360   : > { %5990 = vmatpush3.bf16.msra.mxu0 %v6330_v39 }
0x1361   : > { %5991 = vmatprep.subr.bf16.mxu0 %v6569_v1 }
0x1364   : > { %5992 = vmatpush3.bf16.msra.mxu0 %v6331_v41 }
0x1365   : > { %5993 = vmatprep.subr.bf16.mxu0 %v6569_v1 }
0x1368   : > { %5994 = vmatpush3.bf16.msra.mxu0 %v6332_v42 }
0x1369   : > { %5995 = vmatprep.subr.bf16.mxu0 %v6569_v1 }
0x136c   : > { %5996 = vmatpush3.bf16.msra.mxu0 %v6333_v43 }
0x136d   : > { %5997 = vmatprep.subr.bf16.mxu0 %v6569_v1 }
0x1370   : > { %5998 = vmatpush3.bf16.msra.mxu0 %v6334_v6 }
0x1371   : > { %5999 = vmatprep.subr.bf16.mxu0 %v6569_v1 }
0x1374   : > { %6000 = vmatpush3.bf16.msra.mxu0 %v6335_v51 }
0x1375   : > { %6025 = vmatprep.subr.bf16.mxu0 %v6569_v1 }
0x13e7   : > { %v2701_v32 = vpop.xlane.xlu1 %2700 }
0x13e8   : > { %v2702_v33 = vmul.f32 0.03125, %v2701_v32  ;;  %v6338_v32 = vld [vmem:[%s7766_s2 + $0x20] ss:$8 sps:$4 sm:$0xff]  }
0x13ea   : > { %v2703_v34 = vsub.f32 %v2694_v30, %v2702_v33 }
0x13ec   : > { %v2704_v59 = vmul.f32 %v2703_v34, %v2703_v34 }
0x13ee   : > { %v2705_v36 = vsel %vm729_vm1, %v2704_v59, 0.0  ;;  %v6341_v59 = vld [vmem:[%s7766_s2 + $0x30] ss:$8 sps:$4 sm:$0xff]  }
0x13ef   : > { %2706 = vadd.xlane.f32.xlu0 %v2705_v36 }
0x147c   : > { %v2707_v44 = vpop.xlane.xlu0 %2706 }
0x147d   : > { %v2708_v45 = vmul.f32 0.03125, %v2707_v44 }
0x147f   : > { %v2709_v46 = vadd.f32 1e-05, %v2708_v45 }
0x1481   : > { %6438 = vrsqrt.f32 %v2709_v46 }
0x148b   : > { %v6439_v47 = vpop.eup %6438 }
0x148c   : > { %v2711_v18 = vmul.f32 %v6439_v47, %v2703_v34  ;;  %v6343_v34 = vld [vmem:[%s7766_s2 + $0x34] ss:$8 sps:$4 sm:$0xff]  }
0x148e   : > { %v2718_v21 = vmul.f32 %v5426_v48, %v2711_v18 }
0x1490   : > { %v2725_v49 = vadd.f32 %v5427_v19, %v2718_v21 }
0x1492   : > { %v2748_v50 = vpack.c.bf16 %v2725_v49, %v2725_v49 }
0x1494   : > { %5982 = vmatmul.mubr.msk.bf16.vlgmr.msra.gmra.mrb[64].mxu1 %vm729_vm1, %v2748_v50 }
0x1495   : > { %6009 = vmatprep.mubr.msk.bf16.mxu1 %vm6570_vm0, %v6569_v1  ;;  %6006 = vmatpush3.bf16.msra.mxu1 %v6336_v56  ;;  %v6345_v56 = vld [vmem:[%s7772_s21 + $0x18] sm:$0xff]  }
0x1496   : > { %6007 = vmatprep.subr.bf16.mxu1 %v6569_v1 }
0x1499   : > { %6008 = vmatpush3.bf16.msra.mxu1 %v6337_v15 }
0x149a   : > { %3024 = vmatprep.subr.bf16.mxu1 %v6340_v16 }
0x1567   : > { %v2804_v53 = vpop.f32.mrb[64].mxu1 }
0x1568   : > { %v2805_v54 = vadd.f32 %v5428_v52, %v2804_v53  ;;  %v5983_v55 = vpop.f32.mrb[65].mxu1 }
0x1569   : > { %v2807_v40 = vpop.f32.mrb[66].mxu1 }
0x156a   : > { %v2810_v57 = vmax.f32 %v2805_v54, 0.0  ;;  %v5984_v58 = vpop.f32.mrb[67].mxu1 }
0x156c   : > { %v2811_v60 = vpack.c.bf16 %v2810_v57, %v2810_v57 }
0x156e   : > { %6002 = vmatmul.mubr.bf16.vlgmr.msra.gmra.mrb[64].mxu0 %v2811_v60 }
0x156f   : > { %6027 = vmatprep.mubr.msk.bf16.mxu0 %vm6570_vm0, %v6569_v1 }
0x1641   : > { %v2900_v0 = vpop.f32.mrb[64].mxu0 }
0x1642   : > { %v2901_v2 = vadd.f32 %v5432_v62, %v2900_v0  ;;  %v6003_v3 = vpop.f32.mrb[65].mxu0 }
0x1643   : > { %v2903_v4 = vpop.f32.mrb[66].mxu0 }
0x1644   : > { %v6004_v5 = vpop.f32.mrb[67].mxu0  ;;  %v2906_v7 = vadd.f32 %v2901_v2, %v2725_v49 }
0x1646   : > { %v2911_v8 = vsel %vm729_vm1, %v2906_v7, 0.0 }
0x1647   : > { %2912 = vadd.xlane.f32.xlu0 %v2911_v8 }
0x16d4   : > { %v2913_v14 = vpop.xlane.xlu0 %2912 }
0x16d5   : > { %v2914_v10 = vmul.f32 0.03125, %v2913_v14 }
0x16d7   : > { %v2915_v11 = vsub.f32 %v2906_v7, %v2914_v10 }
0x16d9   : > { %v2916_v12 = vmul.f32 %v2915_v11, %v2915_v11 }
0x16db   : > { %v2917_v13 = vsel %vm729_vm1, %v2916_v12, 0.0  ;;  %v6344_v12 = vld [vmem:[%s7772_s21 + $0x10] sm:$0xff]  }
0x16dc   : > { %2918 = vadd.xlane.f32.xlu1 %v2917_v13 }
0x1769   : > { %v2919_v17 = vpop.xlane.xlu1 %2918 }
0x176a   : > { %v2920_v20 = vmul.f32 0.03125, %v2919_v17 }
0x176c   : > { %v2921_v22 = vadd.f32 1e-05, %v2920_v20 }
0x176e   : > { %6440 = vrsqrt.f32 %v2921_v22 }
0x1778   : > { %v6441_v26 = vpop.eup %6440 }
0x1779   : > { %v2923_v28 = vmul.f32 %v6441_v26, %v2915_v11 }
0x177b   : > { %v2930_v30 = vmul.f32 %v5443_v27, %v2923_v28 }
0x177d   : > { %v7222_v31 = vadd.f32 %v5444_v29, %v2930_v30 }
0x177f   : > { %v2948_v33 = vpack.c.bf16 %v7222_v31, %v7222_v31 }
0x1781   : > { %6010 = vmatmul.mubr.msk.bf16.vlgmr.msra.gmra.mrb[68].mxu1 %vm729_vm1, %v2948_v33 }
0x1782   : > { %3025 = vmatpush1.bf16.msra.mxu1 %v6338_v32  ;;  %3056 = vmatprep.mubr.bf16.mxu1 %v6571_v9 }
0x1783   : > { %3026 = vmatprep.subr.bf16.mxu1 %v6343_v34 }
0x1786   : > { %3027 = vmatpush1.bf16.msra.mxu1 %v6341_v59 }
0x1787   : > { %6013 = vmatprep.subr.bf16.mxu1 %v6569_v1 }
0x1789   : > { %5460 = vmatmul.mubr.msk.bf16.vlgmr.msra.gmra.mrb[72].mxu1 %vm729_vm1, %v2948_v33 }
0x178a   : > { %6015 = vmatprep.mubr.msk.bf16.mxu1 %vm6570_vm0, %v6569_v1 }
0x1854   : > { %v2998_v36 = vpop.f32.mrb[68].mxu1 }
0x1855   : > { %v3066_v63 = vpack.c.bf16 %v2998_v36, %v2998_v36  ;;  %v6011_v37 = vpop.f32.mrb[69].mxu1 }
0x1856   : > { %v3001_v61 = vpop.f32.mrb[70].mxu1 }
0x1857   : > { %3129 = vrot.lane.b32.xlu0 %v3066_v63, %s7774_s6  ;;  %v6012_v38 = vpop.f32.mrb[71].mxu1 }
0x185b   : > { %3283 = vrot.lane.b32.xlu0 %v3066_v63, %s7773_s24 }
0x185c   : > { %v3058_v39 = vpop.f32.mrb[72].mxu1 }
0x185d   : > { %v3060_v41 = vpop.f32.mrb[73].mxu1  ;;  %v7250_v46 = vpack.c.bf16 %v3058_v39, %v3058_v39 }
0x185e   : > { %v3065_v42 = vpack.c.bf16 %v3060_v41, %v3060_v41  ;;  %v3062_v43 = vpop.f32.mrb[74].mxu1 }
0x185f   : > { %3391 = vrot.lane.b32.xlu0 %v3066_v63, %s7776_s26  ;;  %v3063_v44 = vpop.f32.mrb[75].mxu1  ;;  %v3241_v48 = vsel %vm964_vm2, %v7250_v46, 0 }
0x1860   : > { %v3072_v45 = vsel %vm729_vm1, %v3065_v42, 0 }
0x1861   : > { %6014 = vmatpush3.bf16.xpose.msra.mxu1 %v3072_v45 }
0x1862   : > { %6019 = vmatprep.subr.bf16.mxu1 %v6569_v1 }
0x1868   : > { %6016 = vmatmul.mubr.msk.bf16.vlgmr.msra.gmra.mrb[76].mxu1 %vm729_vm1, %v3066_v63 }
0x1869   : > { %6020 = vmatpush3.bf16.xpose.msra.mxu1 %v3072_v45  ;;  %6021 = vmatprep.mubr.msk.bf16.mxu1 %vm6570_vm0, %v6569_v1 }
0x186a   : > { %6031 = vmatprep.subr.bf16.mxu1 %v6569_v1 }
0x18c9   : > { %v3130_v47 = vpop.permute.xlu0 %3129 }
0x18ca   : > { %6022 = vmatmul.mubr.msk.bf16.vlgmr.msra.gmra.mrb[80].mxu1 %vm729_vm1, %v3130_v47 }
0x18cb   : > { %6032 = vmatpush3.bf16.msra.mxu1 %v3241_v48  ;;  %6033 = vmatprep.mubr.msk.bf16.mxu1 %vm6570_vm0, %v6569_v1 }
0x18cc   : > { %6043 = vmatprep.subr.bf16.mxu1 %v6569_v1 }
0x18cd   : > { %v3284_v11 = vpop.permute.xlu0 %3283 }
0x18d1   : > { %v3392_v13 = vpop.permute.xlu0 %3391 }
0x193b   : > { %v3108_v18 = vpop.f32.mrb[76].mxu1 }
0x193c   : > { %v6017_v19 = vpop.f32.mrb[77].mxu1  ;;  %v3114_v0 = vmul.f32 0.35355338, %v3108_v18 }
0x193d   : > { %v3111_v21 = vpop.f32.mrb[78].mxu1 }
0x193e   : > { %v6018_v49 = vpop.f32.mrb[79].mxu1  ;;  %v3115_v2 = vsel %vm6801_vm3, %v3114_v0, -inf }
0x193f   : > { %v3116_v3 = vsel %vm885_vm4, %v3115_v2, -inf }
0x199d   : > { %v3168_v50 = vpop.f32.mrb[80].mxu1 }
0x199e   : > { %v3174_v6 = vmul.f32 0.35355338, %v3168_v50  ;;  %v6023_v51 = vpop.f32.mrb[81].mxu1 }
0x199f   : > { %v3171_v52 = vpop.f32.mrb[82].mxu1 }
0x19a0   : > { %v6024_v53 = vpop.f32.mrb[83].mxu1  ;;  %v3175_v54 = vsel %vm6801_vm3, %v3174_v6, -inf }
0x19a1   : > { %v3176_v55 = vsel %vm885_vm4, %v3175_v54, -inf }
0x19a2   : > { %3177 = vmax.xlane.f32.xlu1 %v3176_v55 }
0x1a2f   : > { %v3178_v40 = vpop.xlane.xlu1 %3177 }
0x1a30   : > { %v3179_v57 = vsub.f32 %v3175_v54, %v3178_v40 }
0x1a32   : > { %v3180_v58 = vmul.f32 1.442695, %v3179_v57 }
0x1a34   : > { %6442 = vpow2.f32 %v3180_v58 }
0x1a3e   : > { %v6443_v60 = vpop.eup %6442 }
0x1a3f   : > { %v3182_v62 = vsel %vm885_vm4, %v6443_v60, 0.0 }
0x1a40   : > { %3183 = vadd.xlane.f32.xlu1 %v3182_v62 }
0x1a51   : > { %3189 = vrot.lane.b32.xlu1 %v7250_v46, %s7774_s6 }
0x1a75   : > { %3117 = vmax.xlane.f32.xlu1 %v3116_v3 }
0x1acd   : > { %v3184_v4 = vpop.xlane.xlu1 %3183 }
0x1ace   : > { %6444 = vrcp.f32 %v3184_v4 }
0x1ad1   : > { %v3190_v5 = vpop.permute.xlu1 %3189 }
0x1ad2   : > { %v3195_v7 = vsel %vm964_vm2, %v3190_v5, 0 }
0x1ad3   : > { %6026 = vmatpush3.bf16.msra.mxu0 %v3195_v7 }
0x1ad4   : > { %6037 = vmatprep.subr.bf16.mxu0 %v6569_v1 }
0x1ad8   : > { %v6445_v8 = vpop.eup %6444 }
0x1ad9   : > { %v3186_v14 = vmul.f32 %v6445_v8, %v6443_v60 }
0x1adb   : > { %v3187_v10 = vpack.c.bf16 %v3186_v14, %v3186_v14 }
0x1add   : > { %6028 = vmatmul.mubr.msk.bf16.vlgmr.msra.gmra.mrb[68].mxu0 %vm885_vm4, %v3187_v10 }
0x1ade   : > { %6038 = vmatpush3.bf16.xpose.msra.mxu0 %v3072_v45  ;;  %6039 = vmatprep.mubr.msk.bf16.mxu0 %vm6570_vm0, %v6569_v1 }
0x1adf   : > { %6049 = vmatprep.subr.bf16.mxu0 %v6569_v1 }
0x1ae5   : > { %6040 = vmatmul.mubr.msk.bf16.vlgmr.msra.gmra.mrb[72].mxu0 %vm729_vm1, %v3284_v11 }
0x1ae6   : > { %6050 = vmatpush3.bf16.xpose.msra.mxu0 %v3072_v45  ;;  %6051 = vmatprep.mubr.msk.bf16.mxu0 %vm6570_vm0, %v6569_v1 }
0x1ae7   : > { %6061 = vmatprep.subr.bf16.mxu0 %v6569_v1 }
0x1aed   : > { %6052 = vmatmul.mubr.msk.bf16.vlgmr.msra.gmra.mrb[76].mxu0 %vm729_vm1, %v3392_v13 }
0x1aee   : > { %6062 = vmatpush3.bf16.msra.mxu0 %v6344_v12  ;;  %6065 = vmatprep.mubr.msk.bf16.mxu0 %vm6570_vm0, %v6569_v1  ;;  %v6348_v12 = vld [vmem:[%s7775_s7 + $0x24] ss:$8 sps:$4 sm:$0xff]  }
0x1aef   : > { %6063 = vmatprep.subr.bf16.mxu0 %v6569_v1 }
0x1af2   : > { %6064 = vmatpush3.bf16.msra.mxu0 %v6345_v56 }
0x1af3   : > { %6069 = vmatprep.subr.bf16.mxu0 %v6569_v1 }
0x1af5   : > { %6066 = vmatmul.mubr.msk.bf16.vlgmr.msra.gmra.mrb[80].mxu0 %vm729_vm1, %v7099_v25 }
0x1af6   : > { %6071 = vmatprep.mubr.msk.bf16.mxu0 %vm6570_vm0, %v6569_v1 }
0x1b02   : > { %v3118_v15 = vpop.xlane.xlu1 %3117 }
0x1b03   : > { %v3119_v16 = vsub.f32 %v3115_v2, %v3118_v15 }
0x1b05   : > { %v3120_v17 = vmul.f32 1.442695, %v3119_v16  ;;  %v6346_v16 = vld [vmem:[%s7775_s7 + $0x20] ss:$8 sps:$4 sm:$0xff]  }
0x1b07   : > { %6446 = vpow2.f32 %v3120_v17 }
0x1b11   : > { %v6447_v20 = vpop.eup %6446 }
0x1b12   : > { %v3122_v22 = vsel %vm885_vm4, %v6447_v20, 0.0 }
0x1b13   : > { %3123 = vadd.xlane.f32.xlu1 %v3122_v22  ;;  %v6349_v22 = vld [vmem:[%s7775_s7 + $0x30] ss:$8 sps:$4 sm:$0xff]  }
0x1ba0   : > { %v3124_v26 = vpop.xlane.xlu1 %3123 }
0x1ba1   : > { %6448 = vrcp.f32 %v3124_v26 }
0x1bab   : > { %v6449_v27 = vpop.eup %6448 }
0x1bac   : > { %v3126_v28 = vmul.f32 %v6449_v27, %v6447_v20  ;;  %v6351_v20 = vld [vmem:[%s7775_s7 + $0x34] ss:$8 sps:$4 sm:$0xff]   ;;  %s689_s7 = scalar_lea.vmem [#allocation2], %s5351_s0 }
0x1bae   : > { %v3127_v29 = vpack.c.bf16 %v3126_v28, %v3126_v28 }
0x1bb0   : > { %v3231_v30 = vpop.f32.mrb[68].mxu0  ;;  %6034 = vmatmul.mubr.msk.bf16.vlgmr.msra.gmra.mrb[84].mxu1 %vm885_vm4, %v3127_v29 }
0x1bb1   : > { %v6029_v32 = vpop.f32.mrb[69].mxu0  ;;  %6045 = vmatprep.mubr.msk.bf16.mxu1 %vm6570_vm0, %v6569_v1 }
0x1bb2   : > { %v3234_v33 = vpop.f32.mrb[70].mxu0 }
0x1bb3   : > { %v6030_v34 = vpop.f32.mrb[71].mxu0 }
0x1bb8   : > { %v3322_v59 = vpop.f32.mrb[72].mxu0 }
0x1bb9   : > { %v3328_v36 = vmul.f32 0.35355338, %v3322_v59  ;;  %v6041_v63 = vpop.f32.mrb[73].mxu0 }
0x1bba   : > { %v3325_v37 = vpop.f32.mrb[74].mxu0 }
0x1bbb   : > { %v6042_v61 = vpop.f32.mrb[75].mxu0  ;;  %v3329_v38 = vsel %vm6801_vm3, %v3328_v36, -inf }
0x1bbc   : > { %v3330_v39 = vsel %vm885_vm4, %v3329_v38, -inf }
0x1bbd   : > { %3331 = vmax.xlane.f32.xlu0 %v3330_v39 }
0x1bc0   : > { %v3430_v41 = vpop.f32.mrb[76].mxu0 }
0x1bc1   : > { %v3436_v42 = vmul.f32 0.35355338, %v3430_v41  ;;  %v6053_v43 = vpop.f32.mrb[77].mxu0 }
0x1bc2   : > { %v3433_v44 = vpop.f32.mrb[78].mxu0 }
0x1bc3   : > { %v6054_v45 = vpop.f32.mrb[79].mxu0  ;;  %v3437_v47 = vsel %vm6801_vm3, %v3436_v42, -inf }
0x1bc4   : > { %v3438_v48 = vsel %vm885_vm4, %v3437_v47, -inf }
0x1bc5   : > { %3439 = vmax.xlane.f32.xlu0 %v3438_v48 }
0x1bc8   : > { %v3587_v18 = vpop.f32.mrb[80].mxu0 }
0x1bc9   : > { %v6067_v19 = vpop.f32.mrb[81].mxu0 }
0x1bca   : > { %v3590_v21 = vpop.f32.mrb[82].mxu0 }
0x1bcb   : > { %v7302_v49 = vpack.c.bf16 %v3590_v21, %v3587_v18  ;;  %v6068_v50 = vpop.f32.mrb[83].mxu0 }
0x1c4a   : > { %v3332_v6 = vpop.xlane.xlu0 %3331 }
0x1c4b   : > { %v3333_v51 = vsub.f32 %v3329_v38, %v3332_v6 }
0x1c4d   : > { %v3334_v52 = vmul.f32 1.442695, %v3333_v51 }
0x1c4f   : > { %6450 = vpow2.f32 %v3334_v52 }
0x1c52   : > { %v3440_v53 = vpop.xlane.xlu0 %3439 }
0x1c53   : > { %v3441_v54 = vsub.f32 %v3437_v47, %v3440_v53 }
0x1c55   : > { %v3442_v55 = vmul.f32 1.442695, %v3441_v54 }
0x1c57   : > { %6452 = vpow2.f32 %v3442_v55 }
0x1c59   : > { %v6451_v40 = vpop.eup %6450 }
0x1c5a   : > { %v3336_v35 = vsel %vm885_vm4, %v6451_v40, 0.0 }
0x1c5b   : > { %3337 = vadd.xlane.f32.xlu0 %v3336_v35 }
0x1c61   : > { %v6453_v57 = vpop.eup %6452 }
0x1c62   : > { %v3444_v58 = vsel %vm885_vm4, %v6453_v57, 0.0 }
0x1c63   : > { %3445 = vadd.xlane.f32.xlu1 %v3444_v58 }
0x1c71   : > { %3342 = vrot.lane.b32.xlu0 %v7250_v46, %s7773_s24 }
0x1c74   : > { %3450 = vrot.lane.b32.xlu1 %v7250_v46, %s7776_s26 }
0x1c78   : > { %3733 = vrot.lane.b32.xlu1 %v7302_v49, %s7774_s6 }
0x1c83   : > { %v3277_v60 = vpop.f32.mrb[84].mxu1 }
0x1c84   : > { %v3278_v62 = vadd.f32 %v3277_v60, %v3231_v30  ;;  %v6035_v0 = vpop.f32.mrb[85].mxu1 }
0x1c85   : > { %v3280_v2 = vpop.f32.mrb[86].mxu1 }
0x1c86   : > { %v6036_v3 = vpop.f32.mrb[87].mxu1 }
0x1ce8   : > { %v3338_v4 = vpop.xlane.xlu0 %3337 }
0x1ce9   : > { %6454 = vrcp.f32 %v3338_v4 }
0x1cec   : > { %v3343_v5 = vpop.permute.xlu0 %3342 }
0x1ced   : > { %v3348_v7 = vsel %vm964_vm2, %v3343_v5, 0 }
0x1cee   : > { %6044 = vmatpush3.bf16.msra.mxu1 %v3348_v7 }
0x1cef   : > { %6055 = vmatprep.subr.bf16.mxu1 %v6569_v1 }
0x1cf0   : > { %v3446_v8 = vpop.xlane.xlu1 %3445 }
0x1cf1   : > { %6456 = vrcp.f32 %v3446_v8 }
0x1cf3   : > { %v6455_v14 = vpop.eup %6454 }
0x1cf4   : > { %v3340_v46 = vmul.f32 %v6455_v14, %v6451_v40  ;;  %v3451_v10 = vpop.permute.xlu1 %3450 }
0x1cf5   : > { %v3456_v13 = vsel %vm964_vm2, %v3451_v10, 0 }
0x1cf6   : > { %v3341_v11 = vpack.c.bf16 %v3340_v46, %v3340_v46 }
0x1cf8   : > { %6046 = vmatmul.mubr.msk.bf16.vlgmr.msra.gmra.mrb[88].mxu1 %vm885_vm4, %v3341_v11  ;;  %v3734_v42 = vpop.permute.xlu1 %3733 }
0x1cf9   : > { %6056 = vmatpush3.bf16.msra.mxu1 %v3456_v13  ;;  %6057 = vmatprep.mubr.msk.bf16.mxu1 %vm6570_vm0, %v6569_v1 }
0x1cfa   : > { %3614 = vmatprep.subr.bf16.mxu1 %v6348_v12 }
0x1cfb   : > { %v6457_v56 = vpop.eup %6456 }
0x1cfc   : > { %v3448_v15 = vmul.f32 %v6457_v56, %v6453_v57 }
0x1cfe   : > { %v3449_v17 = vpack.c.bf16 %v3448_v15, %v3448_v15 }
0x1d00   : > { %6058 = vmatmul.mubr.msk.bf16.vlgmr.msra.gmra.mrb[92].mxu1 %vm885_vm4, %v3449_v17 }
0x1d01   : > { %3615 = vmatpush1.bf16.msra.mxu1 %v6346_v16  ;;  %3646 = vmatprep.mubr.bf16.mxu1 %v6571_v9 }
0x1d02   : > { %3616 = vmatprep.subr.bf16.mxu1 %v6351_v20 }
0x1d05   : > { %3617 = vmatpush1.bf16.msra.mxu1 %v6349_v22 }
0x1d06   : > { %6075 = vmatprep.subr.bf16.mxu1 %v6569_v1 }
0x1d08   : > { %5488 = vmatmul.mubr.msk.bf16.vlgmr.msra.gmra.mrb[96].mxu1 %vm729_vm1, %v7099_v25 }
0x1d09   : > { %6077 = vmatprep.mubr.msk.bf16.mxu1 %vm6570_vm0, %v6569_v1 }
0x1dcb   : > { %v3384_v26 = vpop.f32.mrb[88].mxu1 }
0x1dcc   : > { %v3390_v27 = vadd.f32 %v3384_v26, %v3278_v62  ;;  %v6047_v28 = vpop.f32.mrb[89].mxu1 }
0x1dcd   : > { %v3387_v29 = vpop.f32.mrb[90].mxu1 }
0x1dce   : > { %v6048_v30 = vpop.f32.mrb[91].mxu1 }
0x1dd3   : > { %v3492_v32 = vpop.f32.mrb[92].mxu1 }
0x1dd4   : > { %v7337_v33 = vadd.f32 %v3492_v32, %v3390_v27  ;;  %v6059_v34 = vpop.f32.mrb[93].mxu1 }
0x1dd5   : > { %v3495_v59 = vpop.f32.mrb[94].mxu1 }
0x1dd6   : > { %v6060_v36 = vpop.f32.mrb[95].mxu1 }
0x1ddb   : > { %v3648_v63 = vpop.f32.mrb[96].mxu1 }
0x1ddc   : > { %v3650_v37 = vpop.f32.mrb[97].mxu1 }
0x1ddd   : > { %v3652_v61 = vpop.f32.mrb[98].mxu1 }
0x1dde   : > { %v7339_v38 = vpack.c.bf16 %v3652_v61, %v3648_v63  ;;  %v3654_v25 = vpop.f32.mrb[99].mxu1 }
0x1ddf   : > { %v3657_v39 = vpack.c.bf16 %v3654_v25, %v3650_v37 }
0x1de1   : > { %v7342_v41 = vsel %vm729_vm1, %v3657_v39, 0 }
0x1de2   : > { %6070 = vmatpush3.bf16.xpose.msra.mxu0 %v7342_v41  ;;  %6076 = vmatpush3.bf16.xpose.msra.mxu1 %v7342_v41 }
0x1de3   : > { %6087 = vmatprep.subr.bf16.mxu1 %v6569_v1  ;;  %6081 = vmatprep.subr.bf16.mxu0 %v6569_v1 }
0x1de9   : > { %6072 = vmatmul.mubr.msk.bf16.vlgmr.msra.gmra.mrb[84].mxu0 %vm729_vm1, %v7302_v49  ;;  %6078 = vmatmul.mubr.msk.bf16.vlgmr.msra.gmra.mrb[100].mxu1 %vm729_vm1, %v3734_v42 }
0x1dea   : > { %6088 = vmatpush3.bf16.msra.mxu1 %v7339_v38  ;;  %6083 = vmatprep.mubr.msk.bf16.mxu0 %vm6570_vm0, %v6569_v1 }
0x1deb   : > { %6089 = vmatprep.mubr.msk.bf16.mxu1 %vm6570_vm0, %v6569_v1  ;;  %6099 = vmatprep.subr.bf16.mxu1 %v6569_v1 }
0x1ebc   : > { %v3700_v43 = vpop.f32.mrb[84].mxu0  ;;  %v3772_v44 = vpop.f32.mrb[100].mxu1 }
0x1ebd   : > { %v3779_v45 = vmul.f32 0.35355338, %v3772_v44  ;;  %v6073_v47 = vpop.f32.mrb[85].mxu0  ;;  %v6079_v48 = vpop.f32.mrb[101].mxu1  ;;  %v3707_v53 = vmul.f32 0.35355338, %v3700_v43 }
0x1ebe   : > { %v3703_v18 = vpop.f32.mrb[86].mxu0  ;;  %v3775_v19 = vpop.f32.mrb[102].mxu1 }
0x1ebf   : > { %v3780_v21 = vmul.f32 0.35355338, %v3775_v19  ;;  %v6074_v50 = vpop.f32.mrb[87].mxu0  ;;  %v6080_v6 = vpop.f32.mrb[103].mxu1  ;;  %v3781_v51 = vsel %vm1481_vm5, %v3779_v45, -inf  ;;  %v3709_v54 = vsel %vm1481_vm5, %v3707_v53, -inf }
0x1ec0   : > { %3782 = vmax.xlane.f32.xlu0 %v3781_v51  ;;  %v3708_v5 = vmul.f32 0.35355338, %v3703_v18 }
0x1ec1   : > { %v3784_v52 = vsel %vm1481_vm5, %v3780_v21, -inf }
0x1ec2   : > { %3785 = vmax.xlane.f32.xlu1 %v3784_v52  ;;  %v3712_v7 = vsel %vm1481_vm5, %v3708_v5, -inf }
0x1ed3   : > { %3805 = vrot.lane.b32.xlu1 %v7339_v38, %s7774_s6 }
0x1ed7   : > { %4016 = vrot.lane.b32.xlu1 %v7302_v49, %s7776_s26 }
0x1efb   : > { %3710 = vmax.xlane.f32.xlu1 %v3709_v54 }
0x1f4d   : > { %v3783_v55 = vpop.xlane.xlu0 %3782 }
0x1f4e   : > { %v3787_v40 = vsub.f32 %v3779_v45, %v3783_v55 }
0x1f4f   : > { %v3786_v35 = vpop.xlane.xlu1 %3785 }
0x1f50   : > { %v3788_v57 = vsub.f32 %v3780_v21, %v3786_v35  ;;  %v3789_v58 = vmul.f32 1.442695, %v3787_v40 }
0x1f52   : > { %v3791_v60 = vmul.f32 1.442695, %v3788_v57  ;;  %6458 = vpow2.f32 %v3789_v58 }
0x1f53   : > { %v3806_v62 = vpop.permute.xlu1 %3805 }
0x1f54   : > { %6082 = vmatpush3.bf16.msra.mxu0 %v3806_v62  ;;  %6460 = vpow2.f32 %v3791_v60 }
0x1f55   : > { %6093 = vmatprep.subr.bf16.mxu0 %v6569_v1 }
0x1f57   : > { %v4017_v56 = vpop.permute.xlu1 %4016 }
0x1f5c   : > { %v6459_v0 = vpop.eup %6458 }
0x1f5d   : > { %v3793_v2 = vsel %vm1481_vm5, %v6459_v0, 0.0 }
0x1f5e   : > { %v6461_v3 = vpop.eup %6460  ;;  %3794 = vadd.xlane.f32.xlu0 %v3793_v2 }
0x1f5f   : > { %v3796_v4 = vsel %vm1481_vm5, %v6461_v3, 0.0 }
0x1f62   : > { %3797 = vadd.xlane.f32.xlu0 %v3796_v4 }
0x1f78   : > { %3896 = vrot.lane.b32.xlu0 %v7302_v49, %s7773_s24 }
0x1f88   : > { %v3711_v15 = vpop.xlane.xlu1 %3710 }
0x1f89   : > { %v3715_v22 = vsub.f32 %v3707_v53, %v3711_v15 }
0x1f8b   : > { %v3717_v29 = vmul.f32 1.442695, %v3715_v22 }
0x1f97   : > { %3713 = vmax.xlane.f32.xlu0 %v3712_v7 }
0x1feb   : > { %v3795_v8 = vpop.xlane.xlu0 %3794 }
0x1fec   : > { %6462 = vrcp.f32 %v3795_v8 }
0x1fef   : > { %v3798_v14 = vpop.xlane.xlu0 %3797 }
0x1ff0   : > { %6464 = vrcp.f32 %v3798_v14 }
0x1ff1   : > { %6466 = vpow2.f32 %v3717_v29 }
0x1ff3   : > { %v3897_v49 = vpop.permute.xlu0 %3896 }
0x1ff6   : > { %v6463_v46 = vpop.eup %6462 }
0x1ff7   : > { %v3800_v11 = vmul.f32 %v6463_v46, %v6459_v0 }
0x1ffa   : > { %v6465_v10 = vpop.eup %6464 }
0x1ffb   : > { %v3802_v12 = vmul.f32 %v6465_v10, %v6461_v3  ;;  %v6467_v48 = vpop.eup %6466 }
0x1ffc   : > { %v3721_v21 = vsel %vm1481_vm5, %v6467_v48, 0.0 }
0x1ffd   : > { %v3803_v13 = vpack.c.bf16 %v3802_v12, %v3800_v11 }
0x1fff   : > { %6084 = vmatmul.mubr.msk.bf16.vlgmr.msra.gmra.mrb[88].mxu0 %vm1481_vm5, %v3803_v13 }
0x2000   : > { %6094 = vmatpush3.bf16.xpose.msra.mxu0 %v7342_v41  ;;  %6095 = vmatprep.mubr.msk.bf16.mxu0 %vm6570_vm0, %v6569_v1 }
0x2001   : > { %6105 = vmatprep.subr.bf16.mxu0 %v6569_v1 }
0x2007   : > { %6096 = vmatmul.mubr.msk.bf16.vlgmr.msra.gmra.mrb[92].mxu0 %vm729_vm1, %v3897_v49 }
0x2008   : > { %6106 = vmatpush3.bf16.xpose.msra.mxu0 %v7342_v41  ;;  %6107 = vmatprep.mubr.msk.bf16.mxu0 %vm6570_vm0, %v6569_v1 }
0x2009   : > { %6117 = vmatprep.subr.bf16.mxu0 %v6569_v1 }
0x200f   : > { %6108 = vmatmul.mubr.msk.bf16.vlgmr.msra.gmra.mrb[96].mxu0 %vm729_vm1, %v4017_v56 }
0x2010   : > { %6121 = vmatprep.mubr.msk.bf16.mxu0 %vm6570_vm0, %v6569_v1 }
0x2024   : > { %v3714_v17 = vpop.xlane.xlu0 %3713 }
0x2025   : > { %v3716_v28 = vsub.f32 %v3708_v5, %v3714_v17 }
0x2027   : > { %v3719_v30 = vmul.f32 1.442695, %v3716_v28 }
0x2029   : > { %6468 = vpow2.f32 %v3719_v30 }
0x2033   : > { %v6469_v19 = vpop.eup %6468 }
0x2034   : > { %v3724_v50 = vsel %vm1481_vm5, %v6469_v19, 0.0 }
0x20d2   : > { %v7383_v16 = vpop.f32.mrb[88].mxu0 }
0x20d3   : > { %v6085_v20 = vpop.f32.mrb[89].mxu0 }
0x20d4   : > { %v7385_v26 = vpop.f32.mrb[90].mxu0 }
0x20d5   : > { %v6086_v27 = vpop.f32.mrb[91].mxu0 }
0x20da   : > { %v3935_v32 = vpop.f32.mrb[92].mxu0 }
0x20db   : > { %v3942_v34 = vmul.f32 0.35355338, %v3935_v32  ;;  %v6097_v59 = vpop.f32.mrb[93].mxu0 }
0x20dc   : > { %v3938_v36 = vpop.f32.mrb[94].mxu0 }
0x20dd   : > { %v3943_v63 = vmul.f32 0.35355338, %v3938_v36  ;;  %v6098_v37 = vpop.f32.mrb[95].mxu0  ;;  %v3944_v61 = vsel %vm1481_vm5, %v3942_v34, -inf }
0x20de   : > { %3945 = vmax.xlane.f32.xlu0 %v3944_v61 }
0x20df   : > { %v3947_v25 = vsel %vm1481_vm5, %v3943_v63, -inf }
0x20e0   : > { %3948 = vmax.xlane.f32.xlu1 %v3947_v25 }
0x20e2   : > { %v4055_v39 = vpop.f32.mrb[96].mxu0 }
0x20e3   : > { %v4062_v41 = vmul.f32 0.35355338, %v4055_v39  ;;  %v6109_v42 = vpop.f32.mrb[97].mxu0 }
0x20e4   : > { %v4058_v43 = vpop.f32.mrb[98].mxu0 }
0x20e5   : > { %v4063_v44 = vmul.f32 0.35355338, %v4058_v43  ;;  %v6110_v45 = vpop.f32.mrb[99].mxu0  ;;  %v4064_v47 = vsel %vm1481_vm5, %v4062_v41, -inf }
0x20e6   : > { %4065 = vmax.xlane.f32.xlu0 %v4064_v47 }
0x20e7   : > { %v4067_v18 = vsel %vm1481_vm5, %v4063_v44, -inf }
0x20e8   : > { %4068 = vmax.xlane.f32.xlu1 %v4067_v18 }
0x20ea   : > { %3722 = vadd.xlane.f32.xlu0 %v3721_v21 }
0x20ec   : > { %3725 = vadd.xlane.f32.xlu1 %v3724_v50 }
0x216b   : > { %v3946_v6 = vpop.xlane.xlu0 %3945 }
0x216c   : > { %v3950_v51 = vsub.f32 %v3942_v34, %v3946_v6 }
0x216d   : > { %v3949_v52 = vpop.xlane.xlu1 %3948 }
0x216e   : > { %v3952_v53 = vmul.f32 1.442695, %v3950_v51  ;;  %v3951_v54 = vsub.f32 %v3943_v63, %v3949_v52 }
0x2170   : > { %6470 = vpow2.f32 %v3952_v53  ;;  %v3954_v55 = vmul.f32 1.442695, %v3951_v54 }
0x2172   : > { %6472 = vpow2.f32 %v3954_v55 }
0x2173   : > { %v4066_v40 = vpop.xlane.xlu0 %4065 }
0x2174   : > { %v4070_v35 = vsub.f32 %v4062_v41, %v4066_v40 }
0x2175   : > { %v4069_v57 = vpop.xlane.xlu1 %4068 }
0x2176   : > { %v4072_v58 = vmul.f32 1.442695, %v4070_v35  ;;  %v4071_v60 = vsub.f32 %v4063_v44, %v4069_v57 }
0x2177   : > { %v3723_v62 = vpop.xlane.xlu0 %3722 }
0x2178   : > { %6474 = vpow2.f32 %v4072_v58  ;;  %v4074_v0 = vmul.f32 1.442695, %v4071_v60 }
0x2179   : > { %6476 = vrcp.f32 %v3723_v62  ;;  %v3726_v2 = vpop.xlane.xlu1 %3725 }
0x217a   : > { %v6471_v3 = vpop.eup %6470  ;;  %6478 = vpow2.f32 %v4074_v0 }
0x217b   : > { %6480 = vrcp.f32 %v3726_v2  ;;  %v3956_v4 = vsel %vm1481_vm5, %v6471_v3, 0.0 }
0x217c   : > { %v6473_v5 = vpop.eup %6472  ;;  %3957 = vadd.xlane.f32.xlu0 %v3956_v4 }
0x217d   : > { %v3959_v7 = vsel %vm1481_vm5, %v6473_v5, 0.0 }
0x217e   : > { %3960 = vadd.xlane.f32.xlu1 %v3959_v7  ;;  %v6352_v7 = vld [vmem:[%s7712_s16 + $0x10] sm:$0xff]  }
0x217f   : > { %6118 = vmatpush3.bf16.msra.mxu0 %v6352_v7 }
0x2180   : > { %6119 = vmatprep.subr.bf16.mxu0 %v6569_v1 }
0x2182   : > { %v6475_v8 = vpop.eup %6474 }
0x2183   : > { %v6477_v14 = vpop.eup %6476  ;;  %v4076_v46 = vsel %vm1481_vm5, %v6475_v8, 0.0 }
0x2184   : > { %v6479_v10 = vpop.eup %6478  ;;  %4077 = vadd.xlane.f32.xlu0 %v4076_v46  ;;  %v3728_v13 = vmul.f32 %v6477_v14, %v6467_v48  ;;  %v6356_v14 = vld [vmem:[%s7714_s18 + $0x50] sm:$0xff]   ;;  %v6357_v46 = vld [vmem:[%s7714_s18 + $0x58] sm:$0xff]  }
0x2185   : > { %v6481_v11 = vpop.eup %6480  ;;  %v4079_v12 = vsel %vm1481_vm5, %v6479_v10, 0.0 }
0x2186   : > { %v3730_v49 = vmul.f32 %v6481_v11, %v6469_v19  ;;  %4080 = vadd.xlane.f32.xlu1 %v4079_v12  ;;  %v6359_v11 = vld [vmem:[%s7714_s18 + $0x68] sm:$0xff]  }
0x2188   : > { %v3731_v56 = vpack.c.bf16 %v3730_v49, %v3728_v13 }
0x218a   : > { %6090 = vmatmul.mubr.msk.bf16.vlgmr.msra.gmra.mrb[104].mxu1 %vm1481_vm5, %v3731_v56 }
0x218b   : > { %6101 = vmatprep.mubr.msk.bf16.mxu1 %vm6570_vm0, %v6569_v1 }
0x2197   : > { %4087 = vrot.lane.b32.xlu1 %v7339_v38, %s7776_s26 }
0x219a   : > { %3967 = vrot.lane.b32.xlu0 %v7339_v38, %s7773_s24 }
0x2209   : > { %v3958_v15 = vpop.xlane.xlu0 %3957 }
0x220a   : > { %6482 = vrcp.f32 %v3958_v15 }
0x220b   : > { %v3961_v17 = vpop.xlane.xlu1 %3960 }
0x220c   : > { %6484 = vrcp.f32 %v3961_v17 }
0x2211   : > { %v4078_v20 = vpop.xlane.xlu0 %4077 }
0x2212   : > { %6486 = vrcp.f32 %v4078_v20 }
0x2213   : > { %v4081_v22 = vpop.xlane.xlu1 %4080 }
0x2214   : > { %v6483_v27 = vpop.eup %6482  ;;  %6488 = vrcp.f32 %v4081_v22  ;;  %v5499_v22 = vld [vmem:[%s7706_s10 + $0x2] ss:$0 sm:$0xff] }
0x2215   : > { %v3968_v28 = vpop.permute.xlu0 %3967  ;;  %v3963_v30 = vmul.f32 %v6483_v27, %v6471_v3  ;;  %v7420_v3 = vadd.f32 %v7337_v33, %v7222_v31  ;;  %v6353_v31 = vld [vmem:[%s7712_s16 + $0x18] sm:$0xff]   ;;  %v6354_v33 = vld [vmem:[%s7714_s18 + $0x40] sm:$0xff]  }
0x2216   : > { %v6485_v29 = vpop.eup %6484  ;;  %6100 = vmatpush3.bf16.msra.mxu1 %v3968_v28  ;;  %6120 = vmatpush3.bf16.msra.mxu0 %v6353_v31 }
0x2217   : > { %v3965_v32 = vmul.f32 %v6485_v29, %v6473_v5  ;;  %6111 = vmatprep.subr.bf16.mxu1 %v6569_v1  ;;  %v4088_v59 = vpop.permute.xlu1 %4087  ;;  %v3504_v5 = vsel %vm729_vm1, %v7420_v3, 0.0  ;;  %6145 = vmatprep.subr.bf16.mxu0 %v6569_v1 }
0x2219   : > { %v3966_v34 = vpack.c.bf16 %v3965_v32, %v3963_v30  ;;  %v5500_v32 = vld [vmem:[%s7707_s11 + $0x2] ss:$0 sm:$0xff] }
0x221b   : > { %6102 = vmatmul.mubr.msk.bf16.vlgmr.msra.gmra.mrb[108].mxu1 %vm1481_vm5, %v3966_v34 }
0x221c   : > { %v6487_v38 = vpop.eup %6486  ;;  %6112 = vmatpush3.bf16.msra.mxu1 %v4088_v59  ;;  %6113 = vmatprep.mubr.msk.bf16.mxu1 %vm6570_vm0, %v6569_v1 }
0x221d   : > { %6125 = vmatprep.subr.bf16.mxu1 %v6569_v1  ;;  %v4083_v63 = vmul.f32 %v6487_v38, %v6475_v8  ;;  %v6355_v8 = vld [vmem:[%s7714_s18 + $0x48] sm:$0xff]  }
0x221e   : > { %v6489_v36 = vpop.eup %6488 }
0x221f   : > { %v4085_v37 = vmul.f32 %v6489_v36, %v6479_v10  ;;  %v6358_v10 = vld [vmem:[%s7714_s18 + $0x60] sm:$0xff]  }
0x2221   : > { %v4086_v61 = vpack.c.bf16 %v4085_v37, %v4083_v63  ;;  %v6360_v63 = vld [vmem:[%s7714_s18 + $0x70] sm:$0xff]   ;;  %v6361_v37 = vld [vmem:[%s7714_s18 + $0x78] sm:$0xff]  }
0x2223   : > { %6114 = vmatmul.mubr.msk.bf16.vlgmr.msra.gmra.mrb[112].mxu1 %vm1481_vm5, %v4086_v61  ;;  %v5523_v61 = vld [vmem:[%s7713_s17 + $0x1] ss:$0 sm:$0xff] }
0x2224   : > { %6141 = vmatprep.mubr.msk.bf16.mxu1 %vm6570_vm0, %v6569_v1  ;;  %6126 = vmatpush3.bf16.msra.mxu1 %v6354_v33 }
0x2225   : > { %6127 = vmatprep.subr.bf16.mxu1 %v6569_v1 }
0x2228   : > { %6128 = vmatpush3.bf16.msra.mxu1 %v6355_v8 }
0x2229   : > { %6129 = vmatprep.subr.bf16.mxu1 %v6569_v1 }
0x222c   : > { %6130 = vmatpush3.bf16.msra.mxu1 %v6356_v14 }
0x222d   : > { %6131 = vmatprep.subr.bf16.mxu1 %v6569_v1 }
0x2230   : > { %6132 = vmatpush3.bf16.msra.mxu1 %v6357_v46 }
0x2231   : > { %6133 = vmatprep.subr.bf16.mxu1 %v6569_v1 }
0x2234   : > { %6134 = vmatpush3.bf16.msra.mxu1 %v6358_v10 }
0x2235   : > { %6135 = vmatprep.subr.bf16.mxu1 %v6569_v1 }
0x2238   : > { %6136 = vmatpush3.bf16.msra.mxu1 %v6359_v11  ;;  %v5471_v11 = vld [vmem:[%s7778_s8 + $0x3] ss:$0 sm:$0xff] }
0x2239   : > { %6137 = vmatprep.subr.bf16.mxu1 %v6569_v1 }
0x223c   : > { %6138 = vmatpush3.bf16.msra.mxu1 %v6360_v63 }
0x223d   : > { %6139 = vmatprep.subr.bf16.mxu1 %v6569_v1 }
0x2240   : > { %6140 = vmatpush3.bf16.msra.mxu1 %v6361_v37 }
0x2241   : > { %6165 = vmatprep.subr.bf16.mxu1 %v6569_v1 }
0x225d   : > { %v3889_v25 = vpop.f32.mrb[104].mxu1 }
0x225e   : > { %v3890_v39 = vadd.f32 %v3889_v25, %v7383_v16  ;;  %v6091_v41 = vpop.f32.mrb[105].mxu1 }
0x225f   : > { %v3892_v42 = vpop.f32.mrb[106].mxu1 }
0x2260   : > { %v3893_v43 = vadd.f32 %v3892_v42, %v7385_v26  ;;  %v6092_v44 = vpop.f32.mrb[107].mxu1 }
0x22ee   : > { %v4007_v45 = vpop.f32.mrb[108].mxu1 }
0x22ef   : > { %v4014_v47 = vadd.f32 %v4007_v45, %v3890_v39  ;;  %v6103_v48 = vpop.f32.mrb[109].mxu1 }
0x22f0   : > { %v4010_v18 = vpop.f32.mrb[110].mxu1 }
0x22f1   : > { %v4015_v19 = vadd.f32 %v4010_v18, %v3893_v43  ;;  %v6104_v21 = vpop.f32.mrb[111].mxu1 }
0x22f2   : > { %v5527_v21 = vld [vmem:[%s7715_s19 + $0x1] ss:$0 sm:$0xff] }
0x22f6   : > { %v4127_v50 = vpop.f32.mrb[112].mxu1 }
0x22f7   : > { %v4134_v6 = vadd.f32 %v4127_v50, %v4014_v47  ;;  %v6115_v51 = vpop.f32.mrb[113].mxu1 }
0x22f8   : > { %v4130_v52 = vpop.f32.mrb[114].mxu1 }
0x22f9   : > { %v4135_v53 = vadd.f32 %v4130_v52, %v4015_v19  ;;  %v6116_v54 = vpop.f32.mrb[115].mxu1  ;;  %v4136_v55 = vadd.f32 %v4134_v6, %v7093_v23 }
0x22fb   : > { %v4142_v16 = vsel %vm729_vm1, %v4136_v55, 0.0  ;;  %v4137_v40 = vadd.f32 %v4135_v53, %v7095_v24 }
0x22fc   : > { %4143 = vadd.xlane.f32.xlu1 %v4142_v16 }
0x22fd   : > { %v4145_v26 = vsel %vm729_vm1, %v4137_v40, 0.0 }
0x22fe   : > { %4146 = vadd.xlane.f32.xlu0 %v4145_v26 }
0x2389   : > { %v4144_v35 = vpop.xlane.xlu1 %4143 }
0x238a   : > { %v4148_v57 = vmul.f32 0.03125, %v4144_v35 }
0x238b   : > { %v4147_v58 = vpop.xlane.xlu0 %4146 }
0x238c   : > { %v4150_v60 = vsub.f32 %v4136_v55, %v4148_v57  ;;  %v4149_v62 = vmul.f32 0.03125, %v4147_v58 }
0x238e   : > { %v4151_v0 = vsub.f32 %v4137_v40, %v4149_v62  ;;  %v4152_v2 = vmul.f32 %v4150_v60, %v4150_v60  ;;  %v6363_v62 = vld [vmem:[%s7777_s23 + $0x18] sm:$0xff]  }
0x2390   : > { %v4154_v23 = vsel %vm729_vm1, %v4152_v2, 0.0  ;;  %v4153_v4 = vmul.f32 %v4151_v0, %v4151_v0 }
0x2391   : > { %4155 = vadd.xlane.f32.xlu0 %v4154_v23 }
0x2392   : > { %v4157_v24 = vsel %vm729_vm1, %v4153_v4, 0.0 }
0x2393   : > { %4158 = vadd.xlane.f32.xlu1 %v4157_v24 }
0x2395   : > { %3505 = vadd.xlane.f32.xlu0 %v3504_v5 }
0x241e   : > { %v4156_v12 = vpop.xlane.xlu0 %4155 }
0x241f   : > { %v4160_v13 = vmul.f32 0.03125, %v4156_v12 }
0x2420   : > { %v4159_v49 = vpop.xlane.xlu1 %4158 }
0x2421   : > { %v4162_v56 = vadd.f32 1e-05, %v4160_v13  ;;  %v4161_v15 = vmul.f32 0.03125, %v4159_v49  ;;  %v5472_v13 = vld [vmem:[%s7779_s9 + $0x3] ss:$0 sm:$0xff] }
0x2422   : > { %v3506_v18 = vpop.xlane.xlu0 %3505 }
0x2423   : > { %6490 = vrsqrt.f32 %v4162_v56  ;;  %v4163_v17 = vadd.f32 1e-05, %v4161_v15  ;;  %v3507_v19 = vmul.f32 0.03125, %v3506_v18 }
0x2425   : > { %6492 = vrsqrt.f32 %v4163_v17  ;;  %v3508_v6 = vsub.f32 %v7420_v3, %v3507_v19  ;;  %v6366_v17 = vld [vmem:[%s7781_s25 + $0x24] ss:$8 sps:$4 sm:$0xff]  }
0x2427   : > { %v3509_v35 = vmul.f32 %v3508_v6, %v3508_v6 }
0x2429   : > { %v3510_v58 = vsel %vm729_vm1, %v3509_v35, 0.0 }
0x242d   : > { %v6491_v20 = vpop.eup %6490 }
0x242e   : > { %v4166_v27 = vmul.f32 %v6491_v20, %v4150_v60  ;;  %v6362_v60 = vld [vmem:[%s7777_s23 + $0x10] sm:$0xff]   ;;  %v6364_v20 = vld [vmem:[%s7781_s25 + $0x20] ss:$8 sps:$4 sm:$0xff]  }
0x242f   : > { %v6493_v28 = vpop.eup %6492 }
0x2430   : > { %v4174_v29 = vmul.f32 %v5499_v22, %v4166_v27  ;;  %v4167_v30 = vmul.f32 %v6493_v28, %v4151_v0  ;;  %v6369_v27 = vld [vmem:[%s7781_s25 + $0x34] ss:$8 sps:$4 sm:$0xff]  }
0x2432   : > { %v4175_v34 = vmul.f32 %v5499_v22, %v4167_v30  ;;  %v4182_v59 = vadd.f32 %v5500_v32, %v4174_v29  ;;  %v6367_v22 = vld [vmem:[%s7781_s25 + $0x30] ss:$8 sps:$4 sm:$0xff]  }
0x2434   : > { %v4183_v38 = vadd.f32 %v5500_v32, %v4175_v34 }
0x2436   : > { %v4210_v36 = vpack.c.bf16 %v4183_v38, %v4182_v59 }
0x2438   : > { %6122 = vmatmul.mubr.msk.bf16.vlgmr.msra.gmra.mrb[100].mxu0 %vm729_vm1, %v4210_v36 }
0x2439   : > { %6149 = vmatprep.mubr.msk.bf16.mxu0 %vm6570_vm0, %v6569_v1  ;;  %6146 = vmatpush3.bf16.msra.mxu0 %v6362_v60 }
0x243a   : > { %6147 = vmatprep.subr.bf16.mxu0 %v6569_v1 }
0x243d   : > { %6148 = vmatpush3.bf16.msra.mxu0 %v6363_v62 }
0x243e   : > { %4509 = vmatprep.subr.bf16.mxu0 %v6366_v17 }
0x250b   : > { %v4266_v25 = vpop.f32.mrb[100].mxu0 }
0x250c   : > { %v4267_v39 = vadd.f32 %v5523_v61, %v4266_v25  ;;  %v6123_v41 = vpop.f32.mrb[101].mxu0  ;;  %v5539_v25 = vld [vmem:[%s7707_s11 + $0x3] ss:$0 sm:$0xff] }
0x250d   : > { %v4269_v42 = vpop.f32.mrb[102].mxu0 }
0x250e   : > { %v4270_v43 = vadd.f32 %v5523_v61, %v4269_v42  ;;  %v6124_v44 = vpop.f32.mrb[103].mxu0  ;;  %v4273_v45 = vmax.f32 %v4267_v39, 0.0 }
0x2510   : > { %v4274_v47 = vmax.f32 %v4270_v43, 0.0 }
0x2512   : > { %v4275_v48 = vpack.c.bf16 %v4274_v47, %v4273_v45 }
0x2514   : > { %6142 = vmatmul.mubr.bf16.vlgmr.msra.gmra.mrb[116].mxu1 %v4275_v48 }
0x2515   : > { %6167 = vmatprep.mubr.msk.bf16.mxu1 %vm6570_vm0, %v6569_v1 }
0x25e7   : > { %v4364_v50 = vpop.f32.mrb[116].mxu1 }
0x25e8   : > { %v4365_v51 = vadd.f32 %v5527_v21, %v4364_v50  ;;  %v6143_v52 = vpop.f32.mrb[117].mxu1 }
0x25e9   : > { %v4367_v53 = vpop.f32.mrb[118].mxu1 }
0x25ea   : > { %v4368_v54 = vadd.f32 %v5527_v21, %v4367_v53  ;;  %v6144_v55 = vpop.f32.mrb[119].mxu1  ;;  %v4371_v16 = vadd.f32 %v4365_v51, %v4182_v59 }
0x25ec   : > { %v4372_v40 = vadd.f32 %v4368_v54, %v4183_v38  ;;  %v4377_v26 = vsel %vm729_vm1, %v4371_v16, 0.0  ;;  %v5538_v38 = vld [vmem:[%s7706_s10 + $0x3] ss:$0 sm:$0xff] }
0x25ed   : > { %4378 = vadd.xlane.f32.xlu1 %v4377_v26 }
0x25ee   : > { %v4380_v57 = vsel %vm729_vm1, %v4372_v40, 0.0 }
0x25ef   : > { %4381 = vadd.xlane.f32.xlu0 %v4380_v57 }
0x25f1   : > { %3511 = vadd.xlane.f32.xlu1 %v3510_v58 }
0x267a   : > { %v4379_v0 = vpop.xlane.xlu1 %4378 }
0x267b   : > { %v4383_v2 = vmul.f32 0.03125, %v4379_v0 }
0x267c   : > { %v4382_v3 = vpop.xlane.xlu0 %4381 }
0x267d   : > { %v4385_v23 = vsub.f32 %v4371_v16, %v4383_v2  ;;  %v4384_v4 = vmul.f32 0.03125, %v4382_v3 }
0x267e   : > { %v3512_v24 = vpop.xlane.xlu1 %3511 }
0x267f   : > { %v4386_v5 = vsub.f32 %v4372_v40, %v4384_v4  ;;  %v3513_v7 = vmul.f32 0.03125, %v3512_v24  ;;  %v4387_v31 = vmul.f32 %v4385_v23, %v4385_v23 }
0x2681   : > { %v3514_v33 = vadd.f32 1e-05, %v3513_v7  ;;  %v4389_v8 = vsel %vm729_vm1, %v4387_v31, 0.0  ;;  %v4388_v14 = vmul.f32 %v4386_v5, %v4386_v5 }
0x2682   : > { %4390 = vadd.xlane.f32.xlu0 %v4389_v8 }
0x2683   : > { %6494 = vrsqrt.f32 %v3514_v33  ;;  %v4392_v46 = vsel %vm729_vm1, %v4388_v14, 0.0 }
0x2684   : > { %4393 = vadd.xlane.f32.xlu1 %v4392_v46 }
0x268d   : > { %v6495_v10 = vpop.eup %6494 }
0x268e   : > { %v3516_v12 = vmul.f32 %v6495_v10, %v3508_v6 }
0x2690   : > { %v3523_v49 = vmul.f32 %v5471_v11, %v3516_v12 }
0x2692   : > { %v7502_v56 = vadd.f32 %v5472_v13, %v3523_v49 }
0x2694   : > { %v4429_v15 = vpack.c.bf16 %v7502_v56, %v7502_v56 }
0x2696   : > { %6150 = vmatmul.mubr.msk.bf16.vlgmr.msra.gmra.mrb[104].mxu0 %vm729_vm1, %v4429_v15 }
0x2697   : > { %4541 = vmatprep.mubr.bf16.mxu0 %v6571_v9  ;;  %4510 = vmatpush1.bf16.msra.mxu0 %v6364_v20 }
0x2698   : > { %4511 = vmatprep.subr.bf16.mxu0 %v6369_v27 }
0x269b   : > { %4512 = vmatpush1.bf16.msra.mxu0 %v6367_v22 }
0x269c   : > { %6153 = vmatprep.subr.bf16.mxu0 %v6569_v1 }
0x270f   : > { %v4391_v9 = vpop.xlane.xlu0 %4390 }
0x2710   : > { %v4395_v28 = vmul.f32 0.03125, %v4391_v9 }
0x2711   : > { %v4394_v29 = vpop.xlane.xlu1 %4393 }
0x2712   : > { %v4397_v30 = vadd.f32 1e-05, %v4395_v28  ;;  %v4396_v32 = vmul.f32 0.03125, %v4394_v29 }
0x2714   : > { %6496 = vrsqrt.f32 %v4397_v30  ;;  %v4398_v34 = vadd.f32 1e-05, %v4396_v32 }
0x2716   : > { %6498 = vrsqrt.f32 %v4398_v34 }
0x271e   : > { %v6497_v59 = vpop.eup %6496 }
0x271f   : > { %v4401_v36 = vmul.f32 %v6497_v59, %v4385_v23 }
0x2720   : > { %v6499_v63 = vpop.eup %6498 }
0x2721   : > { %v4409_v37 = vmul.f32 %v5538_v38, %v4401_v36  ;;  %v4402_v61 = vmul.f32 %v6499_v63, %v4386_v5 }
0x2723   : > { %v4410_v39 = vmul.f32 %v5538_v38, %v4402_v61  ;;  %v4417_v41 = vadd.f32 %v5539_v25, %v4409_v37 }
0x2725   : > { %v4418_v42 = vadd.f32 %v5539_v25, %v4410_v39 }
0x2727   : > { %v4430_v43 = vpack.c.bf16 %v4418_v42, %v4417_v41 }
0x2729   : > { %5555 = vmatmul.mubr.msk.bf16.vlgmr.msra.gmra.mrb[108].mxu0 %vm729_vm1, %v4430_v43 }
0x272a   : > { %6155 = vmatprep.mubr.msk.bf16.mxu0 %vm6570_vm0, %v6569_v1 }
0x2769   : > { %v4480_v44 = vpop.f32.mrb[104].mxu0 }
0x276a   : > { %v4553_v45 = vpack.c.bf16 %v4480_v44, %v4480_v44  ;;  %v6151_v47 = vpop.f32.mrb[105].mxu0 }
0x276b   : > { %v4483_v48 = vpop.f32.mrb[106].mxu0 }
0x276c   : > { %4604 = vrot.lane.b32.xlu0 %v4553_v45, %s7774_s6  ;;  %v6152_v18 = vpop.f32.mrb[107].mxu0 }
0x2770   : > { %4835 = vrot.lane.b32.xlu0 %v4553_v45, %s7776_s26 }
0x27de   : > { %v4605_v54 = vpop.permute.xlu0 %4604 }
0x27e2   : > { %v4836_v5 = vpop.permute.xlu0 %4835 }
0x27fc   : > { %v4543_v19 = vpop.f32.mrb[108].mxu0 }
0x27fd   : > { %v4545_v21 = vpop.f32.mrb[109].mxu0 }
0x27fe   : > { %v4547_v50 = vpop.f32.mrb[110].mxu0 }
0x27ff   : > { %v4554_v6 = vpack.c.bf16 %v4547_v50, %v4543_v19  ;;  %v4549_v51 = vpop.f32.mrb[111].mxu0  ;;  %v6372_v50 = vld [vmem:[%s7710_s14 + $0x40] sm:$0xff]  }
0x2800   : > { %v4552_v52 = vpack.c.bf16 %v4549_v51, %v4545_v21  ;;  %v6370_v21 = vld [vmem:[%s7708_s12 + $0x10] sm:$0xff]  }
0x2801   : > { %4882 = vrot.lane.b32.xlu0 %v4554_v6, %s7776_s26  ;;  %4652 = vrot.lane.b32.xlu1 %v4554_v6, %s7774_s6  ;;  %v6374_v51 = vld [vmem:[%s7710_s14 + $0x50] sm:$0xff]   ;;  %s7783_s6 = sld [smem:[#allocation9_spill]]  ;;  %s5276_s26 = sshll.u32 %s689_s7, 4  ;;  %s7656_s26 = int_to_ptr.vmem [resolvable:$true] %s5276_s26 }
0x2802   : > { %v4559_v53 = vsel %vm729_vm1, %v4552_v52, 0  ;;  %v6375_v52 = vld [vmem:[%s7710_s14 + $0x58] sm:$0xff]   ;;  %s6505_s1 = scalar_lea.vmem %s7656_s26, 128 }
0x2803   : > { %6154 = vmatpush3.bf16.xpose.msra.mxu0 %v4559_v53  ;;  %p6506_p11 = scmp.ne.s32.totalorder %s7656_s26, %s6505_s1 }
0x2804   : > { %6159 = vmatprep.subr.bf16.mxu0 %v6569_v1 }
0x2805   : > { %4741 = vrot.lane.b32.xlu1 %v4553_v45, %s7773_s24  ;;  %p6507_p12 = pnand %p6506_p11, %p6730_p5 }
0x2807   : > { %s5610_s2 = sshll.u32 %s7783_s6, 7  ;;  %p6508_p13 = pneg %p6507_p12 }
0x2808   : > { %s6576_s6 = smov [#allocation2]  }
0x2809   : > { %4788 = vrot.lane.b32.xlu1 %v4554_v6, %s7773_s24  ;;  %s7785_s24 = sld [smem:[#allocation24_spill]]  ;;  %s6509_s0 = sshll.u32 %s6576_s6, 4  ;;  %s6510_s0 = int_to_ptr.vmem [resolvable:$false] %s6509_s0 }
0x280a   : > { %6156 = vmatmul.mubr.msk.bf16.vlgmr.msra.gmra.mrb[112].mxu0 %vm729_vm1, %v4553_v45  ;;  %s6511_s22 = scalar_lea.vmem %s6510_s0, 256  ;;  %p6512_p0 = scmp.lt.s32.totalorder %s7656_s26, %s6510_s0 }
0x280b   : > { %6160 = vmatpush3.bf16.xpose.msra.mxu0 %v4559_v53  ;;  %6161 = vmatprep.mubr.msk.bf16.mxu0 %vm6570_vm0, %v6569_v1  ;;  %p6513_p1 = scmp.lt.s32.totalorder %s6511_s22, %s6505_s1 }
0x280c   : > { %6171 = vmatprep.subr.bf16.mxu0 %v6569_v1 }
0x280d   : > { %p6514_p2 = por %p6513_p1, %p6512_p0 }
0x280f   : > { %p6515_p3 = pnand %p6514_p2, %p6508_p13 }
0x2812   : > { %6162 = vmatmul.mubr.msk.bf16.vlgmr.msra.gmra.mrb[116].mxu0 %vm729_vm1, %v4605_v54  ;;  %v6377_v54 = vld [vmem:[%s7710_s14 + $0x68] sm:$0xff]  }
0x2813   : > { %6172 = vmatpush3.bf16.msra.mxu0 %v4554_v6  ;;  %6173 = vmatprep.mubr.msk.bf16.mxu0 %vm6570_vm0, %v6569_v1  ;;  %v6373_v6 = vld [vmem:[%s7710_s14 + $0x48] sm:$0xff]  }
0x2814   : > { %6183 = vmatprep.subr.bf16.mxu0 %v6569_v1 }
0x2873   : > { %v4653_v55 = vpop.permute.xlu1 %4652  ;;  %v4883_v27 = vpop.permute.xlu0 %4882 }
0x2874   : > { %6166 = vmatpush3.bf16.msra.mxu1 %v4653_v55 }
0x2875   : > { %6177 = vmatprep.subr.bf16.mxu1 %v6569_v1 }
0x2877   : > { %v4742_v16 = vpop.permute.xlu1 %4741 }
0x287b   : > { %v4789_v62 = vpop.permute.xlu1 %4788 }
0x28dd   : > { %v4595_v40 = vpop.f32.mrb[112].mxu0 }
0x28de   : > { %v4601_v26 = vmul.f32 0.35355338, %v4595_v40  ;;  %v6157_v35 = vpop.f32.mrb[113].mxu0 }
0x28df   : > { %v4598_v57 = vpop.f32.mrb[114].mxu0  ;;  %v5566_v35 = vld [vmem:[%s7778_s8 + $0x4] ss:$0 sm:$0xff] }
0x28e0   : > { %v4602_v58 = vpack.c.bf16 %v4601_v26, %v4601_v26  ;;  %v6158_v60 = vpop.f32.mrb[115].mxu0 }
0x28e2   : > { %6174 = vmatmul.mubr.msk.bf16.vlgmr.msra.gmra.mrb[120].mxu0 %vm1481_vm5, %v4602_v58  ;;  %v5567_v58 = vld [vmem:[%s7779_s9 + $0x4] ss:$0 sm:$0xff] }
0x28e3   : > { %6184 = vmatpush3.bf16.msra.mxu0 %v4789_v62  ;;  %6185 = vmatprep.mubr.msk.bf16.mxu0 %vm6570_vm0, %v6569_v1 }
0x28e4   : > { %6195 = vmatprep.subr.bf16.mxu0 %v6569_v1 }
0x28e5   : > { %v4643_v0 = vpop.f32.mrb[116].mxu0 }
0x28e6   : > { %v4649_v2 = vmul.f32 0.35355338, %v4643_v0  ;;  %v6163_v3 = vpop.f32.mrb[117].mxu0 }
0x28e7   : > { %v4646_v23 = vpop.f32.mrb[118].mxu0  ;;  %v6379_v3 = vld [vmem:[%s7710_s14 + $0x78] sm:$0xff]  }
0x28e8   : > { %v4650_v4 = vpack.c.bf16 %v4649_v2, %v4649_v2  ;;  %v6164_v24 = vpop.f32.mrb[119].mxu0  ;;  %v6378_v2 = vld [vmem:[%s7710_s14 + $0x70] sm:$0xff]   ;;  %v5590_v23 = vld [vmem:[%s7709_s13 + $0x1] ss:$0 sm:$0xff] }
0x28ea   : > { %6168 = vmatmul.mubr.msk.bf16.vlgmr.msra.gmra.mrb[120].mxu1 %vm1481_vm5, %v4650_v4 }
0x28eb   : > { %6178 = vmatpush3.bf16.xpose.msra.mxu1 %v4559_v53  ;;  %6179 = vmatprep.mubr.msk.bf16.mxu1 %vm6570_vm0, %v6569_v1 }
0x28ec   : > { %6189 = vmatprep.subr.bf16.mxu1 %v6569_v1 }
0x28f2   : > { %6180 = vmatmul.mubr.msk.bf16.vlgmr.msra.gmra.mrb[124].mxu1 %vm729_vm1, %v4742_v16 }
0x28f3   : > { %6190 = vmatpush3.bf16.xpose.msra.mxu1 %v4559_v53  ;;  %6191 = vmatprep.mubr.msk.bf16.mxu1 %vm6570_vm0, %v6569_v1  ;;  %v6376_v53 = vld [vmem:[%s7710_s14 + $0x60] sm:$0xff]  }
0x28f4   : > { %6201 = vmatprep.subr.bf16.mxu1 %v6569_v1 }
0x28fa   : > { %6192 = vmatmul.mubr.msk.bf16.vlgmr.msra.gmra.mrb[128].mxu1 %vm729_vm1, %v4836_v5 }
0x28fb   : > { %6205 = vmatprep.mubr.msk.bf16.mxu1 %vm6570_vm0, %v6569_v1  ;;  %6202 = vmatpush3.bf16.msra.mxu1 %v6370_v21 }
0x28fc   : > { %6203 = vmatprep.subr.bf16.mxu1 %v6569_v1 }
0x29b5   : > { %v4735_v7 = vpop.f32.mrb[120].mxu0 }
0x29b6   : > { %v6175_v31 = vpop.f32.mrb[121].mxu0 }
0x29b7   : > { %v4738_v33 = vpop.f32.mrb[122].mxu0 }
0x29b8   : > { %v6176_v8 = vpop.f32.mrb[123].mxu0 }
0x29bd   : > { %v4692_v14 = vpop.f32.mrb[120].mxu1 }
0x29be   : > { %v4736_v46 = vadd.f32 %v4735_v7, %v4692_v14  ;;  %v6169_v10 = vpop.f32.mrb[121].mxu1  ;;  %v5594_v14 = vld [vmem:[%s7711_s15 + $0x1] ss:$0 sm:$0xff] }
0x29bf   : > { %v4695_v11 = vpop.f32.mrb[122].mxu1 }
0x29c0   : > { %v6170_v12 = vpop.f32.mrb[123].mxu1 }
0x29c5   : > { %v4780_v13 = vpop.f32.mrb[124].mxu1 }
0x29c6   : > { %v4786_v49 = vmul.f32 0.35355338, %v4780_v13  ;;  %v6181_v15 = vpop.f32.mrb[125].mxu1 }
0x29c7   : > { %v4783_v17 = vpop.f32.mrb[126].mxu1 }
0x29c8   : > { %v4787_v20 = vpack.c.bf16 %v4786_v49, %v4786_v49  ;;  %v6182_v22 = vpop.f32.mrb[127].mxu1 }
0x29ca   : > { %6186 = vmatmul.mubr.msk.bf16.vlgmr.msra.gmra.mrb[124].mxu0 %vm1481_vm5, %v4787_v20 }
0x29cb   : > { %6196 = vmatpush3.bf16.msra.mxu0 %v4883_v27  ;;  %6197 = vmatprep.mubr.msk.bf16.mxu0 %vm6570_vm0, %v6569_v1 }
0x29cc   : > { %6209 = vmatprep.subr.bf16.mxu0 %v6569_v1 }
0x29cd   : > { %v4874_v9 = vpop.f32.mrb[128].mxu1 }
0x29ce   : > { %v4880_v28 = vmul.f32 0.35355338, %v4874_v9  ;;  %v6193_v29 = vpop.f32.mrb[129].mxu1 }
0x29cf   : > { %v4877_v30 = vpop.f32.mrb[130].mxu1 }
0x29d0   : > { %v4881_v32 = vpack.c.bf16 %v4880_v28, %v4880_v28  ;;  %v6194_v34 = vpop.f32.mrb[131].mxu1  ;;  %v5178_v28 = vld [vmem:[%s7716_s20 + $0x8] sm:$0xff]  ;;  %v6575_v30 = vmov 0.0|0.0  }
0x29d1   : > { %v5180_v34 = vld [vmem:[%s7716_s20 + $0x18] sm:$0xff] }
0x29d2   : > { %6198 = vmatmul.mubr.msk.bf16.vlgmr.msra.gmra.mrb[128].mxu0 %vm1481_vm5, %v4881_v32  ;;  %v5179_v32 = vld [vmem:[%s7716_s20 + $0x10] sm:$0xff] }
0x29d3   : > { %6225 = vmatprep.mubr.msk.bf16.mxu0 %vm6570_vm0, %v6569_v1  ;;  %6210 = vmatpush3.bf16.msra.mxu0 %v6372_v50 }
0x29d4   : > { %6211 = vmatprep.subr.bf16.mxu0 %v6569_v1 }
0x29d7   : > { %6212 = vmatpush3.bf16.msra.mxu0 %v6373_v6 }
0x29d8   : > { %6213 = vmatprep.subr.bf16.mxu0 %v6569_v1 }
0x29db   : > { %6214 = vmatpush3.bf16.msra.mxu0 %v6374_v51 }
0x29dc   : > { %6215 = vmatprep.subr.bf16.mxu0 %v6569_v1 }
0x29df   : > { %6216 = vmatpush3.bf16.msra.mxu0 %v6375_v52 }
0x29e0   : > { %6217 = vmatprep.subr.bf16.mxu0 %v6569_v1 }
0x29e3   : > { %6218 = vmatpush3.bf16.msra.mxu0 %v6376_v53 }
0x29e4   : > { %6219 = vmatprep.subr.bf16.mxu0 %v6569_v1 }
0x29e7   : > { %6220 = vmatpush3.bf16.msra.mxu0 %v6377_v54 }
0x29e8   : > { %6221 = vmatprep.subr.bf16.mxu0 %v6569_v1 }
0x29eb   : > { %6222 = vmatpush3.bf16.msra.mxu0 %v6378_v2 }
0x29ec   : > { %6223 = vmatprep.subr.bf16.mxu0 %v6569_v1 }
0x29ef   : > { %6224 = vmatpush3.bf16.msra.mxu0 %v6379_v3 }
0x29f0   : > { %6240 = vmatprep.subr.bf16.mxu0 %v6575_v30 }
0x2a9d   : > { %v4828_v59 = vpop.f32.mrb[124].mxu0 }
0x2a9e   : > { %v4834_v38 = vadd.f32 %v4828_v59, %v4736_v46  ;;  %v6187_v36 = vpop.f32.mrb[125].mxu0  ;;  %v6244_v59 = vpack.c.bf16 %v5180_v34, %v5179_v32 }
0x2a9f   : > { %v4831_v63 = vpop.f32.mrb[126].mxu0 }
0x2aa0   : > { %v6188_v37 = vpop.f32.mrb[127].mxu0 }
0x2aa5   : > { %v4922_v61 = vpop.f32.mrb[128].mxu0 }
0x2aa6   : > { %v4928_v25 = vadd.f32 %v4922_v61, %v4834_v38  ;;  %v6199_v39 = vpop.f32.mrb[129].mxu0  ;;  %v5605_v61 = vld [vmem:[%s7778_s8 + $0x5] ss:$0 sm:$0xff]  ;;  %s7787_s8 = smov %s7786_s28 }
0x2aa7   : > { %v4925_v41 = vpop.f32.mrb[130].mxu0  ;;  %v5606_v39 = vld [vmem:[%s7779_s9 + $0x5] ss:$0 sm:$0xff]  ;;  %s7654_s9 = scalar_lea.hbm %s7786_s28, %s5610_s2 }
0x2aa8   : > { %v4929_v42 = vadd.f32 %v4928_v25, %v7502_v56  ;;  %v6200_v43 = vpop.f32.mrb[131].mxu0  ;;  %v6371_v56 = vld [vmem:[%s7708_s12 + $0x18] sm:$0xff]  }
0x2aa9   : > { %6204 = vmatpush3.bf16.msra.mxu1 %v6371_v56  ;;  %v5607_v43 = vld [vmem:[%s7785_s24] ss:$0 sm:$0xff] }
0x2aaa   : > { %v4934_v44 = vsel %vm729_vm1, %v4929_v42, 0.0 }
0x2aab   : > { %4935 = vadd.xlane.f32.xlu1 %v4934_v44 }
0x2b38   : > { %v4936_v45 = vpop.xlane.xlu1 %4935 }
0x2b39   : > { %v4937_v47 = vmul.f32 0.03125, %v4936_v45 }
0x2b3b   : > { %v4938_v48 = vsub.f32 %v4929_v42, %v4937_v47 }
0x2b3d   : > { %v4939_v18 = vmul.f32 %v4938_v48, %v4938_v48 }
0x2b3f   : > { %v4940_v19 = vsel %vm729_vm1, %v4939_v18, 0.0 }
0x2b40   : > { %4941 = vadd.xlane.f32.xlu0 %v4940_v19 }
0x2bcd   : > { %v4942_v55 = vpop.xlane.xlu0 %4941 }
0x2bce   : > { %v4943_v16 = vmul.f32 0.03125, %v4942_v55 }
0x2bd0   : > { %v4944_v40 = vadd.f32 1e-05, %v4943_v16 }
0x2bd2   : > { %6500 = vrsqrt.f32 %v4944_v40 }
0x2bdc   : > { %v6501_v26 = vpop.eup %6500 }
0x2bdd   : > { %v4946_v57 = vmul.f32 %v6501_v26, %v4938_v48 }
0x2bdf   : > { %v4953_v60 = vmul.f32 %v5566_v35, %v4946_v57 }
0x2be1   : > { %v4960_v62 = vadd.f32 %v5567_v58, %v4953_v60 }
0x2be3   : > { %v4987_v0 = vpack.c.bf16 %v4960_v62, %v4960_v62 }
0x2be5   : > { %6206 = vmatmul.mubr.msk.bf16.vlgmr.msra.gmra.mrb[132].mxu1 %vm729_vm1, %v4987_v0 }
0x2cb8   : > { %v5043_v4 = vpop.f32.mrb[132].mxu1 }
0x2cb9   : > { %v5044_v24 = vadd.f32 %v5590_v23, %v5043_v4  ;;  %v6207_v5 = vpop.f32.mrb[133].mxu1 }
0x2cba   : > { %v5046_v7 = vpop.f32.mrb[134].mxu1 }
0x2cbb   : > { %v5049_v31 = vmax.f32 %v5044_v24, 0.0  ;;  %v6208_v33 = vpop.f32.mrb[135].mxu1 }
0x2cbd   : > { %v5050_v8 = vpack.c.bf16 %v5049_v31, %v5049_v31 }
0x2cbf   : > { %6226 = vmatmul.mubr.bf16.vlgmr.msra.gmra.mrb[132].mxu0 %v5050_v8 }
0x2cc0   : > { %6237 = vmatprep.mubr.msk.f32.mxu0 %vm6570_vm0, %v6569_v1  ;;  %v5177_v1 = vld [vmem:[%s7716_s20] sm:$0xff] }
0x2cc1   : > { %v6241_v29 = vpack.c.bf16 %v5178_v28, %v5177_v1 }
0x2cc3   : > { %6242 = vmatpush3.bf16.msra.mxu0 %v6241_v29 }
0x2cc4   : > { %6243 = vmatprep.subr.bf16.mxu0 %v6575_v30 }
0x2cc7   : > { %6245 = vmatpush3.bf16.msra.mxu0 %v6244_v59 }
0x2d92   : > { %v5139_v46 = vpop.f32.mrb[132].mxu0 }
0x2d93   : > { %v5140_v10 = vadd.f32 %v5594_v14, %v5139_v46  ;;  %v6227_v11 = vpop.f32.mrb[133].mxu0 }
0x2d94   : > { %v5142_v12 = vpop.f32.mrb[134].mxu0 }
0x2d95   : > { %v5145_v13 = vadd.f32 %v5140_v10, %v4960_v62  ;;  %v6228_v49 = vpop.f32.mrb[135].mxu0 }
0x2d97   : > { %v5150_v15 = vsel %vm729_vm1, %v5145_v13, 0.0 }
0x2d98   : > { %5151 = vadd.xlane.f32.xlu0 %v5150_v15 }
0x2e25   : > { %v5152_v17 = vpop.xlane.xlu0 %5151 }
0x2e26   : > { %v5153_v20 = vmul.f32 0.03125, %v5152_v17 }
0x2e28   : > { %v5154_v22 = vsub.f32 %v5145_v13, %v5153_v20 }
0x2e2a   : > { %v5155_v27 = vmul.f32 %v5154_v22, %v5154_v22 }
0x2e2c   : > { %v5156_v9 = vsel %vm729_vm1, %v5155_v27, 0.0 }
0x2e2d   : > { %5157 = vadd.xlane.f32.xlu1 %v5156_v9 }
0x2eba   : > { %v5158_v38 = vpop.xlane.xlu1 %5157 }
0x2ebb   : > { %v5159_v36 = vmul.f32 0.03125, %v5158_v38 }
0x2ebd   : > { %v5160_v63 = vadd.f32 1e-05, %v5159_v36 }
0x2ebf   : > { %6502 = vrsqrt.f32 %v5160_v63 }
0x2ec9   : > { %v6503_v37 = vpop.eup %6502 }
0x2eca   : > { %v5162_v25 = vmul.f32 %v6503_v37, %v5154_v22 }
0x2ecc   : > { %v5169_v41 = vmul.f32 %v5605_v61, %v5162_v25 }
0x2ece   : > { %v5176_v42 = vadd.f32 %v5606_v39, %v5169_v41 }
0x2ed0   : > { %6238 = vmatmul.mubr.msk.f32.vlgmr.msra.gmra.mrb[136].mxu0 %vm729_vm1, %v5176_v42 }
0x2fa3   : > { %v5257_v44 = vpop.f32.mrb[136].mxu0 }
0x2fa4   : > { %v5258_v45 = vadd.f32 %v5607_v43, %v5257_v44  ;;  %v6239_v47 = vpop.f32.mrb[137].mxu0 }
0x2fa6   : > { %5261 = vst [vmem:[%s689_s7] sm:$0xff] %v5258_v45 }
0x2fa7   : > { %6518 = shalt.err (!%p6515_p3)
}
0x2fa8   : > { %s6519_s7 = scalar_lea.hbm %s7654_s9, 128  ;;  %s6523_s24 = scalar_lea.hbm %s7787_s8, 256 }
0x2fa9   : > { %p6520_p4 = scmp.ne.s32.totalorder %s7654_s9, %s6519_s7  ;;  %p6524_p9 = scmp.lt.u32.totalorder %s7654_s9, %s7787_s8 }
0x2faa   : > { %p6525_p10 = scmp.lt.u32.totalorder %s6523_s24, %s6519_s7  ;;  %p6527_p12 = scmp.lt.u32.totalorder %s6519_s7, %s7654_s9 }
0x2fab   : > { %p6521_p7 = pnand %p6520_p4, %p6730_p5 }
0x2fac   : > { %p6526_p11 = por %p6525_p10, %p6524_p9 }
0x2fad   : > { %p6522_p8 = pneg %p6521_p7 }
0x2fae   : > { %p6528_p13 = por %p6527_p12, %p6526_p11 }
0x2fb0   : > { %p6529_p0 = pnand %p6528_p13, %p6522_p8 }
0x2fb2   : > { %6532 = shalt.err (!%p6529_p0)
}
0x2fb3   : > { %6246 = dma.vmem_to_hbm [thread:$0]  (%p6730_p5), %s7656_s26, 128, %s7654_s9, %s5263_s5  }
0x2fb4 PF: > { %s7788_s28 = sld [smem:[#allocation8_spill]]  ;;  %s7789_s1 = sld [smem:[#allocation5_spill]] }
0x2fba   : > { %p6252_p1 = scmp.ge.s32.totalorder %s7788_s28, 2  ;;  %s5288_s0 = sand.u32 1, %s7789_s1  }
0x2fbb   : > { %s5289_s22 = scalar_lea.sflag [#allocation3], %s5288_s0 }
0x2fbc   : > { %p6249_p2 = pnand %p6252_p1, %p6734_p6 }
0x2fbe   : > { %6550 = dma.done.wait (!%p6249_p2), %s5289_s22, 128  }
0x2fbf   : > { %6552 = vsyncadd (!%p6249_p2), %s5289_s22, 4294967168  ;;  %s7791_s30 = sld [smem:[#allocation10_spill]]  ;;  %s7792_s3 = sld [smem:[#allocation6_spill]] }
0x2fc0   : > { %s7793_s28 = sld [smem:[#allocation7_spill]]  ;;  %s7794_s29 = sld [smem:[#allocation11_spill]] }
0x2fc5   : > { %p32_p3 = scmp.ge.s32.totalorder %s7791_s30, 4  }
0x2fc7   :  { %34 = sbr.rel (!%p32_p3) target bundleno = 16 (0x10), region = 176 }
0x2fce   :  { %5294 = vsyncpa [#allocation3], 1 }
0x2fcf   :  { %5296 = vsyncpa [#allocation3 + $0x1], 1 }

</bundles_post_ra>
